<compile_context>
chip_gen: v7x
topology: tpu7x:2x2x1
jax: 0.10.0
libtpu: 0.0.40
codegen_flags: <defaults>
</compile_context>

<pallas_src>
import functools

import jax
import jax.numpy as jnp
from jax.experimental import pallas as pl
from jax.experimental.pallas import tpu as pltpu


C_STEM = 16     # stem / MBConv output channels
C_EXP = 64      # MBConv expanded channels
C_SE = 4        # squeeze-excite bottleneck
C_HEAD = 64     # head channels
N_BBOX = 4      # bbox regression outputs
K_STEM = 32     # 3*3*3 = 27 im2col taps, zero-padded to a sublane multiple
OUT_LANES = 128  # lane-dense bbox output width (real bboxes live in lanes [:4])
BIAS_ROWS = 16   # packed bias matrix rows (sublane multiple)


def _silu(x):
    return x * jax.nn.sigmoid(x)


# ----------------------------------------------------------------------------
# One fused Pallas kernel: per grid step it runs the whole forward for BB images.
# ----------------------------------------------------------------------------
def _obj_loc_kernel(cols_ref, bias_ref,
                    w_stem_ref, w_exp_ref, w_dw_ref,
                    w_se1_ref, w_se2_ref, w_proj_ref, w_head_ref, w_cls_ref,
                    bbox_ref,
                    xe_pad_ref,
                    *, bb, ho, wo, pad_rows, act_dtype):
    f32 = jnp.float32
    hw = ho * wo

    # --- re-zero only the pad rows of the persistent depthwise scratch -------
    # (must be per-step: "parallel" grid means a core may never run step 0)
    zpad = jnp.zeros((pad_rows, C_EXP), act_dtype)
    xe_pad_ref[pl.ds(0, pad_rows), :] = zpad
    xe_pad_ref[pl.ds(pad_rows + hw, pad_rows), :] = zpad

    # --- unpack the consolidated (16,128) f32 bias/scale matrix --------------
    bias = bias_ref[...]
    b_stem = bias[0:1, :C_STEM]
    b_exp = bias[1:2, :C_EXP]
    s_dw = bias[2:3, :C_EXP]
    b_dw = bias[3:4, :C_EXP]
    b_se1 = bias[4:5, :C_SE]
    b_se2 = bias[5:6, :C_EXP]
    b_proj = bias[6:7, :C_STEM]
    b_head = bias[7:8, :C_HEAD]
    b_cls = bias[8:9, :]                                     # (1, 128)

    # ---- Stem: 3x3 stride-2 conv (im2col matmul) + folded BN + SiLU ---------
    cols = cols_ref[...].reshape(bb * hw, K_STEM)            # bf16
    xs = _silu(jnp.dot(cols, w_stem_ref[...],
                       preferred_element_type=f32) + b_stem)  # (bb*hw, 16) f32

    # ---- MBConv expand 1x1 + BN + SiLU --------------------------------------
    xe = _silu(jnp.dot(xs.astype(jnp.bfloat16), w_exp_ref[...],
                       preferred_element_type=f32) + b_exp)
    xe = xe.astype(act_dtype)                                # (bb*hw, 64)

    # ---- Depthwise 3x3 (pad 1, stride 1) -------------------------------------
    # Hoisted column-boundary masks (shared by all taps / all images of the step).
    win_len = hw + 2 * wo
    col_q = jax.lax.broadcasted_iota(jnp.int32, (win_len, 1), 0) % wo
    mask_l = (col_q != 0).astype(act_dtype)       # kills wrap for dj = -1
    mask_r = (col_q != wo - 1).astype(act_dtype)  # kills wrap for dj = +1
    w_dw = w_dw_ref[...].astype(act_dtype)        # (16, 64), rows 0..8 used
    base0 = pad_rows - wo                         # aligned window base

    xg_parts = []
    for b in range(bb):                           # static per-image loop
        # write this image's expanded activation into the middle of the scratch
        xe_b = xe[b * hw:(b + 1) * hw, :]
        xe_pad_ref[pl.ds(pad_rows, hw), :] = xe_b

        # 3 dj-shifted windows (only 2 misaligned loads); masks applied once per window
        win_l = xe_pad_ref[pl.ds(base0 - 1, win_len), :] * mask_l
        win_c = xe_pad_ref[pl.ds(base0, win_len), :]
        win_r = xe_pad_ref[pl.ds(base0 + 1, win_len), :] * mask_r

        acc = jnp.zeros((hw, C_EXP), f32)
        for ki in range(3):                       # di = ki - 1
            q0 = ki * wo                          # 0 / wo / 2*wo -> sublane aligned
            for kj, win in ((0, win_l), (1, win_c), (2, win_r)):
                k = ki * 3 + kj
                acc = acc + win[q0:q0 + hw, :] * w_dw[k:k + 1, :]
        xd = _silu((acc * s_dw + b_dw).astype(act_dtype))    # (hw, 64)

        # ---- Squeeze-excite: pool -> 64->4 SiLU -> 4->64 sigmoid -> gate -----
        pooled = jnp.mean(xd.astype(f32), axis=0, keepdims=True)        # (1, 64)
        se = _silu(jnp.dot(pooled, w_se1_ref[...],
                           preferred_element_type=f32) + b_se1)
        se = jax.nn.sigmoid(jnp.dot(se, w_se2_ref[...],
                                    preferred_element_type=f32) + b_se2)
        xg_parts.append(xd * se.astype(act_dtype))

    xg = xg_parts[0] if bb == 1 else jnp.concatenate(xg_parts, axis=0)  # (bb*hw, 64)

    # ---- MBConv project 1x1 + BN + residual (64 -> 16, stride 1) ------------
    xp = (jnp.dot(xg.astype(jnp.bfloat16), w_proj_ref[...],
                  preferred_element_type=f32) + b_proj + xs)            # (bb*hw, 16) f32

    # ---- Head: 1x1 conv + BN + SiLU, global avg pool, linear -> 4 bboxes ----
    xh = _silu((jnp.dot(xp.astype(jnp.bfloat16), w_head_ref[...],
                        preferred_element_type=f32) + b_head).astype(act_dtype))
    feats = [jnp.mean(xh[b * hw:(b + 1) * hw, :].astype(f32),
                      axis=0, keepdims=True) for b in range(bb)]
    feat = feats[0] if bb == 1 else jnp.concatenate(feats, axis=0)      # (bb, 64)

    # Classifier weight/bias are pre-padded to 128 output lanes -> lane-dense store.
    bbox = jnp.dot(feat, w_cls_ref[...], preferred_element_type=f32) + b_cls  # (bb, 128)
    bbox_ref[0] = bbox.astype(bbox_ref.dtype)


# ----------------------------------------------------------------------------
# Glue (im2col for the stride-2 stem, parameter setup) — plain JAX
# ----------------------------------------------------------------------------
def im2col(x, ksize, stride, pad):
    """x:(B,H,W,C) -> ((B, Ho*Wo, k*k*C), Ho, Wo). Tap-major, then C."""
    B, H, W, C = x.shape
    xp = jnp.pad(x, ((0, 0), (pad, pad), (pad, pad), (0, 0)))
    ho = (H + 2 * pad - ksize) // stride + 1
    wo = (W + 2 * pad - ksize) // stride + 1
    taps = []
    for ki in range(ksize):
        for kj in range(ksize):
            taps.append(xp[:, ki:ki + stride * ho:stride,
                           kj:kj + stride * wo:stride, :])
    cols = jnp.concatenate(taps, axis=-1)                     # (B,Ho,Wo,k*k*C)
    return cols.reshape(B, ho * wo, ksize * ksize * C), ho, wo


def init_params(key):
    def dense(key, k_in, n_out, wdtype=jnp.bfloat16):
        kw, kb = jax.random.split(key)
        w = (jax.random.normal(kw, (k_in, n_out), jnp.float32)
             / jnp.sqrt(float(k_in))).astype(wdtype)
        b = 0.01 * jax.random.normal(kb, (1, n_out), jnp.float32)
        return w, b

    keys = jax.random.split(key, 10)
    p = {}
    w_stem, p["b_stem"] = dense(keys[0], 27, C_STEM)             # stem conv + folded BN
    p["w_stem"] = jnp.pad(w_stem, ((0, K_STEM - 27), (0, 0)))    # pad K 27 -> 32
    p["w_exp"], p["b_exp"] = dense(keys[1], C_STEM, C_EXP)       # MBConv expand 1x1
    p["w_dw"] = jax.random.normal(keys[2], (9, C_EXP), jnp.float32) / 3.0
    p["s_dw"] = jnp.ones((1, C_EXP), jnp.float32)                # folded BN scale
    p["b_dw"] = 0.01 * jax.random.normal(keys[3], (1, C_EXP), jnp.float32)
    p["w_se1"], p["b_se1"] = dense(keys[4], C_EXP, C_SE, jnp.float32)   # SE reduce
    p["w_se2"], p["b_se2"] = dense(keys[5], C_SE, C_EXP, jnp.float32)   # SE expand
    p["w_proj"], p["b_proj"] = dense(keys[6], C_EXP, C_STEM)     # MBConv project 1x1
    p["w_head"], p["b_head"] = dense(keys[7], C_STEM, C_HEAD)    # head 1x1 conv
    p["w_cls"], p["b_cls"] = dense(keys[8], C_HEAD, N_BBOX, jnp.float32)  # -> 4 bbox
    return p


def _const_spec(shape):
    zeros = (0,) * len(shape)
    return pl.BlockSpec(shape, lambda s, _z=zeros: _z)


def _row128(v):
    v = jnp.asarray(v, jnp.float32).reshape(1, -1)
    return jnp.pad(v, ((0, 0), (0, OUT_LANES - v.shape[1])))


# ----------------------------------------------------------------------------
# ObjLocModel.forward equivalent
# ----------------------------------------------------------------------------
def obj_loc_forward(params, images_nchw, gt_bboxes=None):
    # NCHW (PyTorch) -> NHWC
    x = jnp.transpose(images_nchw, (0, 2, 3, 1)).astype(jnp.float32)
    B = x.shape[0]

    # im2col for the stride-2 stem conv (cheap glue; output is tiny), K pad to 32.
    cols, ho, wo = im2col(x, ksize=3, stride=2, pad=1)
    hw = ho * wo
    k_raw = cols.shape[-1]
    cols = jnp.pad(cols, ((0, 0), (0, 0), (0, K_STEM - k_raw))).astype(jnp.bfloat16)

    # ---- batch blocking: >=2 grid steps (v7x has 2 TCs), BB images per step ----
    n_steps = 2 if B >= 2 else 1
    bb = -(-B // n_steps)          # ceil
    b_pad = n_steps * bb
    if b_pad != B:
        cols = jnp.pad(cols, ((0, b_pad - B), (0, 0), (0, 0)))

    # bf16 VPU/EUP math only on v6e/v7x; v5e (and older) stay f32.
    kind = jax.devices()[0].device_kind.lower()
    act_dtype = jnp.bfloat16 if ("v6" in kind or "v7" in kind) else jnp.float32

    # depthwise scratch layout: pad rows are a multiple of 32 (>= wo+1) so the
    # middle write and the di-tap slices stay aligned even with bf16 sublane packing.
    pad_rows = ((wo + 1 + 31) // 32) * 32
    p_total = hw + 2 * pad_rows

    # ---- consolidate the 9 bias/scale vectors into one (16,128) f32 matrix ----
    biasmat = jnp.concatenate([
        _row128(params["b_stem"]), _row128(params["b_exp"]),
        _row128(params["s_dw"]), _row128(params["b_dw"]),
        _row128(params["b_se1"]), _row128(params["b_se2"]),
        _row128(params["b_proj"]), _row128(params["b_head"]),
        _row128(params["b_cls"]),
    ], axis=0)
    biasmat = jnp.pad(biasmat, ((0, BIAS_ROWS - biasmat.shape[0]), (0, 0)))
    w_dw_p = jnp.pad(params["w_dw"], ((0, 16 - params["w_dw"].shape[0]), (0, 0)))
    w_cls_p = jnp.pad(params["w_cls"].astype(jnp.float32),
                      ((0, 0), (0, OUT_LANES - N_BBOX)))      # lane-dense classifier

    weight_args = (
        biasmat,
        params["w_stem"], params["w_exp"], w_dw_p,
        params["w_se1"], params["w_se2"],
        params["w_proj"], params["w_head"], w_cls_p,
    )

    in_specs = [pl.BlockSpec((bb, hw, K_STEM), lambda s: (s, 0, 0))]
    in_specs += [_const_spec(w.shape) for w in weight_args]   # weights resident in VMEM

    kernel = functools.partial(_obj_loc_kernel, bb=bb, ho=ho, wo=wo,
                               pad_rows=pad_rows, act_dtype=act_dtype)
    out = pl.pallas_call(
        kernel,
        out_shape=jax.ShapeDtypeStruct((n_steps, bb, OUT_LANES), jnp.float32),
        grid=(n_steps,),
        in_specs=in_specs,
        out_specs=pl.BlockSpec((1, bb, OUT_LANES), lambda s: (s, 0, 0)),
        scratch_shapes=[pltpu.VMEM((p_total, C_EXP), act_dtype)],
        compiler_params=pltpu.CompilerParams(
            # batch-step axis is independent -> shards across v7x's 2 TensorCores
            dimension_semantics=("parallel",),
        ),
    )(cols, *weight_args)

    bboxes = out.reshape(b_pad, OUT_LANES)[:B, :N_BBOX]

    if gt_bboxes is not None:
        # (B, 4) MSE is far too small for its own launch -> plain JAX (per review).
        loss = jnp.mean((bboxes - gt_bboxes.astype(jnp.float32)) ** 2)
        return bboxes, loss
    return bboxes


# ----------------------------------------------------------------------------
if __name__ == "__main__":
    key = jax.random.PRNGKey(0)
    k_img, k_gt = jax.random.split(key)

    B, C, H, W = 2, 3, 32, 32
    images = jax.random.normal(k_img, (B, C, H, W), jnp.float32)   # NCHW like PyTorch
    gt_bboxes = jax.random.uniform(k_gt, (B, 4), jnp.float32) * 32.0

    params = init_params(jax.random.PRNGKey(42))

    infer = jax.jit(lambda p, im: obj_loc_forward(p, im))
    train = jax.jit(lambda p, im, gt: obj_loc_forward(p, im, gt))

    # Inference path (gt_bboxes is None)
    bboxes = jax.block_until_ready(infer(params, images))
    assert bboxes.shape == (B, 4)
    assert bool(jnp.all(jnp.isfinite(bboxes)))

    # Training path (gt_bboxes provided -> (bboxes, loss))
    bboxes2, loss = train(params, images, gt_bboxes)
    bboxes2 = jax.block_until_ready(bboxes2)
    loss = jax.block_until_ready(loss)
    assert bboxes2.shape == (B, 4) and loss.shape == ()
    assert bool(jnp.isfinite(loss))

    print("KERNEL_OK")
</pallas_src>

<mosaic_0001>
module attributes {stable_mosaic.version = 11 : i64} {
  func.func @_obj_loc_kernel(%arg0: i32, %arg1: memref<1x256x32xbf16, #tpu.memory_space<vmem>>, %arg2: memref<16x128xf32, #tpu.memory_space<vmem>>, %arg3: memref<32x16xbf16, #tpu.memory_space<vmem>>, %arg4: memref<16x64xbf16, #tpu.memory_space<vmem>>, %arg5: memref<16x64xf32, #tpu.memory_space<vmem>>, %arg6: memref<64x4xf32, #tpu.memory_space<vmem>>, %arg7: memref<4x64xf32, #tpu.memory_space<vmem>>, %arg8: memref<64x16xbf16, #tpu.memory_space<vmem>>, %arg9: memref<16x64xbf16, #tpu.memory_space<vmem>>, %arg10: memref<64x128xf32, #tpu.memory_space<vmem>>, %arg11: memref<1x1x128xf32, #tpu.memory_space<vmem>>, %arg12: memref<320x64xf32, #tpu.memory_space<vmem>>) attributes {dimension_semantics = [#tpu.dimension_semantics<parallel>], iteration_bounds = array<i64: 2>, scalar_prefetch = 0 : i64, scratch_operands = 1 : i64, tpu.core_type = #tpu.core_type<tc>, window_params = [{transform_indices = @transform_0, window_bounds = array<i64: 1, 256, 32>}, {pipeline_mode = #tpu.pipeline_mode<synchronous>, transform_indices = @transform_1, window_bounds = array<i64: 16, 128>}, {pipeline_mode = #tpu.pipeline_mode<synchronous>, transform_indices = @transform_2, window_bounds = array<i64: 32, 16>}, {pipeline_mode = #tpu.pipeline_mode<synchronous>, transform_indices = @transform_3, window_bounds = array<i64: 16, 64>}, {pipeline_mode = #tpu.pipeline_mode<synchronous>, transform_indices = @transform_4, window_bounds = array<i64: 16, 64>}, {pipeline_mode = #tpu.pipeline_mode<synchronous>, transform_indices = @transform_5, window_bounds = array<i64: 64, 4>}, {pipeline_mode = #tpu.pipeline_mode<synchronous>, transform_indices = @transform_6, window_bounds = array<i64: 4, 64>}, {pipeline_mode = #tpu.pipeline_mode<synchronous>, transform_indices = @transform_7, window_bounds = array<i64: 64, 16>}, {pipeline_mode = #tpu.pipeline_mode<synchronous>, transform_indices = @transform_8, window_bounds = array<i64: 16, 64>}, {pipeline_mode = #tpu.pipeline_mode<synchronous>, transform_indices = @transform_9, window_bounds = array<i64: 64, 128>}, {transform_indices = @transform_10, window_bounds = array<i64: 1, 1, 128>}]} {
    %cst = arith.constant 0.000000e+00 : f32
    %0 = vector.broadcast %cst : f32 to vector<32x64xf32>
    %c0 = arith.constant 0 : index
    %c0_0 = arith.constant 0 : index
    %1 = vector.load %arg12[%c0, %c0_0] : memref<320x64xf32, #tpu.memory_space<vmem>>, vector<32x64xf32>
    tpu.vector_store %arg12[%c0, %c0_0], %0 {strides = array<i32>} : memref<320x64xf32, #tpu.memory_space<vmem>>, vector<32x64xf32>,
    %c288 = arith.constant 288 : index
    %c0_1 = arith.constant 0 : index
    %2 = vector.load %arg12[%c288, %c0_1] : memref<320x64xf32, #tpu.memory_space<vmem>>, vector<32x64xf32>
    tpu.vector_store %arg12[%c288, %c0_1], %0 {strides = array<i32>} : memref<320x64xf32, #tpu.memory_space<vmem>>, vector<32x64xf32>,
    %c0_2 = arith.constant 0 : index
    %c0_3 = arith.constant 0 : index
    %3 = vector.load %arg2[%c0_2, %c0_3] : memref<16x128xf32, #tpu.memory_space<vmem>>, vector<16x128xf32>
    %4 = vector.extract_strided_slice %3 {offsets = [0, 0], sizes = [1, 16], strides = [1, 1]} : vector<16x128xf32> to vector<1x16xf32>
    %5 = vector.extract_strided_slice %3 {offsets = [1, 0], sizes = [1, 64], strides = [1, 1]} : vector<16x128xf32> to vector<1x64xf32>
    %6 = vector.extract_strided_slice %3 {offsets = [2, 0], sizes = [1, 64], strides = [1, 1]} : vector<16x128xf32> to vector<1x64xf32>
    %7 = vector.extract_strided_slice %3 {offsets = [3, 0], sizes = [1, 64], strides = [1, 1]} : vector<16x128xf32> to vector<1x64xf32>
    %8 = vector.extract_strided_slice %3 {offsets = [4, 0], sizes = [1, 4], strides = [1, 1]} : vector<16x128xf32> to vector<1x4xf32>
    %9 = vector.extract_strided_slice %3 {offsets = [5, 0], sizes = [1, 64], strides = [1, 1]} : vector<16x128xf32> to vector<1x64xf32>
    %10 = vector.extract_strided_slice %3 {offsets = [6, 0], sizes = [1, 16], strides = [1, 1]} : vector<16x128xf32> to vector<1x16xf32>
    %11 = vector.extract_strided_slice %3 {offsets = [7, 0], sizes = [1, 64], strides = [1, 1]} : vector<16x128xf32> to vector<1x64xf32>
    %12 = vector.extract_strided_slice %3 {offsets = [8, 0], sizes = [1, 128], strides = [1, 1]} : vector<16x128xf32> to vector<1x128xf32>
    %c0_4 = arith.constant 0 : index
    %c0_5 = arith.constant 0 : index
    %c0_6 = arith.constant 0 : index
    %13 = vector.load %arg1[%c0_4, %c0_5, %c0_6] : memref<1x256x32xbf16, #tpu.memory_space<vmem>>, vector<1x256x32xbf16>
    %14 = vector.shape_cast %13 : vector<1x256x32xbf16> to vector<256x32xbf16>
    %c0_7 = arith.constant 0 : index
    %c0_8 = arith.constant 0 : index
    %15 = vector.load %arg3[%c0_7, %c0_8] : memref<32x16xbf16, #tpu.memory_space<vmem>>, vector<32x16xbf16>
    %cst_9 = arith.constant dense<0.000000e+00> : vector<256x16xf32>
    %16 = tpu.matmul %14, %15, %cst_9 {dimension_numbers = #tpu.dot_dimension_numbers<[1], [0], [0], [1], [0, 0, 1, 1], [], []>} : vector<256x32xbf16>, vector<32x16xbf16>, vector<256x16xf32> -> vector<256x16xf32>
    %17 = vector.broadcast %4 : vector<1x16xf32> to vector<256x16xf32>
    %18 = arith.addf %16, %17 : vector<256x16xf32>
    %19 = arith.negf %18 : vector<256x16xf32>
    %20 = math.exp %19 : vector<256x16xf32>
    %cst_10 = arith.constant 1.000000e+00 : f32
    %21 = vector.broadcast %cst_10 : f32 to vector<256x16xf32>
    %22 = arith.addf %21, %20 : vector<256x16xf32>
    %23 = arith.divf %21, %22 : vector<256x16xf32>
    %24 = arith.mulf %18, %23 : vector<256x16xf32>
    %25 = arith.truncf %24 : vector<256x16xf32> to vector<256x16xbf16>
    %c0_11 = arith.constant 0 : index
    %c0_12 = arith.constant 0 : index
    %26 = vector.load %arg4[%c0_11, %c0_12] : memref<16x64xbf16, #tpu.memory_space<vmem>>, vector<16x64xbf16>
    %cst_13 = arith.constant dense<0.000000e+00> : vector<256x64xf32>
    %27 = tpu.matmul %25, %26, %cst_13 {dimension_numbers = #tpu.dot_dimension_numbers<[1], [0], [0], [1], [0, 0, 1, 1], [], []>} : vector<256x16xbf16>, vector<16x64xbf16>, vector<256x64xf32> -> vector<256x64xf32>
    %28 = vector.broadcast %5 : vector<1x64xf32> to vector<256x64xf32>
    %29 = arith.addf %27, %28 : vector<256x64xf32>
    %30 = arith.negf %29 : vector<256x64xf32>
    %31 = math.exp %30 : vector<256x64xf32>
    %cst_14 = arith.constant 1.000000e+00 : f32
    %32 = vector.broadcast %cst_14 : f32 to vector<256x64xf32>
    %33 = arith.addf %32, %31 : vector<256x64xf32>
    %34 = arith.divf %32, %33 : vector<256x64xf32>
    %35 = arith.mulf %29, %34 : vector<256x64xf32>
    %36 = tpu.iota {dimensions = array<i32: 0>} : vector<288x1xi32>
    %c16_i32 = arith.constant 16 : i32
    %c0_i32 = arith.constant 0 : i32
    %37 = arith.cmpi eq, %c16_i32, %c0_i32 : i32
    %c1_i32 = arith.constant 1 : i32
    %38 = arith.select %37, %c1_i32, %c16_i32 : i32
    %39 = vector.broadcast %38 : i32 to vector<288x1xi32>
    %40 = arith.remsi %36, %39 : vector<288x1xi32>
    %c0_i32_15 = arith.constant 0 : i32
    %41 = vector.broadcast %c0_i32_15 : i32 to vector<288x1xi32>
    %42 = arith.cmpi ne, %40, %41 : vector<288x1xi32>
    %c0_i32_16 = arith.constant 0 : i32
    %43 = vector.broadcast %c0_i32_16 : i32 to vector<288x1xi32>
    %44 = arith.cmpi slt, %40, %43 : vector<288x1xi32>
    %c0_i32_17 = arith.constant 0 : i32
    %45 = arith.cmpi slt, %38, %c0_i32_17 : i32
    %46 = vector.broadcast %45 : i1 to vector<288x1xi1>
    %47 = vector.broadcast %46 : vector<288x1xi1> to vector<288x1xi1>
    %48 = arith.xori %44, %47 : vector<288x1xi1>
    %49 = arith.andi %48, %42 : vector<288x1xi1>
    %50 = vector.broadcast %38 : i32 to vector<288x1xi32>
    %51 = arith.addi %40, %50 : vector<288x1xi32>
    %52 = arith.select %49, %51, %40 : vector<288x1xi1>, vector<288x1xi32>
    %c0_i32_18 = arith.constant 0 : i32
    %53 = vector.broadcast %c0_i32_18 : i32 to vector<288x1xi32>
    %54 = arith.cmpi ne, %52, %53 : vector<288x1xi32>
    %55 = arith.extui %54 : vector<288x1xi1> to vector<288x1xi32>
    %56 = arith.sitofp %55 : vector<288x1xi32> to vector<288x1xf32>
    %c15_i32 = arith.constant 15 : i32
    %57 = vector.broadcast %c15_i32 : i32 to vector<288x1xi32>
    %58 = arith.cmpi ne, %52, %57 : vector<288x1xi32>
    %59 = arith.extui %58 : vector<288x1xi1> to vector<288x1xi32>
    %60 = arith.sitofp %59 : vector<288x1xi32> to vector<288x1xf32>
    %c0_19 = arith.constant 0 : index
    %c0_20 = arith.constant 0 : index
    %61 = vector.load %arg5[%c0_19, %c0_20] : memref<16x64xf32, #tpu.memory_space<vmem>>, vector<16x64xf32>
    %c32 = arith.constant 32 : index
    %c0_21 = arith.constant 0 : index
    %62 = vector.load %arg12[%c32, %c0_21] : memref<320x64xf32, #tpu.memory_space<vmem>>, vector<256x64xf32>
    tpu.vector_store %arg12[%c32, %c0_21], %35 {strides = array<i32>} : memref<320x64xf32, #tpu.memory_space<vmem>>, vector<256x64xf32>,
    %c15 = arith.constant 15 : index
    %c0_22 = arith.constant 0 : index
    %63 = vector.load %arg12[%c15, %c0_22] : memref<320x64xf32, #tpu.memory_space<vmem>>, vector<288x64xf32>
    %64 = vector.broadcast %56 : vector<288x1xf32> to vector<288x64xf32>
    %65 = arith.mulf %63, %64 : vector<288x64xf32>
    %c16 = arith.constant 16 : index
    %c0_23 = arith.constant 0 : index
    %66 = vector.load %arg12[%c16, %c0_23] : memref<320x64xf32, #tpu.memory_space<vmem>>, vector<288x64xf32>
    %c17 = arith.constant 17 : index
    %c0_24 = arith.constant 0 : index
    %67 = vector.load %arg12[%c17, %c0_24] : memref<320x64xf32, #tpu.memory_space<vmem>>, vector<288x64xf32>
    %68 = vector.broadcast %60 : vector<288x1xf32> to vector<288x64xf32>
    %69 = arith.mulf %67, %68 : vector<288x64xf32>
    %cst_25 = arith.constant 0.000000e+00 : f32
    %70 = vector.broadcast %cst_25 : f32 to vector<256x64xf32>
    %71 = vector.extract_strided_slice %65 {offsets = [0, 0], sizes = [256, 64], strides = [1, 1]} : vector<288x64xf32> to vector<256x64xf32>
    %72 = vector.extract_strided_slice %61 {offsets = [0, 0], sizes = [1, 64], strides = [1, 1]} : vector<16x64xf32> to vector<1x64xf32>
    %73 = vector.broadcast %72 : vector<1x64xf32> to vector<256x64xf32>
    %74 = arith.mulf %71, %73 : vector<256x64xf32>
    %75 = arith.addf %70, %74 : vector<256x64xf32>
    %76 = vector.extract_strided_slice %66 {offsets = [0, 0], sizes = [256, 64], strides = [1, 1]} : vector<288x64xf32> to vector<256x64xf32>
    %77 = vector.extract_strided_slice %61 {offsets = [1, 0], sizes = [1, 64], strides = [1, 1]} : vector<16x64xf32> to vector<1x64xf32>
    %78 = vector.broadcast %77 : vector<1x64xf32> to vector<256x64xf32>
    %79 = arith.mulf %76, %78 : vector<256x64xf32>
    %80 = arith.addf %75, %79 : vector<256x64xf32>
    %81 = vector.extract_strided_slice %69 {offsets = [0, 0], sizes = [256, 64], strides = [1, 1]} : vector<288x64xf32> to vector<256x64xf32>
    %82 = vector.extract_strided_slice %61 {offsets = [2, 0], sizes = [1, 64], strides = [1, 1]} : vector<16x64xf32> to vector<1x64xf32>
    %83 = vector.broadcast %82 : vector<1x64xf32> to vector<256x64xf32>
    %84 = arith.mulf %81, %83 : vector<256x64xf32>
    %85 = arith.addf %80, %84 : vector<256x64xf32>
    %86 = vector.extract_strided_slice %65 {offsets = [16, 0], sizes = [256, 64], strides = [1, 1]} : vector<288x64xf32> to vector<256x64xf32>
    %87 = vector.extract_strided_slice %61 {offsets = [3, 0], sizes = [1, 64], strides = [1, 1]} : vector<16x64xf32> to vector<1x64xf32>
    %88 = vector.broadcast %87 : vector<1x64xf32> to vector<256x64xf32>
    %89 = arith.mulf %86, %88 : vector<256x64xf32>
    %90 = arith.addf %85, %89 : vector<256x64xf32>
    %91 = vector.extract_strided_slice %66 {offsets = [16, 0], sizes = [256, 64], strides = [1, 1]} : vector<288x64xf32> to vector<256x64xf32>
    %92 = vector.extract_strided_slice %61 {offsets = [4, 0], sizes = [1, 64], strides = [1, 1]} : vector<16x64xf32> to vector<1x64xf32>
    %93 = vector.broadcast %92 : vector<1x64xf32> to vector<256x64xf32>
    %94 = arith.mulf %91, %93 : vector<256x64xf32>
    %95 = arith.addf %90, %94 : vector<256x64xf32>
    %96 = vector.extract_strided_slice %69 {offsets = [16, 0], sizes = [256, 64], strides = [1, 1]} : vector<288x64xf32> to vector<256x64xf32>
    %97 = vector.extract_strided_slice %61 {offsets = [5, 0], sizes = [1, 64], strides = [1, 1]} : vector<16x64xf32> to vector<1x64xf32>
    %98 = vector.broadcast %97 : vector<1x64xf32> to vector<256x64xf32>
    %99 = arith.mulf %96, %98 : vector<256x64xf32>
    %100 = arith.addf %95, %99 : vector<256x64xf32>
    %101 = vector.extract_strided_slice %65 {offsets = [32, 0], sizes = [256, 64], strides = [1, 1]} : vector<288x64xf32> to vector<256x64xf32>
    %102 = vector.extract_strided_slice %61 {offsets = [6, 0], sizes = [1, 64], strides = [1, 1]} : vector<16x64xf32> to vector<1x64xf32>
    %103 = vector.broadcast %102 : vector<1x64xf32> to vector<256x64xf32>
    %104 = arith.mulf %101, %103 : vector<256x64xf32>
    %105 = arith.addf %100, %104 : vector<256x64xf32>
    %106 = vector.extract_strided_slice %66 {offsets = [32, 0], sizes = [256, 64], strides = [1, 1]} : vector<288x64xf32> to vector<256x64xf32>
    %107 = vector.extract_strided_slice %61 {offsets = [7, 0], sizes = [1, 64], strides = [1, 1]} : vector<16x64xf32> to vector<1x64xf32>
    %108 = vector.broadcast %107 : vector<1x64xf32> to vector<256x64xf32>
    %109 = arith.mulf %106, %108 : vector<256x64xf32>
    %110 = arith.addf %105, %109 : vector<256x64xf32>
    %111 = vector.extract_strided_slice %69 {offsets = [32, 0], sizes = [256, 64], strides = [1, 1]} : vector<288x64xf32> to vector<256x64xf32>
    %112 = vector.extract_strided_slice %61 {offsets = [8, 0], sizes = [1, 64], strides = [1, 1]} : vector<16x64xf32> to vector<1x64xf32>
    %113 = vector.broadcast %112 : vector<1x64xf32> to vector<256x64xf32>
    %114 = arith.mulf %111, %113 : vector<256x64xf32>
    %115 = arith.addf %110, %114 : vector<256x64xf32>
    %116 = vector.broadcast %6 : vector<1x64xf32> to vector<256x64xf32>
    %117 = arith.mulf %115, %116 : vector<256x64xf32>
    %118 = vector.broadcast %7 : vector<1x64xf32> to vector<256x64xf32>
    %119 = arith.addf %117, %118 : vector<256x64xf32>
    %120 = arith.negf %119 : vector<256x64xf32>
    %121 = math.exp %120 : vector<256x64xf32>
    %cst_26 = arith.constant 1.000000e+00 : f32
    %122 = vector.broadcast %cst_26 : f32 to vector<256x64xf32>
    %123 = arith.addf %122, %121 : vector<256x64xf32>
    %124 = arith.divf %122, %123 : vector<256x64xf32>
    %125 = arith.mulf %119, %124 : vector<256x64xf32>
    %cst_27 = arith.constant dense<0.000000e+00> : vector<64xf32>
    %126 = vector.multi_reduction <add>, %125, %cst_27 [0] : vector<256x64xf32> to vector<64xf32>
    %127 = vector.shape_cast %126 : vector<64xf32> to vector<1x64xf32>
    %cst_28 = arith.constant 2.560000e+02 : f32
    %128 = vector.broadcast %cst_28 : f32 to vector<1x64xf32>
    %129 = arith.divf %127, %128 : vector<1x64xf32>
    %c0_29 = arith.constant 0 : index
    %c0_30 = arith.constant 0 : index
    %130 = vector.load %arg6[%c0_29, %c0_30] : memref<64x4xf32, #tpu.memory_space<vmem>>, vector<64x4xf32>
    %cst_31 = arith.constant dense<0.000000e+00> : vector<1x4xf32>
    %131 = tpu.matmul %129, %130, %cst_31 {dimension_numbers = #tpu.dot_dimension_numbers<[1], [0], [0], [1], [0, 0, 1, 1], [], []>} : vector<1x64xf32>, vector<64x4xf32>, vector<1x4xf32> -> vector<1x4xf32>
    %132 = arith.addf %131, %8 : vector<1x4xf32>
    %133 = arith.negf %132 : vector<1x4xf32>
    %134 = math.exp %133 : vector<1x4xf32>
    %cst_32 = arith.constant 1.000000e+00 : f32
    %135 = vector.broadcast %cst_32 : f32 to vector<1x4xf32>
    %136 = arith.addf %135, %134 : vector<1x4xf32>
    %137 = arith.divf %135, %136 : vector<1x4xf32>
    %138 = arith.mulf %132, %137 : vector<1x4xf32>
    %c0_33 = arith.constant 0 : index
    %c0_34 = arith.constant 0 : index
    %139 = vector.load %arg7[%c0_33, %c0_34] : memref<4x64xf32, #tpu.memory_space<vmem>>, vector<4x64xf32>
    %cst_35 = arith.constant dense<0.000000e+00> : vector<1x64xf32>
    %140 = tpu.matmul %138, %139, %cst_35 {dimension_numbers = #tpu.dot_dimension_numbers<[1], [0], [0], [1], [0, 0, 1, 1], [], []>} : vector<1x4xf32>, vector<4x64xf32>, vector<1x64xf32> -> vector<1x64xf32>
    %141 = arith.addf %140, %9 : vector<1x64xf32>
    %142 = arith.negf %141 : vector<1x64xf32>
    %143 = math.exp %142 : vector<1x64xf32>
    %cst_36 = arith.constant 1.000000e+00 : f32
    %144 = vector.broadcast %cst_36 : f32 to vector<1x64xf32>
    %145 = arith.addf %144, %143 : vector<1x64xf32>
    %146 = arith.divf %144, %145 : vector<1x64xf32>
    %147 = vector.broadcast %146 : vector<1x64xf32> to vector<256x64xf32>
    %148 = arith.mulf %125, %147 : vector<256x64xf32>
    %149 = arith.truncf %148 : vector<256x64xf32> to vector<256x64xbf16>
    %c0_37 = arith.constant 0 : index
    %c0_38 = arith.constant 0 : index
    %150 = vector.load %arg8[%c0_37, %c0_38] : memref<64x16xbf16, #tpu.memory_space<vmem>>, vector<64x16xbf16>
    %cst_39 = arith.constant dense<0.000000e+00> : vector<256x16xf32>
    %151 = tpu.matmul %149, %150, %cst_39 {dimension_numbers = #tpu.dot_dimension_numbers<[1], [0], [0], [1], [0, 0, 1, 1], [], []>} : vector<256x64xbf16>, vector<64x16xbf16>, vector<256x16xf32> -> vector<256x16xf32>
    %152 = vector.broadcast %10 : vector<1x16xf32> to vector<256x16xf32>
    %153 = arith.addf %151, %152 : vector<256x16xf32>
    %154 = arith.addf %153, %24 : vector<256x16xf32>
    %155 = arith.truncf %154 : vector<256x16xf32> to vector<256x16xbf16>
    %c0_40 = arith.constant 0 : index
    %c0_41 = arith.constant 0 : index
    %156 = vector.load %arg9[%c0_40, %c0_41] : memref<16x64xbf16, #tpu.memory_space<vmem>>, vector<16x64xbf16>
    %cst_42 = arith.constant dense<0.000000e+00> : vector<256x64xf32>
    %157 = tpu.matmul %155, %156, %cst_42 {dimension_numbers = #tpu.dot_dimension_numbers<[1], [0], [0], [1], [0, 0, 1, 1], [], []>} : vector<256x16xbf16>, vector<16x64xbf16>, vector<256x64xf32> -> vector<256x64xf32>
    %158 = vector.broadcast %11 : vector<1x64xf32> to vector<256x64xf32>
    %159 = arith.addf %157, %158 : vector<256x64xf32>
    %160 = arith.negf %159 : vector<256x64xf32>
    %161 = math.exp %160 : vector<256x64xf32>
    %cst_43 = arith.constant 1.000000e+00 : f32
    %162 = vector.broadcast %cst_43 : f32 to vector<256x64xf32>
    %163 = arith.addf %162, %161 : vector<256x64xf32>
    %164 = arith.divf %162, %163 : vector<256x64xf32>
    %165 = arith.mulf %159, %164 : vector<256x64xf32>
    %cst_44 = arith.constant dense<0.000000e+00> : vector<64xf32>
    %166 = vector.multi_reduction <add>, %165, %cst_44 [0] : vector<256x64xf32> to vector<64xf32>
    %167 = vector.shape_cast %166 : vector<64xf32> to vector<1x64xf32>
    %cst_45 = arith.constant 2.560000e+02 : f32
    %168 = vector.broadcast %cst_45 : f32 to vector<1x64xf32>
    %169 = arith.divf %167, %168 : vector<1x64xf32>
    %c0_46 = arith.constant 0 : index
    %c0_47 = arith.constant 0 : index
    %170 = vector.load %arg10[%c0_46, %c0_47] : memref<64x128xf32, #tpu.memory_space<vmem>>, vector<64x128xf32>
    %cst_48 = arith.constant dense<0.000000e+00> : vector<1x128xf32>
    %171 = tpu.matmul %169, %170, %cst_48 {dimension_numbers = #tpu.dot_dimension_numbers<[1], [0], [0], [1], [0, 0, 1, 1], [], []>} : vector<1x64xf32>, vector<64x128xf32>, vector<1x128xf32> -> vector<1x128xf32>
    %172 = arith.addf %171, %12 : vector<1x128xf32>
    %c0_49 = arith.constant 0 : index
    %c0_50 = arith.constant 0 : index
    %c0_51 = arith.constant 0 : index
    %173 = vector.load %arg11[%c0_49, %c0_50, %c0_51] : memref<1x1x128xf32, #tpu.memory_space<vmem>>, vector<1x1x128xf32>
    %174 = vector.shape_cast %173 : vector<1x1x128xf32> to vector<1x128xf32>
    %175 = vector.shape_cast %172 : vector<1x128xf32> to vector<1x1x128xf32>
    tpu.vector_store %arg11[%c0_49, %c0_50, %c0_51], %175 {strides = array<i32>} : memref<1x1x128xf32, #tpu.memory_space<vmem>>, vector<1x1x128xf32>,
    return
  }
  func.func @transform_0(%arg0: i32) -> (i32, i32, i32) {
    %c0_i32 = arith.constant 0 : i32
    %c0_i32_0 = arith.constant 0 : i32
    %c0_i32_1 = arith.constant 0 : i32
    return %arg0, %c0_i32, %c0_i32_0 : i32, i32, i32
  }
  func.func @transform_1(%arg0: i32) -> (i32, i32) {
    %c0_i32 = arith.constant 0 : i32
    %c0_i32_0 = arith.constant 0 : i32
    %c0_i32_1 = arith.constant 0 : i32
    return %c0_i32, %c0_i32_0 : i32, i32
  }
  func.func @transform_2(%arg0: i32) -> (i32, i32) {
    %c0_i32 = arith.constant 0 : i32
    %c0_i32_0 = arith.constant 0 : i32
    %c0_i32_1 = arith.constant 0 : i32
    return %c0_i32, %c0_i32_0 : i32, i32
  }
  func.func @transform_3(%arg0: i32) -> (i32, i32) {
    %c0_i32 = arith.constant 0 : i32
    %c0_i32_0 = arith.constant 0 : i32
    %c0_i32_1 = arith.constant 0 : i32
    return %c0_i32, %c0_i32_0 : i32, i32
  }
  func.func @transform_4(%arg0: i32) -> (i32, i32) {
    %c0_i32 = arith.constant 0 : i32
    %c0_i32_0 = arith.constant 0 : i32
    %c0_i32_1 = arith.constant 0 : i32
    return %c0_i32, %c0_i32_0 : i32, i32
  }
  func.func @transform_5(%arg0: i32) -> (i32, i32) {
    %c0_i32 = arith.constant 0 : i32
    %c0_i32_0 = arith.constant 0 : i32
    %c0_i32_1 = arith.constant 0 : i32
    return %c0_i32, %c0_i32_0 : i32, i32
  }
  func.func @transform_6(%arg0: i32) -> (i32, i32) {
    %c0_i32 = arith.constant 0 : i32
    %c0_i32_0 = arith.constant 0 : i32
    %c0_i32_1 = arith.constant 0 : i32
    return %c0_i32, %c0_i32_0 : i32, i32
  }
  func.func @transform_7(%arg0: i32) -> (i32, i32) {
    %c0_i32 = arith.constant 0 : i32
    %c0_i32_0 = arith.constant 0 : i32
    %c0_i32_1 = arith.constant 0 : i32
    return %c0_i32, %c0_i32_0 : i32, i32
  }
  func.func @transform_8(%arg0: i32) -> (i32, i32) {
    %c0_i32 = arith.constant 0 : i32
    %c0_i32_0 = arith.constant 0 : i32
    %c0_i32_1 = arith.constant 0 : i32
    return %c0_i32, %c0_i32_0 : i32, i32
  }
  func.func @transform_9(%arg0: i32) -> (i32, i32) {
    %c0_i32 = arith.constant 0 : i32
    %c0_i32_0 = arith.constant 0 : i32
    %c0_i32_1 = arith.constant 0 : i32
    return %c0_i32, %c0_i32_0 : i32, i32
  }
  func.func @transform_10(%arg0: i32) -> (i32, i32, i32) {
    %c0_i32 = arith.constant 0 : i32
    %c0_i32_0 = arith.constant 0 : i32
    %c0_i32_1 = arith.constant 0 : i32
    return %arg0, %c0_i32, %c0_i32_0 : i32, i32, i32
  }
}

</mosaic_0001>

<bundles_post_ra>
// kernel: _lambda_.1
= control target key start
LH: loop header
LB: loop body
LE: loop exit
PB: predicated region body
PF: predicated region fallthrough
CT: control target
= control target key end

     0   :  { %15 = vsyncpa [#allocation4], 0  ;;  %s8241_s0 = inlined_call_operand.vmem [shape: bf16[2,256,32], index: 0, kind: input, shape index: {}]   ;;  %s8242_s1 = inlined_call_operand.vmem [shape: f32[16,128], index: 1, kind: input, shape index: {}]   ;;  %s8243_s2 = inlined_call_operand.vmem [shape: bf16[32,16], index: 2, kind: input, shape index: {}]   ;;  %s8244_s3 = inlined_call_operand.vmem [shape: bf16[16,64], index: 3, kind: input, shape index: {}]   ;;  %s8245_s4 = inlined_call_operand.vmem [shape: f32[16,64], index: 4, kind: input, shape index: {}]   ;;  %s8246_s5 = inlined_call_operand.vmem [shape: f32[64,4], index: 5, kind: input, shape index: {}]   ;;  %s8247_s6 = inlined_call_operand.vmem [shape: f32[4,64], index: 6, kind: input, shape index: {}]   ;;  %s8248_s7 = inlined_call_operand.vmem [shape: bf16[64,16], index: 7, kind: input, shape index: {}]   ;;  %s8249_s8 = inlined_call_operand.vmem [shape: bf16[16,64], index: 8, kind: input, shape index: {}]   ;;  %s8250_s9 = inlined_call_operand.vmem [shape: f32[64,128], index: 9, kind: input, shape index: {}]   ;;  %s8251_s10 = inlined_call_operand.hbm [shape: f32[2,1,128], index: 10, kind: output, shape index: {}]  }
   0x1   :  { %17 = vsyncpa [#allocation4 + $0x1], 0  ;;  %s5744_s13 = smov 0   ;;  %s5746_s14 = smov 0  }
   0x2   :  { %s5748_s15 = smov 0   ;;  %s5750_s16 = smov 0  }
   0x3 LB: > { %s5765_s17 = sadd.s32 4294967295, %s5683_s16   ;;  %s4463_s18 = sadd.s32 4294967294, %s5683_s16   ;;  %s5683_s16 = sphi %s5750_s16, %s8665_s16   ;;  %s5679_s15 = sphi %s5748_s15, %s8664_s15   ;;  %s5675_s14 = sphi %s5746_s14, %s8663_s14   ;;  %s5671_s13 = sphi %s5744_s13, %s8662_s13  }
   0x4   : > { %s5769_s19 = sadd.s32 1, %s5683_s16   ;;  %s245_s20 = sadd.s32 1, %s5679_s15 }
   0x5   : > { %s242_s21 = ssub.s32 %s5683_s16, %s5769_s19  ;;  %p255_p0 = scmp.ne.s32.totalorder %s5679_s15, %s5675_s14 }
   0x6   : > { %p243_p1 = scmp.eq.s32.totalorder %s242_s21, 0  ;;  %p256_p2 = scmp.eq.s32.totalorder %s5765_s17, 1 }
   0x7   : > { %p261_p3 = scmp.ne.s32.totalorder %s5675_s14, %s5671_s13  ;;  %p262_p4 = scmp.eq.s32.totalorder %s4463_s18, 1 }
   0x8   : > { %s5780_s22 = scalar_select %p243_p1, %s5679_s15, %s245_s20  }
   0x9   : > { %p5782_p5 = por %p256_p2, %p255_p0  ;;  %p5786_p6 = por %p262_p4, %p261_p3 }
   0xa   : > { %p4466_p7 = scmp.ge.s32.totalorder %s5683_s16, 1  ;;  %p315_p8 = scmp.lt.s32.totalorder %s5683_s16, 3 }
   0xc   : > { %p316_p9 = pnand %p4466_p7, %p315_p8 }
   0xe   : > { %319 = sbr.rel (%p316_p9) target bundleno = 2092 (0x82c), region = 60 }
  0x15   : > { %v5076_v0 = vld [vmem:[%s8243_s2] sm:$0xff]   ;;  %p352_p10 = scmp.lt.s32.totalorder %s5765_s17, 1  ;;  %v5077_v1 = vld [vmem:[%s8243_s2 + $0x8] sm:$0xff]   ;;  %vm501_vm0 = vcmask 261120   ;;  %v405_v19 = vlaneseq  ;;  %vm963_vm1 = vcmask 130048   ;;  %vm358_vm2 = vcmask 523264  }
  0x16   : > { %4823 = vmatprep.subr.bf16.mxu0 %v5076_v0  ;;  %v5094_v18 = vld [vmem:[%s8244_s3] sm:$0xff]   ;;  %s4727_s25 = sshll.u32 %s5765_s17, 4 }
  0x17   : > { %s353_s29 = scalar_select %p352_p10, %s5765_s17, 1  ;;  %4824 = vmatpush3.bf16.msra.mxu0 %v5076_v0  ;;  %4859 = vmatprep.subr.bf16.mxu1 %v5094_v18  ;;  %v5840_v20 = vshrl.u32 %v405_v19, 7  ;;  %v5848_v22 = vld [vmem:[%s8242_s1] sm:$0xff] }
  0x18   : > { %4825 = vmatprep.subr.bf16.mxu0 %v5077_v1  ;;  %4860 = vmatpush3.bf16.msra.mxu1 %v5094_v18  ;;  %s5688_s17 = smov [#allocation3]  }
  0x19   : > { %s4730_s30 = sshll.u32 %s353_s29, 7  ;;  %8349 = vst [vmem:[#allocation6_spill] sm:$0xff] %v5840_v20  ;;  %v5843_v21 = vsub.s32 0, %v5840_v20  ;;  %s5625_s20 = sshll.u32 %s5688_s17, 4  ;;  %s5626_s20 = int_to_ptr.vmem [resolvable:$false] %s5625_s20 }
  0x1a   : > { %s5803_s18 = scalar_lea.vmem %s8241_s0, %s4730_s30  ;;  %s8199_s30 = scalar_lea.hbm %s8251_s10, %s4727_s25 }
  0x1b   : > { %v5078_v2 = vld [vmem:[%s5803_s18] sm:$0xff]   ;;  %4826 = vmatpush3.bf16.msra.mxu0 %v5077_v1  ;;  %v5079_v3 = vld [vmem:[%s5803_s18 + $0x8] sm:$0xff]   ;;  %v5080_v4 = vld [vmem:[%s5803_s18 + $0x10] sm:$0xff]   ;;  %8350 = vst [vmem:[#allocation7_spill] sm:$0xff] %v5843_v21  ;;  %v5852_v23 = vrot.slane %v5848_v22, %v5843_v21  ;;  %s5627_s21 = scalar_lea.vmem %s5626_s20, 32 }
  0x1c   : > { %4827 = vmatprep.mubr.msk.bf16.mxu0 %vm501_vm0, %v5078_v2  ;;  %v5081_v5 = vld [vmem:[%s5803_s18 + $0x18] sm:$0xff]   ;;  %v5082_v6 = vld [vmem:[%s5803_s18 + $0x20] sm:$0xff]   ;;  %v5083_v7 = vld [vmem:[%s5803_s18 + $0x28] sm:$0xff]  }
  0x1d   : > { %v5084_v8 = vld [vmem:[%s5803_s18 + $0x30] sm:$0xff]   ;;  %v5085_v9 = vld [vmem:[%s5803_s18 + $0x38] sm:$0xff]   ;;  %v5086_v10 = vld [vmem:[%s5803_s18 + $0x40] sm:$0xff]  }
  0x1e   : > { %4828 = vmatmul.mubr.msk.bf16.vlgmr.msra.gmra.mrb[0].mxu0 %vm501_vm0, %v5079_v3  ;;  %v5087_v11 = vld [vmem:[%s5803_s18 + $0x48] sm:$0xff]   ;;  %v5088_v12 = vld [vmem:[%s5803_s18 + $0x50] sm:$0xff]   ;;  %v5089_v13 = vld [vmem:[%s5803_s18 + $0x58] sm:$0xff]  }
  0x1f   : > { %4831 = vmatprep.mubr.msk.bf16.mxu0 %vm501_vm0, %v5080_v4  ;;  %v5090_v14 = vld [vmem:[%s5803_s18 + $0x60] sm:$0xff]   ;;  %v5091_v15 = vld [vmem:[%s5803_s18 + $0x68] sm:$0xff]   ;;  %v5092_v16 = vld [vmem:[%s5803_s18 + $0x70] sm:$0xff]  }
  0x20   : > { %v5093_v17 = vld [vmem:[%s5803_s18 + $0x78] sm:$0xff]   ;;  %s350_s18 = sand.u32 1, %s5675_s14  }
  0x21   : > { %s351_s26 = scalar_lea.vmem [#allocation3], %s350_s18  ;;  %s4396_s11 = scalar_lea.sflag [#allocation4], %s350_s18 }
  0x22   : > { %s4408_s27 = sshll.u32 %s351_s26, 4  ;;  %s8201_s27 = int_to_ptr.vmem [resolvable:$true] %s4408_s27 }
  0x23   : > { %s5621_s12 = scalar_lea.vmem %s8201_s27, 16  ;;  %p5628_p0 = scmp.lt.s32.totalorder %s8201_s27, %s5626_s20 }
  0x24   : > { %p5622_p11 = scmp.ne.s32.totalorder %s8201_s27, %s5621_s12  ;;  %p5629_p1 = scmp.lt.s32.totalorder %s5627_s21, %s5621_s12 }
  0x26   : > { %4832 = vmatmul.mubr.msk.bf16.gmra.mrb[4].mxu0 %vm501_vm0, %v5081_v5  ;;  %p5623_p12 = pnand %p5622_p11, %p5782_p5  ;;  %p5630_p2 = por %p5629_p1, %p5628_p0 }
  0x27   : > { %4835 = vmatprep.mubr.msk.bf16.mxu0 %vm501_vm0, %v5082_v6 }
  0x28   : > { %p5624_p13 = pneg %p5623_p12 }
  0x2a   : > { %p5631_p3 = pnand %p5630_p2, %p5624_p13 }
  0x2e   : > { %4836 = vmatmul.mubr.msk.bf16.gmra.mrb[8].mxu0 %vm501_vm0, %v5083_v7 }
  0x2f   : > { %4839 = vmatprep.mubr.msk.bf16.mxu0 %vm501_vm0, %v5084_v8 }
  0x36   : > { %4840 = vmatmul.mubr.msk.bf16.gmra.mrb[12].mxu0 %vm501_vm0, %v5085_v9 }
  0x37   : > { %4843 = vmatprep.mubr.msk.bf16.mxu0 %vm501_vm0, %v5086_v10 }
  0x3e   : > { %4844 = vmatmul.mubr.msk.bf16.gmra.mrb[16].mxu0 %vm501_vm0, %v5087_v11 }
  0x3f   : > { %4847 = vmatprep.mubr.msk.bf16.mxu0 %vm501_vm0, %v5088_v12 }
  0x46   : > { %4848 = vmatmul.mubr.msk.bf16.gmra.mrb[20].mxu0 %vm501_vm0, %v5089_v13 }
  0x47   : > { %4851 = vmatprep.mubr.msk.bf16.mxu0 %vm501_vm0, %v5090_v14 }
  0x4e   : > { %4852 = vmatmul.mubr.msk.bf16.gmra.mrb[24].mxu0 %vm501_vm0, %v5091_v15 }
  0x4f   : > { %4855 = vmatprep.mubr.msk.bf16.mxu0 %vm501_vm0, %v5092_v16 }
  0x56   : > { %4856 = vmatmul.mubr.msk.bf16.gmra.mrb[28].mxu0 %vm501_vm0, %v5093_v17 }
  0xf1   : > { %v4829_v24 = vpop.f32.mrb[0].mxu0 }
  0xf2   : > { %v5855_v25 = vadd.f32 %v4829_v24, %v5852_v23  ;;  %v584_v26 = vpop.f32.mrb[1].mxu0 }
  0xf3   : > { %v5858_v27 = vadd.f32 %v584_v26, %v5852_v23  ;;  %v4830_v28 = vpop.f32.mrb[2].mxu0 }
  0xf4   : > { %v4505_v29 = vmul.f32 -1.442695, %v5855_v25  ;;  %v5862_v30 = vadd.f32 %v4830_v28, %v5852_v23  ;;  %v587_v31 = vpop.f32.mrb[3].mxu0 }
  0xf5   : > { %v4503_v32 = vmul.f32 -1.442695, %v5858_v27  ;;  %v5866_v33 = vadd.f32 %v587_v31, %v5852_v23 }
  0xf6   : > { %5100 = vpow2.f32 %v4505_v29  ;;  %v4506_v34 = vmul.f32 -1.442695, %v5862_v30 }
  0xf7   : > { %5102 = vpow2.f32 %v4503_v32  ;;  %v4504_v35 = vmul.f32 -1.442695, %v5866_v33 }
  0xf8   : > { %5104 = vpow2.f32 %v4506_v34 }
  0xf9   : > { %5106 = vpow2.f32 %v4504_v35  ;;  %v4833_v36 = vpop.f32.mrb[4].mxu0 }
  0xfa   : > { %v5871_v37 = vadd.f32 %v4833_v36, %v5852_v23  ;;  %v600_v38 = vpop.f32.mrb[5].mxu0 }
  0xfb   : > { %v5874_v39 = vadd.f32 %v600_v38, %v5852_v23  ;;  %v4834_v40 = vpop.f32.mrb[6].mxu0 }
  0xfc   : > { %v4509_v41 = vmul.f32 -1.442695, %v5871_v37  ;;  %v5878_v42 = vadd.f32 %v4834_v40, %v5852_v23  ;;  %v603_v43 = vpop.f32.mrb[7].mxu0 }
  0xfd   : > { %v4507_v44 = vmul.f32 -1.442695, %v5874_v39  ;;  %v5882_v45 = vadd.f32 %v603_v43, %v5852_v23 }
  0xfe   : > { %5108 = vpow2.f32 %v4509_v41  ;;  %v4510_v46 = vmul.f32 -1.442695, %v5878_v42 }
  0xff   : > { %5110 = vpow2.f32 %v4507_v44  ;;  %v4508_v47 = vmul.f32 -1.442695, %v5882_v45 }
 0x100   : > { %v5101_v48 = vpop.eup %5100  ;;  %5112 = vpow2.f32 %v4510_v46 }
 0x101   : > { %v5103_v49 = vpop.eup %5102  ;;  %v809_v50 = vadd.f32 1.0, %v5101_v48  ;;  %5114 = vpow2.f32 %v4508_v47  ;;  %v4837_v51 = vpop.f32.mrb[8].mxu0 }
 0x102   : > { %v5105_v52 = vpop.eup %5104  ;;  %v807_v53 = vadd.f32 1.0, %v5103_v49  ;;  %v5887_v54 = vadd.f32 %v4837_v51, %v5852_v23  ;;  %v616_v55 = vpop.f32.mrb[9].mxu0 }
 0x103   : > { %v5107_v56 = vpop.eup %5106  ;;  %5116 = vrcp.f32 %v809_v50  ;;  %v810_v57 = vadd.f32 1.0, %v5105_v52  ;;  %v5890_v58 = vadd.f32 %v616_v55, %v5852_v23  ;;  %v4838_v59 = vpop.f32.mrb[10].mxu0 }
 0x104   : > { %5118 = vrcp.f32 %v807_v53  ;;  %v808_v60 = vadd.f32 1.0, %v5107_v56  ;;  %v4513_v61 = vmul.f32 -1.442695, %v5887_v54  ;;  %v5894_v62 = vadd.f32 %v4838_v59, %v5852_v23  ;;  %v619_v63 = vpop.f32.mrb[11].mxu0 }
 0x105   : > { %5120 = vrcp.f32 %v810_v57  ;;  %v4511_v0 = vmul.f32 -1.442695, %v5890_v58  ;;  %v5898_v1 = vadd.f32 %v619_v63, %v5852_v23 }
 0x106   : > { %5122 = vrcp.f32 %v808_v60  ;;  %v4514_v2 = vmul.f32 -1.442695, %v5894_v62 }
 0x107   : > { %5124 = vpow2.f32 %v4513_v61  ;;  %v4512_v3 = vmul.f32 -1.442695, %v5898_v1 }
 0x108   : > { %v5109_v4 = vpop.eup %5108  ;;  %5126 = vpow2.f32 %v4511_v0 }
 0x109   : > { %v5111_v5 = vpop.eup %5110  ;;  %v813_v6 = vadd.f32 1.0, %v5109_v4  ;;  %5128 = vpow2.f32 %v4514_v2  ;;  %v4841_v7 = vpop.f32.mrb[12].mxu0 }
 0x10a   : > { %v5113_v8 = vpop.eup %5112  ;;  %v811_v9 = vadd.f32 1.0, %v5111_v5  ;;  %5130 = vpow2.f32 %v4512_v3  ;;  %v5903_v10 = vadd.f32 %v4841_v7, %v5852_v23  ;;  %v632_v11 = vpop.f32.mrb[13].mxu0 }
 0x10b   : > { %v5115_v12 = vpop.eup %5114  ;;  %5132 = vrcp.f32 %v813_v6  ;;  %v814_v13 = vadd.f32 1.0, %v5113_v8  ;;  %v5906_v14 = vadd.f32 %v632_v11, %v5852_v23  ;;  %v4842_v15 = vpop.f32.mrb[14].mxu0 }
 0x10c   : > { %5134 = vrcp.f32 %v811_v9  ;;  %v812_v16 = vadd.f32 1.0, %v5115_v12  ;;  %v4517_v17 = vmul.f32 -1.442695, %v5903_v10  ;;  %v5910_v18 = vadd.f32 %v4842_v15, %v5852_v23  ;;  %v635_v19 = vpop.f32.mrb[15].mxu0 }
 0x10d   : > { %v5117_v24 = vpop.eup %5116  ;;  %5136 = vrcp.f32 %v814_v13  ;;  %v4515_v26 = vmul.f32 -1.442695, %v5906_v14  ;;  %v5914_v28 = vadd.f32 %v635_v19, %v5852_v23 }
 0x10e   : > { %v5119_v29 = vpop.eup %5118  ;;  %5138 = vrcp.f32 %v812_v16  ;;  %v4518_v31 = vmul.f32 -1.442695, %v5910_v18  ;;  %v5922_v40 = vmul.f32 %v5117_v24, %v5855_v25 }
 0x10f   : > { %v5121_v32 = vpop.eup %5120  ;;  %5140 = vpow2.f32 %v4517_v17  ;;  %v4516_v34 = vmul.f32 -1.442695, %v5914_v28  ;;  %v5925_v41 = vmul.f32 %v5119_v29, %v5858_v27 }
 0x110   : > { %v5123_v35 = vpop.eup %5122  ;;  %v5919_v36 = vmul.f32 %v5121_v32, %v5862_v30  ;;  %5142 = vpow2.f32 %v4515_v26  ;;  %8352 = vst [vmem:[#allocation9_spill] sm:$0xff] %v5922_v40 }
 0x111   : > { %v5125_v38 = vpop.eup %5124  ;;  %8353 = vst [vmem:[#allocation10_spill] sm:$0xff] %v5925_v41  ;;  %v5928_v43 = vmul.f32 %v5123_v35, %v5866_v33  ;;  %5144 = vpow2.f32 %v4518_v31  ;;  %v4845_v44 = vpop.f32.mrb[16].mxu0 }
 0x112   : > { %8351 = vst [vmem:[#allocation8_spill] sm:$0xff] %v5919_v36  ;;  %v5127_v46 = vpop.eup %5126  ;;  %v817_v47 = vadd.f32 1.0, %v5125_v38  ;;  %5146 = vpow2.f32 %v4516_v34  ;;  %v5931_v48 = vadd.f32 %v4845_v44, %v5852_v23  ;;  %v648_v30 = vpop.f32.mrb[17].mxu0  ;;  %v936_v25 = vpack.c.bf16 %v5919_v36, %v5922_v40 }
 0x113   : > { %8354 = vst [vmem:[#allocation11_spill] sm:$0xff] %v5928_v43  ;;  %v5129_v49 = vpop.eup %5128  ;;  %v815_v50 = vadd.f32 1.0, %v5127_v46  ;;  %v5936_v27 = vadd.f32 %v648_v30, %v5852_v23  ;;  %v4846_v33 = vpop.f32.mrb[18].mxu0  ;;  %v935_v51 = vpack.c.bf16 %v5928_v43, %v5925_v41 }
 0x114   : > { %v5131_v52 = vpop.eup %5130  ;;  %5148 = vrcp.f32 %v817_v47  ;;  %v818_v53 = vadd.f32 1.0, %v5129_v49  ;;  %v4521_v55 = vmul.f32 -1.442695, %v5931_v48  ;;  %v5942_v56 = vadd.f32 %v4846_v33, %v5852_v23  ;;  %v651_v57 = vpop.f32.mrb[19].mxu0 }
 0x115   : > { %v5133_v59 = vpop.eup %5132  ;;  %5150 = vrcp.f32 %v815_v50  ;;  %v816_v60 = vadd.f32 1.0, %v5131_v52  ;;  %v4519_v61 = vmul.f32 -1.442695, %v5936_v27  ;;  %v5946_v63 = vadd.f32 %v651_v57, %v5852_v23  ;;  %4861 = vmatprep.mubr.msk.bf16.mxu1 %vm963_vm1, %v935_v51 }
 0x116   : > { %v5135_v0 = vpop.eup %5134  ;;  %5152 = vrcp.f32 %v818_v53  ;;  %v4522_v2 = vmul.f32 -1.442695, %v5942_v56  ;;  %4862 = vmatmul.mubr.msk.bf16.vlgmr.msra.gmra.mrb[0].mxu1 %vm963_vm1, %v936_v25  ;;  %v5953_v6 = vmul.f32 %v5133_v59, %v5871_v37 }
 0x117   : > { %v5137_v3 = vpop.eup %5136  ;;  %5154 = vrcp.f32 %v816_v60  ;;  %v4520_v4 = vmul.f32 -1.442695, %v5946_v63  ;;  %v5959_v9 = vmul.f32 %v5135_v0, %v5874_v39 }
 0x118   : > { %v5139_v5 = vpop.eup %5138  ;;  %8355 = vst [vmem:[#allocation12_spill] sm:$0xff] %v5953_v6  ;;  %v5956_v7 = vmul.f32 %v5137_v3, %v5878_v42  ;;  %5156 = vpow2.f32 %v4521_v55 }
 0x119   : > { %v5141_v8 = vpop.eup %5140  ;;  %8357 = vst [vmem:[#allocation14_spill] sm:$0xff] %v5959_v9  ;;  %v5962_v11 = vmul.f32 %v5139_v5, %v5882_v45  ;;  %5158 = vpow2.f32 %v4519_v61  ;;  %v4849_v12 = vpop.f32.mrb[20].mxu0 }
 0x11a   : > { %8356 = vst [vmem:[#allocation13_spill] sm:$0xff] %v5956_v7  ;;  %v5143_v13 = vpop.eup %5142  ;;  %v938_v15 = vpack.c.bf16 %v5956_v7, %v5953_v6  ;;  %v821_v16 = vadd.f32 1.0, %v5141_v8  ;;  %5160 = vpow2.f32 %v4522_v2  ;;  %v5967_v37 = vadd.f32 %v4849_v12, %v5852_v23  ;;  %v664_v42 = vpop.f32.mrb[21].mxu0 }
 0x11b   : > { %8358 = vst [vmem:[#allocation15_spill] sm:$0xff] %v5962_v11  ;;  %v5145_v17 = vpop.eup %5144  ;;  %v937_v39 = vpack.c.bf16 %v5962_v11, %v5959_v9  ;;  %v819_v19 = vadd.f32 1.0, %v5143_v13  ;;  %5162 = vpow2.f32 %v4520_v4  ;;  %v5972_v45 = vadd.f32 %v664_v42, %v5852_v23  ;;  %v4850_v24 = vpop.f32.mrb[22].mxu0 }
 0x11c   : > { %v5147_v26 = vpop.eup %5146  ;;  %5164 = vrcp.f32 %v821_v16  ;;  %v822_v29 = vadd.f32 1.0, %v5145_v17  ;;  %v4525_v31 = vmul.f32 -1.442695, %v5967_v37  ;;  %v5976_v32 = vadd.f32 %v4850_v24, %v5852_v23  ;;  %v667_v34 = vpop.f32.mrb[23].mxu0 }
 0x11d   : > { %5166 = vrcp.f32 %v819_v19  ;;  %v820_v35 = vadd.f32 1.0, %v5147_v26  ;;  %v4523_v38 = vmul.f32 -1.442695, %v5972_v45  ;;  %v5980_v44 = vadd.f32 %v667_v34, %v5852_v23  ;;  %4865 = vmatprep.mubr.msk.bf16.mxu1 %vm963_vm1, %v937_v39 }
 0x11e   : > { %v5149_v46 = vpop.eup %5148  ;;  %5168 = vrcp.f32 %v822_v29  ;;  %v4526_v47 = vmul.f32 -1.442695, %v5976_v32  ;;  %4866 = vmatmul.mubr.msk.bf16.gmra.mrb[4].mxu1 %vm963_vm1, %v938_v15 }
 0x11f   : > { %v5151_v30 = vpop.eup %5150  ;;  %5170 = vrcp.f32 %v820_v35  ;;  %v4524_v49 = vmul.f32 -1.442695, %v5980_v44  ;;  %v5987_v33 = vmul.f32 %v5149_v46, %v5887_v54 }
 0x120   : > { %v5153_v25 = vpop.eup %5152  ;;  %5172 = vpow2.f32 %v4525_v31  ;;  %v5993_v55 = vmul.f32 %v5151_v30, %v5890_v58 }
 0x121   : > { %v5155_v50 = vpop.eup %5154  ;;  %8359 = vst [vmem:[#allocation16_spill] sm:$0xff] %v5987_v33  ;;  %v5990_v51 = vmul.f32 %v5153_v25, %v5894_v62  ;;  %5174 = vpow2.f32 %v4523_v38  ;;  %v4853_v52 = vpop.f32.mrb[24].mxu0 }
 0x122   : > { %v5157_v53 = vpop.eup %5156  ;;  %8361 = vst [vmem:[#allocation18_spill] sm:$0xff] %v5993_v55  ;;  %v5996_v57 = vmul.f32 %v5155_v50, %v5898_v1  ;;  %5176 = vpow2.f32 %v4526_v47  ;;  %v5999_v59 = vadd.f32 %v4853_v52, %v5852_v23  ;;  %v680_v60 = vpop.f32.mrb[25].mxu0 }
 0x123   : > { %8360 = vst [vmem:[#allocation17_spill] sm:$0xff] %v5990_v51  ;;  %v5159_v61 = vpop.eup %5158  ;;  %v825_v54 = vadd.f32 1.0, %v5157_v53  ;;  %5178 = vpow2.f32 %v4524_v49  ;;  %v6002_v62 = vadd.f32 %v680_v60, %v5852_v23  ;;  %v4854_v0 = vpop.f32.mrb[26].mxu0  ;;  %v940_v58 = vpack.c.bf16 %v5990_v51, %v5987_v33 }
 0x124   : > { %8362 = vst [vmem:[#allocation19_spill] sm:$0xff] %v5996_v57  ;;  %v5161_v2 = vpop.eup %5160  ;;  %v939_v1 = vpack.c.bf16 %v5996_v57, %v5993_v55  ;;  %v823_v3 = vadd.f32 1.0, %v5159_v61  ;;  %v6009_v4 = vadd.f32 %v4854_v0, %v5852_v23  ;;  %v683_v5 = vpop.f32.mrb[27].mxu0  ;;  %v4529_v13 = vmul.f32 -1.442695, %v5999_v59 }
 0x125   : > { %v5163_v8 = vpop.eup %5162  ;;  %5180 = vrcp.f32 %v825_v54  ;;  %v826_v12 = vadd.f32 1.0, %v5161_v2  ;;  %v6013_v15 = vadd.f32 %v683_v5, %v5852_v23  ;;  %v4527_v17 = vmul.f32 -1.442695, %v6002_v62 }
 0x126   : > { %v5165_v16 = vpop.eup %5164  ;;  %5182 = vrcp.f32 %v823_v3  ;;  %v824_v42 = vadd.f32 1.0, %v5163_v8  ;;  %4869 = vmatprep.mubr.msk.bf16.mxu1 %vm963_vm1, %v939_v1  ;;  %v4530_v19 = vmul.f32 -1.442695, %v6009_v4  ;;  %v1414_v51 = vadd.s32 128, %v5840_v20 }
 0x127   : > { %v5167_v39 = vpop.eup %5166  ;;  %5184 = vrcp.f32 %v826_v12  ;;  %4870 = vmatmul.mubr.msk.bf16.gmra.mrb[8].mxu1 %vm963_vm1, %v940_v58  ;;  %v4528_v26 = vmul.f32 -1.442695, %v6013_v15  ;;  %v6021_v31 = vmul.f32 %v5165_v16, %v5903_v10 }
 0x128   : > { %v5169_v24 = vpop.eup %5168  ;;  %5186 = vrcp.f32 %v824_v42  ;;  %v6027_v46 = vmul.f32 %v5167_v39, %v5906_v14  ;;  %v1550_v36 = vand.u32 15, %v1414_v51 }
 0x129   : > { %v5171_v29 = vpop.eup %5170  ;;  %8363 = vst [vmem:[#allocation20_spill] sm:$0xff] %v6021_v31  ;;  %v6024_v34 = vmul.f32 %v5169_v24, %v5910_v18  ;;  %5188 = vpow2.f32 %v4529_v13  ;;  %v4857_v35 = vpop.f32.mrb[28].mxu0 }
 0x12a   : > { %v5173_v38 = vpop.eup %5172  ;;  %8365 = vst [vmem:[#allocation22_spill] sm:$0xff] %v6027_v46  ;;  %v6030_v47 = vmul.f32 %v5171_v29, %v5914_v28  ;;  %5190 = vpow2.f32 %v4527_v17  ;;  %v6033_v30 = vadd.f32 %v4857_v35, %v5852_v23  ;;  %v696_v49 = vpop.f32.mrb[29].mxu0 }
 0x12b   : > { %8364 = vst [vmem:[#allocation21_spill] sm:$0xff] %v6024_v34  ;;  %v5175_v25 = vpop.eup %5174  ;;  %v829_v10 = vadd.f32 1.0, %v5173_v38  ;;  %5192 = vpow2.f32 %v4530_v19  ;;  %v6036_v18 = vadd.f32 %v696_v49, %v5852_v23  ;;  %v4858_v50 = vpop.f32.mrb[30].mxu0  ;;  %v942_v14 = vpack.c.bf16 %v6024_v34, %v6021_v31 }
 0x12c   : > { %8366 = vst [vmem:[#allocation23_spill] sm:$0xff] %v6030_v47  ;;  %v5177_v52 = vpop.eup %5176  ;;  %v941_v28 = vpack.c.bf16 %v6030_v47, %v6027_v46  ;;  %v827_v53 = vadd.f32 1.0, %v5175_v25  ;;  %5194 = vpow2.f32 %v4528_v26  ;;  %v699_v60 = vpop.f32.mrb[31].mxu0  ;;  %v4533_v0 = vmul.f32 -1.442695, %v6033_v30 }
 0x12d   : > { %v5179_v61 = vpop.eup %5178  ;;  %5196 = vrcp.f32 %v829_v10  ;;  %v830_v54 = vadd.f32 1.0, %v5177_v52  ;;  %v6044_v2 = vadd.f32 %v4858_v50, %v5852_v23  ;;  %v4531_v1 = vmul.f32 -1.442695, %v6036_v18 }
 0x12e   : > { %5198 = vrcp.f32 %v827_v53  ;;  %v828_v58 = vadd.f32 1.0, %v5179_v61  ;;  %v6048_v3 = vadd.f32 %v699_v60, %v5852_v23  ;;  %4873 = vmatprep.mubr.msk.bf16.mxu1 %vm963_vm1, %v941_v28 }
 0x12f   : > { %v5181_v5 = vpop.eup %5180  ;;  %5200 = vrcp.f32 %v830_v54  ;;  %v4534_v8 = vmul.f32 -1.442695, %v6044_v2  ;;  %4874 = vmatmul.mubr.msk.bf16.gmra.mrb[12].mxu1 %vm963_vm1, %v942_v14 }
 0x130   : > { %v5183_v12 = vpop.eup %5182  ;;  %5202 = vrcp.f32 %v828_v58  ;;  %v4532_v13 = vmul.f32 -1.442695, %v6048_v3  ;;  %v6064_v26 = vmul.f32 %v5181_v5, %v5931_v48 }
 0x131   : > { %v5185_v16 = vpop.eup %5184  ;;  %5204 = vpow2.f32 %v4533_v0  ;;  %v6058_v39 = vmul.f32 %v5183_v12, %v5936_v27 }
 0x132   : > { %v5187_v42 = vpop.eup %5186  ;;  %v6055_v17 = vmul.f32 %v5185_v16, %v5942_v56  ;;  %5206 = vpow2.f32 %v4531_v1  ;;  %8370 = vst [vmem:[#allocation27_spill] sm:$0xff] %v6064_v26 }
 0x133   : > { %v5189_v23 = vpop.eup %5188  ;;  %8368 = vst [vmem:[#allocation25_spill] sm:$0xff] %v6058_v39  ;;  %v6061_v19 = vmul.f32 %v5187_v42, %v5946_v63  ;;  %5208 = vpow2.f32 %v4534_v8 }
 0x134   : > { %8367 = vst [vmem:[#allocation24_spill] sm:$0xff] %v6055_v17  ;;  %v5191_v24 = vpop.eup %5190  ;;  %v833_v29 = vadd.f32 1.0, %v5189_v23  ;;  %5210 = vpow2.f32 %v4532_v13  ;;  %v944_v27 = vpack.c.bf16 %v6055_v17, %v6064_v26 }
 0x135   : > { %8369 = vst [vmem:[#allocation26_spill] sm:$0xff] %v6061_v19  ;;  %v5193_v35 = vpop.eup %5192  ;;  %v943_v56 = vpack.c.bf16 %v6061_v19, %v6058_v39  ;;  %v831_v38 = vadd.f32 1.0, %v5191_v24  ;;  %v8390_v19 = vmov 0.0  }
 0x136   : > { %v5195_v49 = vpop.eup %5194  ;;  %5212 = vrcp.f32 %v833_v29  ;;  %v834_v25 = vadd.f32 1.0, %v5193_v35 }
 0x137   : > { %v5197_v63 = vpop.eup %5196  ;;  %5214 = vrcp.f32 %v831_v38  ;;  %v832_v10 = vadd.f32 1.0, %v5195_v49  ;;  %4877 = vmatprep.mubr.msk.bf16.mxu1 %vm963_vm1, %v943_v56 }
 0x138   : > { %v5199_v48 = vpop.eup %5198  ;;  %5216 = vrcp.f32 %v834_v25  ;;  %4878 = vmatmul.mubr.msk.bf16.gmra.mrb[16].mxu1 %vm963_vm1, %v944_v27  ;;  %v6082_v54 = vmul.f32 %v5197_v63, %v5967_v37 }
 0x139   : > { %v5201_v50 = vpop.eup %5200  ;;  %5218 = vrcp.f32 %v832_v10  ;;  %v6076_v53 = vmul.f32 %v5199_v48, %v5972_v45  ;;  %v1400_v48 = vadd.s32 16, %v5840_v20 }
 0x13a   : > { %v5203_v52 = vpop.eup %5202  ;;  %v6073_v14 = vmul.f32 %v5201_v50, %v5976_v32  ;;  %8374 = vst [vmem:[#allocation31_spill] sm:$0xff] %v6082_v54  ;;  %v2082_v50 = vld [vmem:[%s8245_s4] sm:$0xff] }
 0x13b   : > { %v5205_v28 = vpop.eup %5204  ;;  %8372 = vst [vmem:[#allocation29_spill] sm:$0xff] %v6076_v53  ;;  %v6079_v60 = vmul.f32 %v5203_v52, %v5980_v44 }
 0x13c   : > { %8371 = vst [vmem:[#allocation28_spill] sm:$0xff] %v6073_v14  ;;  %v5207_v61 = vpop.eup %5206  ;;  %v837_v0 = vadd.f32 1.0, %v5205_v28  ;;  %v946_v32 = vpack.c.bf16 %v6073_v14, %v6082_v54  ;;  %v1408_v14 = vadd.s32 80, %v5840_v20 }
 0x13d   : > { %8373 = vst [vmem:[#allocation30_spill] sm:$0xff] %v6079_v60  ;;  %v5209_v58 = vpop.eup %5208  ;;  %v945_v1 = vpack.c.bf16 %v6079_v60, %v6076_v53  ;;  %v835_v5 = vadd.f32 1.0, %v5207_v61 }
 0x13e   : > { %v5211_v8 = vpop.eup %5210  ;;  %5220 = vrcp.f32 %v837_v0  ;;  %v838_v45 = vadd.f32 1.0, %v5209_v58  ;;  %v2083_v0 = vld [vmem:[%s8245_s4 + $0x8] sm:$0xff]  ;;  %v2570_v58 = vsub.s32 4, %v5840_v20  ;;  %v1508_v26 = vand.u32 15, %v1408_v14 }
 0x13f   : > { %5222 = vrcp.f32 %v835_v5  ;;  %v836_v12 = vadd.f32 1.0, %v5211_v8  ;;  %4881 = vmatprep.mubr.msk.bf16.mxu1 %vm963_vm1, %v945_v1  ;;  %v8252_v1 = vsub.s32 7, %v5840_v20  ;;  %v2434_v5 = vsub.s32 2, %v5840_v20 }
 0x140   : > { %v5213_v44 = vpop.eup %5212  ;;  %5224 = vrcp.f32 %v838_v45  ;;  %4882 = vmatmul.mubr.msk.bf16.gmra.mrb[20].mxu1 %vm963_vm1, %v946_v32  ;;  %v2502_v8 = vsub.s32 3, %v5840_v20  ;;  %v1452_v45 = vand.u32 15, %v1400_v48  ;;  %vm6292_vm12 = vcmp.ne.s32.totalorder %v1508_v26, 0 }
 0x141   : > { %v5215_v37 = vpop.eup %5214  ;;  %5226 = vrcp.f32 %v836_v12  ;;  %v6100_v29 = vmul.f32 %v5213_v44, %v5999_v59  ;;  %v6158_v12 = vrot.slane %v2082_v50, %v5843_v21  ;;  %v1413_v26 = vadd.s32 120, %v5840_v20 }
 0x142   : > { %v5217_v13 = vpop.eup %5216  ;;  %v6094_v23 = vmul.f32 %v5215_v37, %v6002_v62  ;;  %vm1868_vm4 = vcmp.ne.s32.totalorder %v1452_v45, 0 }
 0x143   : > { %v5219_v16 = vpop.eup %5218  ;;  %v6091_v42 = vmul.f32 %v5217_v13, %v6009_v4  ;;  %8378 = vst [vmem:[#allocation35_spill] sm:$0xff] %v6100_v29  ;;  %8384 = vst [vmem:[#allocation41_spill] sm:$0xff] %v6158_v12 }
 0x144   : > { %8376 = vst [vmem:[#allocation33_spill] sm:$0xff] %v6094_v23  ;;  %v6097_v24 = vmul.f32 %v5219_v16, %v6013_v15  ;;  %v6163_v16 = vrot.slane %v2083_v0, %v5843_v21 }
 0x145   : > { %8375 = vst [vmem:[#allocation32_spill] sm:$0xff] %v6091_v42  ;;  %v948_v56 = vpack.c.bf16 %v6091_v42, %v6100_v29 }
 0x146   : > { %8377 = vst [vmem:[#allocation34_spill] sm:$0xff] %v6097_v24  ;;  %v947_v35 = vpack.c.bf16 %v6097_v24, %v6094_v23 }
 0x148   : > { %v5221_v38 = vpop.eup %5220  ;;  %4885 = vmatprep.mubr.msk.bf16.mxu1 %vm963_vm1, %v947_v35  ;;  %v6166_v35 = vrot.slane %v5848_v22, %v2434_v5 }
 0x149   : > { %v5223_v4 = vpop.eup %5222  ;;  %4886 = vmatmul.mubr.msk.bf16.gmra.mrb[24].mxu1 %vm963_vm1, %v948_v56  ;;  %v6118_v25 = vmul.f32 %v5221_v38, %v6033_v30  ;;  %v1438_v30 = vand.u32 15, %v5840_v20  ;;  %v6169_v56 = vrot.slane %v5848_v22, %v2502_v8 }
 0x14a   : > { %v5225_v62 = vpop.eup %5224  ;;  %v6112_v59 = vmul.f32 %v5223_v4, %v6036_v18  ;;  %v955_v18 = vsub.s32 1, %v5840_v20 }
 0x14b   : > { %v5227_v49 = vpop.eup %5226  ;;  %v6109_v15 = vmul.f32 %v5225_v62, %v6044_v2  ;;  %8382 = vst [vmem:[#allocation39_spill] sm:$0xff] %v6118_v25  ;;  %v8257_v2 = vmov 0.0   ;;  %vm1866_vm3 = vcmp.ne.s32.totalorder %v1438_v30, 0 }
 0x14c   : > { %8380 = vst [vmem:[#allocation37_spill] sm:$0xff] %v6112_v59  ;;  %v6115_v27 = vmul.f32 %v5227_v49, %v6048_v3  ;;  %360 = vst.msk [vmem:[#allocation2 + $0x8] sm:$0xff] %vm358_vm2, %v8257_v2  ;;  %4912 = vmatprep.subr.mxu0 %v8257_v2  ;;  %v1399_v3 = vadd.s32 8, %v5840_v20  ;;  %v6147_v52 = vrot.slane %v5848_v22, %v955_v18  ;;  %v4584_v28 = vsel %vm1866_vm3, 1.0, %v8257_v2 }
 0x14d   : > { %8379 = vst [vmem:[#allocation36_spill] sm:$0xff] %v6109_v15  ;;  %v950_v10 = vpack.c.bf16 %v6109_v15, %v6118_v25  ;;  %361 = vst.msk [vmem:[#allocation2 + $0x10] sm:$0xff] %vm358_vm2, %v8257_v2  ;;  %v6160_v37 = vrot.slane %v2082_v50, %v955_v18  ;;  %v6174_v49 = vrot.slane %v2082_v50, %v2570_v58  ;;  %v1401_v18 = vadd.s32 24, %v5840_v20 }
 0x14e   : > { %8381 = vst [vmem:[#allocation38_spill] sm:$0xff] %v6115_v27  ;;  %v949_v63 = vpack.c.bf16 %v6115_v27, %v6112_v59  ;;  %362 = vst.msk [vmem:[#allocation2 + $0x18] sm:$0xff] %vm358_vm2, %v8257_v2  ;;  %v1445_v32 = vand.u32 15, %v1399_v3  ;;  %v6198_v45 = vsel %vm1868_vm4, 1.0, %v8257_v2  ;;  %v1403_v15 = vadd.s32 40, %v5840_v20 }
 0x14f   : > { %363 = vst.msk [vmem:[#allocation2 + $0x120] sm:$0xff] %vm358_vm2, %v8257_v2  ;;  %364 = vst.msk [vmem:[#allocation2 + $0x128] sm:$0xff] %vm358_vm2, %v8257_v2  ;;  %vm6358_vm4 = vcmp.ne.s32.totalorder %v1550_v36, 0 }
 0x150   : > { %4889 = vmatprep.mubr.msk.bf16.mxu1 %vm963_vm1, %v949_v63  ;;  %365 = vst.msk [vmem:[#allocation2 + $0x130] sm:$0xff] %vm358_vm2, %v8257_v2  ;;  %8383 = vst [vmem:[#allocation40_spill] sm:$0xff] %v6147_v52  ;;  %v6178_v63 = vrot.slane %v2082_v50, %v8252_v1  ;;  %vm1975_vm5 = vcmp.ne.s32.totalorder %v1445_v32, 15  ;;  %v6206_v1 = vrot.slane %v2082_v50, %v2502_v8  ;;  %v1459_v8 = vand.u32 15, %v1401_v18 }
 0x151   : > { %4890 = vmatmul.mubr.msk.bf16.gmra.mrb[28].mxu1 %vm963_vm1, %v950_v10  ;;  %8385 = vst [vmem:[#allocation42_spill] sm:$0xff] %v6160_v37  ;;  %v1406_v18 = vadd.s32 64, %v5840_v20 }
 0x152   : > { %8386 = vst [vmem:[#allocation43_spill] sm:$0xff] %v6206_v1  ;;  %vm1977_vm6 = vcmp.ne.s32.totalorder %v1459_v8, 15 }
 0x153   : > { %v6248_v39 = vsel %vm1977_vm6, 1.0, %v8390_v19 }
 0x154   : > { %v2116_v61 = vld [vmem:[#allocation2 + $0xf] sm:$0xff] }
 0x155   : > { %v2152_v13 = vmul.f32 %v4584_v28, %v2116_v61  ;;  %v2188_v62 = vld [vmem:[#allocation2 + $0x10] sm:$0xff]  ;;  %v2189_v59 = vld [vmem:[#allocation2 + $0x18] sm:$0xff] }
 0x156   : > { %v2368_v0 = vmul.f32 %v6160_v37, %v2188_v62  ;;  %v6204_v62 = vsel %vm1975_vm5, 1.0, %v8257_v2  ;;  %v2117_v27 = vld [vmem:[#allocation2 + $0x17] sm:$0xff]  ;;  %v8387_v2 = vsub.s32 6, %v5840_v20 }
 0x157   : > { %v2300_v61 = vmul.f32 %v6158_v12, %v2152_v13 }
 0x158   : > { %v6215_v24 = vrot.slane %v2082_v50, %v8387_v2 }
 0x159   : > { %v2400_v32 = vadd.f32 %v2368_v0, %v2300_v61  ;;  %v2301_v61 = vmul.f32 %v6158_v12, %v2117_v27  ;;  %v2369_v0 = vmul.f32 %v6160_v37, %v2189_v59  ;;  %v1405_v59 = vadd.s32 56, %v5840_v20 }
 0x1e9   : > { %v4863_v44 = vpop.f32.mrb[0].mxu1 }
 0x1ea   : > { %v6172_v38 = vadd.f32 %v4863_v44, %v6147_v52  ;;  %v1046_v4 = vpop.f32.mrb[1].mxu1 }
 0x1eb   : > { %v6181_v10 = vadd.f32 %v1046_v4, %v6147_v52  ;;  %v4864_v30 = vpop.f32.mrb[2].mxu1  ;;  %v2638_v4 = vsub.s32 5, %v5840_v20 }
 0x1ec   : > { %v4554_v22 = vmul.f32 -1.442695, %v6172_v38  ;;  %v6186_v3 = vadd.f32 %v4864_v30, %v6147_v52  ;;  %v1049_v48 = vpop.f32.mrb[3].mxu1  ;;  %v6200_v30 = vrot.slane %v2082_v50, %v2434_v5  ;;  %v1404_v5 = vadd.s32 48, %v5840_v20 }
 0x1ed   : > { %v4552_v28 = vmul.f32 -1.442695, %v6181_v10  ;;  %v6192_v58 = vadd.f32 %v1049_v48, %v6147_v52  ;;  %v2224_v48 = vld [vmem:[#allocation2 + $0x11] sm:$0xff]  ;;  %v6211_v25 = vrot.slane %v2082_v50, %v2638_v4 }
 0x1ee   : > { %5228 = vpow2.f32 %v4554_v22  ;;  %v4555_v44 = vmul.f32 -1.442695, %v6186_v3  ;;  %v1402_v22 = vadd.s32 32, %v5840_v20  ;;  %v2436_v42 = vmul.f32 %v6200_v30, %v2224_v48 }
 0x1ef   : > { %5230 = vpow2.f32 %v4552_v28  ;;  %v4553_v13 = vmul.f32 -1.442695, %v6192_v58  ;;  %v1473_v48 = vand.u32 15, %v1403_v15  ;;  %v1480_v53 = vand.u32 15, %v1404_v5 }
 0x1f0   : > { %5232 = vpow2.f32 %v4555_v44  ;;  %v1466_v29 = vand.u32 15, %v1402_v22  ;;  %v6237_v22 = vadd.f32 %v2436_v42, %v2400_v32  ;;  %v6245_v5 = vadd.f32 %v2369_v0, %v2301_v61 }
 0x1f1   : > { %5234 = vpow2.f32 %v4553_v13  ;;  %v4867_v28 = vpop.f32.mrb[4].mxu1  ;;  %vm6250_vm8 = vcmp.ne.s32.totalorder %v1480_v53, 0  ;;  %vm6254_vm9 = vcmp.ne.s32.totalorder %v1473_v48, 15  ;;  %v1487_v61 = vand.u32 15, %v1405_v59 }
 0x1f2   : > { %v6218_v44 = vadd.f32 %v4867_v28, %v6147_v52  ;;  %v1062_v23 = vpop.f32.mrb[5].mxu1  ;;  %vm6241_vm7 = vcmp.ne.s32.totalorder %v1466_v29, 0 }
 0x1f3   : > { %v6224_v13 = vadd.f32 %v1062_v23, %v6147_v52  ;;  %v4868_v4 = vpop.f32.mrb[6].mxu1  ;;  %v6268_v59 = vsel %vm6241_vm7, 1.0, %v8390_v19  ;;  %vm6288_vm11 = vcmp.ne.s32.totalorder %v1487_v61, 15 }
 0x1f4   : > { %v4558_v60 = vmul.f32 -1.442695, %v6218_v44  ;;  %v6228_v2 = vadd.f32 %v4868_v4, %v6147_v52  ;;  %v1065_v50 = vpop.f32.mrb[7].mxu1 }
 0x1f5   : > { %v4556_v28 = vmul.f32 -1.442695, %v6224_v13  ;;  %v6233_v27 = vadd.f32 %v1065_v50, %v6147_v52 }
 0x1f6   : > { %5236 = vpow2.f32 %v4558_v60  ;;  %v4559_v23 = vmul.f32 -1.442695, %v6228_v2  ;;  %v1494_v60 = vand.u32 15, %v1406_v18  ;;  %v1407_v18 = vadd.s32 72, %v5840_v20 }
 0x1f7   : > { %5238 = vpow2.f32 %v4556_v28  ;;  %v4557_v4 = vmul.f32 -1.442695, %v6233_v27 }
 0x1f8   : > { %v5229_v54 = vpop.eup %5228  ;;  %5240 = vpow2.f32 %v4559_v23  ;;  %vm1874_vm10 = vcmp.ne.s32.totalorder %v1494_v60, 0  ;;  %v6279_v60 = vsel %vm6254_vm9, 1.0, %v8390_v19 }
 0x1f9   : > { %v5231_v8 = vpop.eup %5230  ;;  %v1271_v50 = vadd.f32 1.0, %v5229_v54  ;;  %5242 = vpow2.f32 %v4557_v4  ;;  %v6273_v4 = vsel %vm6250_vm8, 1.0, %v8390_v19 }
 0x1fa   : > { %v5233_v29 = vpop.eup %5232  ;;  %v1269_v28 = vadd.f32 1.0, %v5231_v8  ;;  %v4871_v0 = vpop.f32.mrb[8].mxu1 }
 0x1fb   : > { %v5235_v23 = vpop.eup %5234  ;;  %5244 = vrcp.f32 %v1271_v50  ;;  %v1272_v54 = vadd.f32 1.0, %v5233_v29  ;;  %v6260_v17 = vadd.f32 %v4871_v0, %v6147_v52  ;;  %v1078_v53 = vpop.f32.mrb[9].mxu1  ;;  %v1501_v0 = vand.u32 15, %v1407_v18 }
 0x1fc   : > { %5246 = vrcp.f32 %v1269_v28  ;;  %v1270_v48 = vadd.f32 1.0, %v5235_v23  ;;  %v6263_v47 = vadd.f32 %v1078_v53, %v6147_v52  ;;  %v4872_v8 = vpop.f32.mrb[10].mxu1  ;;  %v6286_v28 = vsel %vm1874_vm10, 1.0, %v8390_v19 }
 0x1fd   : > { %5248 = vrcp.f32 %v1272_v54  ;;  %v4562_v14 = vmul.f32 -1.442695, %v6260_v17  ;;  %v1081_v50 = vpop.f32.mrb[11].mxu1  ;;  %v6283_v15 = vadd.f32 %v4872_v8, %v6147_v52  ;;  %v1409_v54 = vadd.s32 88, %v5840_v20 }
 0x1fe   : > { %5250 = vrcp.f32 %v1270_v48  ;;  %v4560_v29 = vmul.f32 -1.442695, %v6263_v47  ;;  %v1410_v53 = vadd.s32 96, %v5840_v20  ;;  %v1411_v48 = vadd.s32 104, %v5840_v20 }
 0x1ff   : > { %v1412_v8 = vadd.s32 112, %v5840_v20  ;;  %5252 = vpow2.f32 %v4562_v14  ;;  %v6301_v61 = vadd.f32 %v1081_v50, %v6147_v52  ;;  %v4563_v57 = vmul.f32 -1.442695, %v6283_v15 }
 0x200   : > { %v5237_v32 = vpop.eup %5236  ;;  %5254 = vpow2.f32 %v4560_v29  ;;  %vm6311_vm13 = vcmp.ne.s32.totalorder %v1501_v0, 15  ;;  %v1515_v29 = vand.u32 15, %v1409_v54  ;;  %v1529_v7 = vand.u32 15, %v1411_v48 }
 0x201   : > { %v5239_v46 = vpop.eup %5238  ;;  %v1275_v34 = vadd.f32 1.0, %v5237_v32  ;;  %v6309_v32 = vsel %vm6288_vm11, 1.0, %v8390_v19  ;;  %v4561_v42 = vmul.f32 -1.442695, %v6301_v61  ;;  %v1536_v0 = vand.u32 15, %v1412_v8 }
 0x202   : > { %v5241_v18 = vpop.eup %5240  ;;  %v1273_v31 = vadd.f32 1.0, %v5239_v46  ;;  %v4875_v55 = vpop.f32.mrb[12].mxu1  ;;  %v6318_v46 = vsel %vm6292_vm12, 1.0, %v8390_v19  ;;  %vm6334_vm15 = vcmp.ne.s32.totalorder %v1515_v29, 15  ;;  %vm6351_vm3 = vcmp.ne.s32.totalorder %v1529_v7, 15 }
 0x203   : > { %5256 = vrcp.f32 %v1275_v34  ;;  %v1276_v33 = vadd.f32 1.0, %v5241_v18  ;;  %v1094_v50 = vpop.f32.mrb[13].mxu1  ;;  %v5243_v11 = vpop.eup %5242  ;;  %8401 = vst [vmem:[#allocation44_spill] sm:$0xff] %v6318_v46  ;;  %v1522_v34 = vand.u32 15, %v1410_v53  ;;  %v6324_v54 = vadd.f32 %v4875_v55, %v6147_v52 }
 0x204   : > { %5258 = vrcp.f32 %v1273_v31  ;;  %v4876_v18 = vpop.f32.mrb[14].mxu1  ;;  %v1543_v31 = vand.u32 15, %v1413_v26  ;;  %v1415_v53 = vadd.s32 136, %v5840_v20  ;;  %vm6343_vm0 = vcmp.ne.s32.totalorder %v1536_v0, 0 }
 0x205   : > { %v5245_v9 = vpop.eup %5244  ;;  %5260 = vrcp.f32 %v1276_v33  ;;  %v1097_v6 = vpop.f32.mrb[15].mxu1  ;;  %8402 = vst [vmem:[#allocation45_spill] sm:$0xff] %v6324_v54  ;;  %v1416_v33 = vadd.s32 144, %v5840_v20  ;;  %vm6330_vm14 = vcmp.ne.s32.totalorder %v1522_v34, 0  ;;  %v6371_v36 = vsel %vm6311_vm13, 1.0, %v8390_v19 }
 0x206   : > { %v5247_v43 = vpop.eup %5246  ;;  %v1367_v41 = vmul.f32 %v5245_v9, %v6172_v38  ;;  %5262 = vpow2.f32 %v4563_v57  ;;  %v1274_v57 = vadd.f32 1.0, %v5243_v11  ;;  %vm6364_vm5 = vcmp.ne.s32.totalorder %v1543_v31, 15  ;;  %8418 = vst [vmem:[#allocation49_spill] sm:$0xff] %v6371_v36 }
 0x207   : > { %v5249_v40 = vpop.eup %5248  ;;  %v1365_v23 = vmul.f32 %v5247_v43, %v6181_v10  ;;  %v6339_v43 = vadd.f32 %v1094_v50, %v6147_v52  ;;  %5264 = vpow2.f32 %v4561_v42  ;;  %v6356_v10 = vadd.f32 %v1097_v6, %v6147_v52 }
 0x208   : > { %v5251_v21 = vpop.eup %5250  ;;  %2086 = vst.msk [vmem:[#allocation2 + $0x30] sm:$0xff] %vm358_vm2, %v1367_v41  ;;  %v1368_v48 = vmul.f32 %v5249_v40, %v6186_v3  ;;  %v6348_v40 = vadd.f32 %v4876_v18, %v6147_v52  ;;  %v1557_v11 = vand.u32 15, %v1415_v53  ;;  %v1564_v26 = vand.u32 15, %v1416_v33 }
 0x209   : > { %8407 = vst [vmem:[#allocation46_spill] sm:$0xff] %v6339_v43  ;;  %2084 = vst.msk [vmem:[#allocation2 + $0x20] sm:$0xff] %vm358_vm2, %v1365_v23  ;;  %v1366_v55 = vmul.f32 %v5251_v21, %v6192_v58  ;;  %v5253_v3 = vpop.eup %5252  ;;  %v4566_v58 = vmul.f32 -1.442695, %v6324_v54  ;;  %v6376_v6 = vsel %vm6330_vm14, 1.0, %v8390_v19  ;;  %v6381_v29 = vsel %vm6334_vm15, 1.0, %v8390_v19 }
 0x20a   : > { %8410 = vst [vmem:[#allocation47_spill] sm:$0xff] %v6348_v40  ;;  %2087 = vst.msk [vmem:[#allocation2 + $0x38] sm:$0xff] %vm358_vm2, %v1368_v48  ;;  %v5255_v50 = vpop.eup %5254  ;;  %v4564_v34 = vmul.f32 -1.442695, %v6339_v43  ;;  %v6387_v14 = vsel %vm6343_vm0, 1.0, %v8390_v19  ;;  %v6392_v0 = vsel %vm6351_vm3, 1.0, %v8390_v19  ;;  %5266 = vrcp.f32 %v1274_v57 }
 0x20b   : > { %8413 = vst [vmem:[#allocation48_spill] sm:$0xff] %v6356_v10  ;;  %2085 = vst.msk [vmem:[#allocation2 + $0x28] sm:$0xff] %vm358_vm2, %v1366_v55  ;;  %v4879_v7 = vpop.f32.mrb[16].mxu1  ;;  %v4567_v31 = vmul.f32 -1.442695, %v6348_v40  ;;  %v6398_v23 = vsel %vm6358_vm4, 1.0, %v8390_v19  ;;  %5268 = vpow2.f32 %v4566_v58 }
 0x20c   : > { %8419 = vst [vmem:[#allocation50_spill] sm:$0xff] %v6376_v6  ;;  %8420 = vst [vmem:[#allocation51_spill] sm:$0xff] %v6381_v29  ;;  %v1110_v18 = vpop.f32.mrb[17].mxu1  ;;  %v4565_v9 = vmul.f32 -1.442695, %v6356_v10  ;;  %v6407_v51 = vsel %vm6364_vm5, 1.0, %v8390_v19  ;;  %5270 = vpow2.f32 %v4564_v34 }
 0x20d   : > { %v5257_v42 = vpop.eup %5256  ;;  %8421 = vst [vmem:[#allocation52_spill] sm:$0xff] %v6387_v14  ;;  %8422 = vst [vmem:[#allocation53_spill] sm:$0xff] %v6392_v0  ;;  %v6400_v53 = vpop.f32.mrb[18].mxu1  ;;  %vm6412_vm6 = vcmp.ne.s32.totalorder %v1564_v26, 0  ;;  %vm6416_vm7 = vcmp.ne.s32.totalorder %v1557_v11, 15  ;;  %v1279_v0 = vadd.f32 1.0, %v5253_v3  ;;  %5272 = vpow2.f32 %v4567_v31 }
 0x20e   : > { %8423 = vst [vmem:[#allocation54_spill] sm:$0xff] %v6398_v23  ;;  %v5259_v33 = vpop.eup %5258  ;;  %v1371_v48 = vmul.f32 %v5257_v42, %v6218_v44  ;;  %8424 = vst [vmem:[#allocation55_spill] sm:$0xff] %v6407_v51  ;;  %v6409_v55 = vpop.f32.mrb[19].mxu1  ;;  %v1277_v26 = vadd.f32 1.0, %v5255_v50  ;;  %5274 = vpow2.f32 %v4565_v9  ;;  %v6437_v3 = vsel %vm6416_vm7, 1.0, %v8390_v19 }
 0x20f   : > { %v5261_v41 = vpop.eup %5260  ;;  %v1369_v38 = vmul.f32 %v5259_v33, %v6224_v13  ;;  %v6423_v13 = vadd.s32 152, %v5840_v20  ;;  %8430 = vst [vmem:[#allocation57_spill] sm:$0xff] %v6437_v3  ;;  %5276 = vrcp.f32 %v1279_v0  ;;  %v6449_v44 = vadd.f32 %v4879_v7, %v6147_v52 }
 0x210   : > { %v5263_v57 = vpop.eup %5262  ;;  %v2118_v42 = vld [vmem:[#allocation2 + $0x1f] sm:$0xff]  ;;  %2090 = vst.msk [vmem:[#allocation2 + $0x50] sm:$0xff] %vm358_vm2, %v1371_v48  ;;  %v1372_v51 = vmul.f32 %v5261_v41, %v6228_v2  ;;  %v6432_v2 = vsel %vm6412_vm6, 1.0, %v8390_v19  ;;  %5278 = vrcp.f32 %v1277_v26  ;;  %v6461_v7 = vadd.f32 %v1110_v18, %v6147_v52 }
 0x211   : > { %v2190_v23 = vld [vmem:[#allocation2 + $0x20] sm:$0xff]  ;;  %v2154_v58 = vmul.f32 %v6198_v45, %v2118_v42  ;;  %2088 = vst.msk [vmem:[#allocation2 + $0x40] sm:$0xff] %vm358_vm2, %v1369_v38  ;;  %8429 = vst [vmem:[#allocation56_spill] sm:$0xff] %v6432_v2  ;;  %v6440_v45 = vadd.s32 160, %v5840_v20  ;;  %v1280_v21 = vadd.f32 1.0, %v5263_v57  ;;  %v2121_v43 = vld [vmem:[#allocation2 + $0x37] sm:$0xff] }
 0x212   : > { %v2225_v8 = vld [vmem:[#allocation2 + $0x19] sm:$0xff]  ;;  %2091 = vst.msk [vmem:[#allocation2 + $0x58] sm:$0xff] %vm358_vm2, %v1372_v51  ;;  %v2370_v34 = vmul.f32 %v6160_v37, %v2190_v23  ;;  %v2120_v48 = vld [vmem:[#allocation2 + $0x2f] sm:$0xff]  ;;  %v2226_v9 = vld [vmem:[#allocation2 + $0x21] sm:$0xff]  ;;  %v6503_v36 = vmul.f32 -1.442695, %v6461_v7 }
 0x213   : > { %v2261_v11 = vmul.f32 %v6204_v62, %v2225_v8  ;;  %v5265_v62 = vpop.eup %5264  ;;  %v2302_v50 = vmul.f32 %v6158_v12, %v2154_v58  ;;  %v2504_v33 = vmul.f32 %v6206_v1, %v2154_v58  ;;  %v6446_v51 = vpop.f32.mrb[20].mxu1  ;;  %v2119_v41 = vld [vmem:[#allocation2 + $0x27] sm:$0xff]  ;;  %8431 = vst [vmem:[#allocation58_spill] sm:$0xff] %v6449_v44  ;;  %v2572_v58 = vmul.f32 %v6174_v49, %v2190_v23  ;;  %v2228_v54 = vld [vmem:[#allocation2 + $0x31] sm:$0xff] }
 0x214   : > { %v2227_v38 = vld [vmem:[#allocation2 + $0x29] sm:$0xff]  ;;  %v6452_v8 = vpop.f32.mrb[21].mxu1  ;;  %v2156_v10 = vmul.f32 %v6268_v59, %v2120_v48  ;;  %v2438_v0 = vmul.f32 %v6200_v30, %v2226_v9  ;;  %v1278_v57 = vadd.f32 1.0, %v5265_v62  ;;  %8433 = vst [vmem:[#allocation60_spill] sm:$0xff] %v6461_v7  ;;  %v2505_v23 = vmul.f32 %v6206_v1, %v2119_v41  ;;  %v6468_v26 = vpop.eup %5266  ;;  %8437 = vst [vmem:[#allocation64_spill] sm:$0xff] %v6503_v36 }
 0x215   : > { %v2437_v31 = vmul.f32 %v6200_v30, %v2261_v11  ;;  %v2402_v3 = vadd.f32 %v2370_v34, %v2302_v50  ;;  %v2536_v11 = vadd.f32 %v2504_v33, %v6237_v22  ;;  %v2191_v2 = vld [vmem:[#allocation2 + $0x28] sm:$0xff]  ;;  %v6456_v14 = vpop.f32.mrb[22].mxu1  ;;  %v2263_v50 = vmul.f32 %v6248_v39, %v2227_v38  ;;  %v6473_v18 = vpop.eup %5268  ;;  %v2192_v48 = vld [vmem:[#allocation2 + $0x30] sm:$0xff] }
 0x216   : > { %8432 = vst [vmem:[#allocation59_spill] sm:$0xff] %v6456_v14  ;;  %v6463_v42 = vpop.f32.mrb[23].mxu1  ;;  %v2303_v34 = vmul.f32 %v6158_v12, %v2119_v41  ;;  %v2371_v59 = vmul.f32 %v6160_v37, %v2191_v2  ;;  %v2573_v39 = vmul.f32 %v6174_v49, %v2191_v2  ;;  %5280 = vrcp.f32 %v1280_v21 }
 0x217   : > { %8434 = vst [vmem:[#allocation61_spill] sm:$0xff] %v6463_v42  ;;  %v2604_v40 = vadd.f32 %v2572_v58, %v2536_v11  ;;  %v2469_v22 = vadd.f32 %v2437_v31, %v6245_v5  ;;  %v2470_v33 = vadd.f32 %v2438_v0, %v2402_v3  ;;  %v2640_v5 = vmul.f32 %v6211_v25, %v2226_v9  ;;  %v6477_v31 = vpop.eup %5270  ;;  %v2196_v7 = vld [vmem:[#allocation2 + $0x50] sm:$0xff] }
 0x218   : > { %v2506_v38 = vmul.f32 %v6206_v1, %v2156_v10  ;;  %v2229_v41 = vld [vmem:[#allocation2 + $0x39] sm:$0xff]  ;;  %5282 = vrcp.f32 %v1278_v57  ;;  %v6481_v3 = vmul.f32 -1.442695, %v6449_v44  ;;  %v6485_v58 = vadd.f32 %v6400_v53, %v6147_v52  ;;  %v6487_v0 = vpop.eup %5272 }
 0x219   : > { %v2537_v11 = vadd.f32 %v2505_v23, %v2469_v22  ;;  %v2641_v2 = vmul.f32 %v6211_v25, %v2263_v50  ;;  %v2672_v9 = vadd.f32 %v2640_v5, %v2604_v40  ;;  %v2708_v21 = vmul.f32 %v6215_v24, %v2156_v10  ;;  %v6491_v23 = vpop.eup %5274  ;;  %v2193_v57 = vld [vmem:[#allocation2 + $0x38] sm:$0xff] }
 0x21a   : > { %8435 = vst [vmem:[#allocation62_spill] sm:$0xff] %v6481_v3  ;;  %8436 = vst [vmem:[#allocation63_spill] sm:$0xff] %v6485_v58  ;;  %v2776_v62 = vmul.f32 %v6178_v63, %v2192_v48  ;;  %v2709_v44 = vmul.f32 %v6215_v24, %v2121_v43  ;;  %v2403_v29 = vadd.f32 %v2371_v59, %v2303_v34  ;;  %v5277_v40 = vpop.eup %5276  ;;  %vm5687_vm6 = vmmov 0  }
 0x21b   : > { %v2605_v22 = vadd.f32 %v2573_v39, %v2537_v11  ;;  %v2538_v6 = vadd.f32 %v2506_v38, %v2470_v33  ;;  %v2439_v53 = vmul.f32 %v6200_v30, %v2263_v50  ;;  %v2740_v14 = vadd.f32 %v2708_v21, %v2672_v9  ;;  %v2122_v11 = vld [vmem:[#allocation2 + $0x3f] sm:$0xff]  ;;  %v5279_v34 = vpop.eup %5278 }
 0x21c   : > { %v6497_v39 = vmul.f32 %v6279_v60, %v2229_v41  ;;  %v2372_v5 = vmul.f32 %v6160_v37, %v2192_v48  ;;  %v2574_v3 = vmul.f32 %v6174_v49, %v2192_v48  ;;  %v2304_v46 = vmul.f32 %v6158_v12, %v2156_v10  ;;  %v6510_v48 = vpop.f32.mrb[24].mxu1 }
 0x21d   : > { %v2673_v42 = vadd.f32 %v2641_v2, %v2605_v22  ;;  %v2777_v59 = vmul.f32 %v6178_v63, %v2193_v57  ;;  %v2844_v50 = vmul.f32 %v6163_v16, %v2228_v54  ;;  %v2808_v38 = vadd.f32 %v2776_v62, %v2740_v14  ;;  %v6514_v20 = vpop.f32.mrb[25].mxu1 }
 0x21e   : > { %v2305_v60 = vmul.f32 %v6158_v12, %v2121_v43  ;;  %v2373_v41 = vmul.f32 %v6160_v37, %v2193_v57  ;;  %v2606_v22 = vadd.f32 %v2574_v3, %v2538_v6  ;;  %v2158_v2 = vmul.f32 %v6273_v4, %v2122_v11  ;;  %8438 = vst [vmem:[#allocation65_spill] sm:$0xff] %v6514_v20 }
 0x21f   : > { %v2741_v33 = vadd.f32 %v2709_v44, %v2673_v42  ;;  %v2471_v10 = vadd.f32 %v2439_v53, %v2403_v29  ;;  %v2876_v21 = vadd.f32 %v2844_v50, %v2808_v38  ;;  %v2845_v36 = vmul.f32 %v6163_v16, %v6497_v39 }
 0x220   : > { %v2440_v14 = vmul.f32 %v6200_v30, %v2228_v54  ;;  %v2642_v44 = vmul.f32 %v6211_v25, %v2228_v54  ;;  %v2404_v42 = vadd.f32 %v2372_v5, %v2304_v46  ;;  %v6520_v6 = vadd.f32 %v6409_v55, %v6147_v52  ;;  %v5281_v4 = vpop.eup %5280 }
 0x221   : > { %v2809_v9 = vadd.f32 %v2777_v59, %v2741_v33  ;;  %v2507_v29 = vmul.f32 %v6206_v1, %v2121_v43  ;;  %v2575_v62 = vmul.f32 %v6174_v49, %v2193_v57  ;;  %v2912_v3 = vmul.f32 %v6166_v35, %v2876_v21  ;;  %v6536_v57 = vpop.f32.mrb[26].mxu1  ;;  %v2194_v21 = vld [vmem:[#allocation2 + $0x40] sm:$0xff] }
 0x222   : > { %8439 = vst [vmem:[#allocation66_spill] sm:$0xff] %v6520_v6  ;;  %v5283_v11 = vpop.eup %5282  ;;  %v2405_v59 = vadd.f32 %v2373_v41, %v2305_v60  ;;  %v6526_v50 = vmul.f32 %v6160_v37, %v2196_v7  ;;  %v2508_v54 = vmul.f32 %v6206_v1, %v2158_v2  ;;  %v2674_v46 = vadd.f32 %v2642_v44, %v2606_v22  ;;  %v2125_v41 = vld [vmem:[#allocation2 + $0x57] sm:$0xff] }
 0x223   : > { %v2877_v53 = vadd.f32 %v2845_v36, %v2809_v9  ;;  %v2539_v5 = vadd.f32 %v2507_v29, %v2471_v10  ;;  %v6530_v55 = vadd.f32 %v6169_v56, %v2912_v3  ;;  %v6533_v33 = vmul.f32 %v6174_v49, %v2196_v7  ;;  %8440 = vst [vmem:[#allocation67_spill] sm:$0xff] %v6536_v57  ;;  %v2197_v9 = vld [vmem:[#allocation2 + $0x58] sm:$0xff] }
 0x224   : > { %v2306_v36 = vmul.f32 %v6158_v12, %v2158_v2  ;;  %v2472_v38 = vadd.f32 %v2440_v14, %v2404_v42  ;;  %v2710_v60 = vmul.f32 %v6215_v24, %v2158_v2  ;;  %v1370_v22 = vmul.f32 %v6468_v26, %v6233_v27  ;;  %v2232_v26 = vld [vmem:[#allocation2 + $0x51] sm:$0xff] }
 0x225   : > { %v2913_v43 = vmul.f32 %v6166_v35, %v2877_v53  ;;  %v4620_v10 = vmul.f32 -1.442695, %v6530_v55  ;;  %v1375_v29 = vmul.f32 %v5277_v40, %v6260_v17  ;;  %v1373_v3 = vmul.f32 %v5279_v34, %v6263_v47 }
 0x226   : > { %v2540_v53 = vadd.f32 %v2508_v54, %v2472_v38  ;;  %v2742_v57 = vadd.f32 %v2710_v60, %v2674_v46  ;;  %2089 = vst.msk [vmem:[#allocation2 + $0x48] sm:$0xff] %vm358_vm2, %v1370_v22  ;;  %v1376_v2 = vmul.f32 %v5281_v4, %v6283_v15  ;;  %v1374_v14 = vmul.f32 %v5283_v11, %v6301_v61 }
 0x227   : > { %v6544_v44 = vadd.f32 %v6169_v56, %v2913_v43  ;;  %5284 = vpow2.f32 %v4620_v10  ;;  %v2309_v42 = vmul.f32 %v6158_v12, %v2125_v41  ;;  %v2377_v43 = vmul.f32 %v6160_v37, %v2197_v9  ;;  %2094 = vst.msk [vmem:[#allocation2 + $0x70] sm:$0xff] %vm358_vm2, %v1375_v29  ;;  %2092 = vst.msk [vmem:[#allocation2 + $0x60] sm:$0xff] %vm358_vm2, %v1373_v3 }
 0x228   : > { %v6557_v47 = vmul.f32 %v6178_v63, %v2196_v7  ;;  %v2374_v17 = vmul.f32 %v6160_v37, %v2194_v21  ;;  %v2441_v15 = vmul.f32 %v6200_v30, %v6497_v39  ;;  %v2576_v61 = vmul.f32 %v6174_v49, %v2194_v21  ;;  %2095 = vst.msk [vmem:[#allocation2 + $0x78] sm:$0xff] %vm358_vm2, %v1376_v2 }
 0x229   : > { %v4621_v27 = vmul.f32 -1.442695, %v6544_v44  ;;  %2093 = vst.msk [vmem:[#allocation2 + $0x68] sm:$0xff] %vm358_vm2, %v1374_v14  ;;  %v2643_v40 = vmul.f32 %v6211_v25, %v6497_v39  ;;  %v2778_v34 = vmul.f32 %v6178_v63, %v2194_v21  ;;  %v2607_v4 = vadd.f32 %v2575_v62, %v2539_v5 }
 0x22a   : > { %v2406_v7 = vadd.f32 %v2374_v17, %v2306_v36  ;;  %v2608_v11 = vadd.f32 %v2576_v61, %v2540_v53  ;;  %v6569_v54 = vmul.f32 %v6200_v30, %v2232_v26  ;;  %v1283_v46 = vadd.f32 1.0, %v6473_v18 }
 0x22b   : > { %5286 = vpow2.f32 %v4621_v27  ;;  %v2810_v38 = vadd.f32 %v2778_v34, %v2742_v57  ;;  %v6572_v60 = vadd.f32 %v2377_v43, %v2309_v42  ;;  %v6575_v22 = vmul.f32 %v6206_v1, %v2125_v41 }
 0x22c   : > { %v6578_v10 = vmul.f32 %v6174_v49, %v2197_v9  ;;  %v6581_v39 = vmul.f32 %v6211_v25, %v2232_v26  ;;  %v6584_v62 = vmul.f32 %v6215_v24, %v2125_v41  ;;  %v6587_v5 = vmul.f32 %v6178_v63, %v2197_v9 }
 0x22d   : > { %v2473_v36 = vadd.f32 %v2441_v15, %v2405_v59  ;;  %v2848_v18 = vmul.f32 %v6163_v16, %v2232_v26  ;;  %v2123_v57 = vld [vmem:[#allocation2 + $0x47] sm:$0xff]  ;;  %v2124_v21 = vld [vmem:[#allocation2 + $0x4f] sm:$0xff]  ;;  %v2675_v3 = vadd.f32 %v2643_v40, %v2607_v4  ;;  %v1281_v53 = vadd.f32 1.0, %v6477_v31 }
 0x22e   : > { %v2195_v29 = vld [vmem:[#allocation2 + $0x48] sm:$0xff]  ;;  %v1284_v2 = vadd.f32 1.0, %v6487_v0  ;;  %v2509_v42 = vmul.f32 %v6206_v1, %v2123_v57  ;;  %5288 = vrcp.f32 %v1283_v46  ;;  %v6594_v41 = vadd.f32 1.0, %v6491_v23 }
 0x22f   : > { %v2230_v14 = vld [vmem:[#allocation2 + $0x41] sm:$0xff]  ;;  %v2231_v27 = vld [vmem:[#allocation2 + $0x49] sm:$0xff]  ;;  %v8441_v59 = vand.u32 15, %v6440_v45  ;;  %v2160_v9 = vmul.f32 %v6286_v28, %v2124_v21  ;;  %v6601_v43 = vmul.f32 -1.442695, %v6485_v58  ;;  %v8442_v31 = vand.u32 15, %v6423_v13 }
 0x230   : > { %v2644_v26 = vmul.f32 %v6211_v25, %v2230_v14  ;;  %v2267_v0 = vmul.f32 %v6309_v32, %v2231_v27  ;;  %v2541_v17 = vadd.f32 %v2509_v42, %v2473_v36  ;;  %v2577_v15 = vmul.f32 %v6174_v49, %v2195_v29 }
 0x231   : > { %vm1886_vm8 = vcmp.ne.s32.totalorder %v8441_v59, 0  ;;  %vm1993_vm9 = vcmp.ne.s32.totalorder %v8442_v31, 15  ;;  %v6608_v23 = vmul.f32 -1.442695, %v6520_v6  ;;  %v5285_v45 = vpop.eup %5284  ;;  %5290 = vrcp.f32 %v1281_v53  ;;  %v6624_v53 = vpop.f32.mrb[27].mxu1 }
 0x232   : > { %v2676_v61 = vadd.f32 %v2644_v26, %v2608_v11  ;;  %v6611_v28 = vsel %vm1886_vm8, 1.0, %v8390_v19  ;;  %v6615_v40 = vadd.f32 %v6446_v51, %v6147_v52  ;;  %v2442_v13 = vmul.f32 %v6200_v30, %v2230_v14  ;;  %8446 = vst [vmem:[#allocation71_spill] sm:$0xff] %v6624_v53 }
 0x233   : > { %8443 = vst [vmem:[#allocation68_spill] sm:$0xff] %v6611_v28  ;;  %v2609_v34 = vadd.f32 %v2577_v15, %v2541_v17  ;;  %v2711_v32 = vmul.f32 %v6215_v24, %v2123_v57  ;;  %v6620_v4 = vsel %vm1993_vm9, 1.0, %v8390_v19  ;;  %v3076_v36 = vadd.f32 1.0, %v5285_v45  ;;  %v2233_v28 = vld [vmem:[#allocation2 + $0x59] sm:$0xff] }
 0x234   : > { %8444 = vst [vmem:[#allocation69_spill] sm:$0xff] %v6615_v40  ;;  %8445 = vst [vmem:[#allocation70_spill] sm:$0xff] %v6620_v4  ;;  %v2307_v11 = vmul.f32 %v6158_v12, %v2123_v57  ;;  %v2712_v21 = vmul.f32 %v6215_v24, %v2160_v9  ;;  %5292 = vrcp.f32 %v1284_v2  ;;  %v2474_v27 = vadd.f32 %v2442_v13, %v2406_v7 }
 0x235   : > { %v5287_v46 = vpop.eup %5286  ;;  %v2645_v51 = vmul.f32 %v6211_v25, %v2267_v0  ;;  %v2743_v42 = vadd.f32 %v2711_v32, %v2675_v3  ;;  %v2779_v59 = vmul.f32 %v6178_v63, %v2195_v29  ;;  %v2375_v26 = vmul.f32 %v6160_v37, %v2195_v29 }
 0x236   : > { %v2510_v31 = vmul.f32 %v6206_v1, %v2160_v9  ;;  %v2744_v17 = vadd.f32 %v2712_v21, %v2676_v61  ;;  %v2846_v15 = vmul.f32 %v6163_v16, %v2230_v14  ;;  %v3077_v45 = vadd.f32 1.0, %v5287_v46  ;;  %v2126_v21 = vld [vmem:[#allocation2 + $0x5f] sm:$0xff] }
 0x237   : > { %v2677_v57 = vadd.f32 %v2645_v51, %v2609_v34  ;;  %v2811_v4 = vadd.f32 %v2779_v59, %v2743_v42  ;;  %v2847_v2 = vmul.f32 %v6163_v16, %v2267_v0  ;;  %5294 = vrcp.f32 %v3076_v36  ;;  %v8449_v34 = vld [vmem:[#allocation6_spill] sm:$0xff] }
 0x238   : > { %v2812_v7 = vadd.f32 %v6557_v47, %v2744_v17  ;;  %v2878_v13 = vadd.f32 %v2846_v15, %v2810_v38  ;;  %v6635_v3 = vadd.f32 %v6452_v8, %v6147_v52  ;;  %v6637_v29 = vpop.eup %5288  ;;  %v2542_v32 = vadd.f32 %v2510_v31, %v2474_v27  ;;  %v8450_v27 = vld [vmem:[#allocation49_spill] sm:$0xff] }
 0x239   : > { %v2879_v61 = vadd.f32 %v2847_v2, %v2811_v4  ;;  %v6640_v14 = vmul.f32 -1.442695, %v6615_v40  ;;  %v6643_v46 = vadd.s32 168, %v8449_v34  ;;  %v2308_v36 = vmul.f32 %v6158_v12, %v2160_v9 }
 0x23a   : > { %8447 = vst [vmem:[#allocation72_spill] sm:$0xff] %v6635_v3  ;;  %v2407_v47 = vadd.f32 %v2375_v26, %v2307_v11  ;;  %v2880_v38 = vadd.f32 %v2848_v18, %v2812_v7  ;;  %v2914_v51 = vmul.f32 %v6166_v35, %v2878_v13  ;;  %5296 = vrcp.f32 %v3077_v45  ;;  %v8451_v18 = vld [vmem:[#allocation44_spill] sm:$0xff]  ;;  %v8453_v13 = vld [vmem:[#allocation62_spill] sm:$0xff] }
 0x23b   : > { %8448 = vst [vmem:[#allocation73_spill] sm:$0xff] %v6640_v14  ;;  %v2745_v8 = vadd.f32 %v6584_v62, %v2677_v57  ;;  %v2915_v42 = vmul.f32 %v6166_v35, %v2879_v61  ;;  %v6650_v4 = vmul.f32 %v8450_v27, %v2233_v28  ;;  %v6652_v59 = vpop.eup %5290  ;;  %v2443_v31 = vmul.f32 %v6200_v30, %v2267_v0 }
 0x23c   : > { %v2916_v17 = vmul.f32 %v6166_v35, %v2880_v38  ;;  %v6657_v9 = vadd.f32 %v6169_v56, %v2914_v51  ;;  %v2162_v11 = vmul.f32 %v8451_v18, %v2126_v21  ;;  %v2610_v26 = vadd.f32 %v6533_v33, %v2542_v32  ;;  %v6683_v32 = vpop.f32.mrb[28].mxu1  ;;  %v2198_v18 = vld [vmem:[#allocation2 + $0x60] sm:$0xff] }
 0x23d   : > { %v6662_v62 = vadd.f32 %v6169_v56, %v2915_v42  ;;  %5298 = vrcp.f32 %v6594_v41  ;;  %v6666_v28 = vadd.s32 176, %v8449_v34  ;;  %v2408_v0 = vadd.f32 %v6526_v50, %v2308_v36  ;;  %8454 = vst [vmem:[#allocation44_spill] sm:$0xff] %v6683_v32  ;;  %v2200_v36 = vld [vmem:[#allocation2 + $0x70] sm:$0xff]  ;;  %v6743_v6 = vpop.f32.mrb[29].mxu1 }
 0x23e   : > { %v6668_v15 = vpop.eup %5292  ;;  %v6672_v45 = vadd.f32 %v6169_v56, %v2916_v17  ;;  %v4622_v57 = vmul.f32 -1.442695, %v6657_v9  ;;  %v6676_v2 = vmul.f32 -1.442695, %v6635_v3  ;;  %v2813_v7 = vadd.f32 %v6587_v5, %v2745_v8  ;;  %v8455_v5 = vld [vmem:[#allocation59_spill] sm:$0xff]  ;;  %8463 = vst [vmem:[#allocation77_spill] sm:$0xff] %v6743_v6 }
 0x23f   : > { %v4623_v33 = vmul.f32 -1.442695, %v6662_v62  ;;  %v2849_v41 = vmul.f32 %v6163_v16, %v6650_v4  ;;  %5300 = vpow2.f32 %v8453_v13  ;;  %v2475_v50 = vadd.f32 %v2443_v31, %v2407_v47  ;;  %v8457_v31 = vld [vmem:[#allocation61_spill] sm:$0xff] }
 0x240   : > { %8452 = vst [vmem:[#allocation49_spill] sm:$0xff] %v6676_v2  ;;  %5302 = vpow2.f32 %v4622_v57  ;;  %v4624_v61 = vmul.f32 -1.442695, %v6672_v45  ;;  %v2512_v21 = vmul.f32 %v6206_v1, %v2162_v11  ;;  %v2678_v38 = vadd.f32 %v6581_v39, %v2610_v26  ;;  %v6700_v26 = vld [vmem:[#allocation2 + $0x77] sm:$0xff]  ;;  %v2127_v2 = vld [vmem:[#allocation2 + $0x67] sm:$0xff] }
 0x241   : > { %5304 = vpow2.f32 %v4623_v33  ;;  %v2881_v51 = vadd.f32 %v2849_v41, %v2813_v7  ;;  %v6690_v8 = vadd.f32 %v8455_v5, %v6147_v52  ;;  %v5295_v42 = vpop.eup %5294  ;;  %v2476_v27 = vadd.f32 %v6569_v54, %v2408_v0  ;;  %v6702_v33 = vld [vmem:[#allocation2 + $0x78] sm:$0xff] }
 0x242   : > { %5306 = vpow2.f32 %v4624_v61  ;;  %v6696_v17 = vadd.f32 %v8457_v31, %v6147_v52  ;;  %v2714_v57 = vmul.f32 %v6215_v24, %v2162_v11  ;;  %v6707_v54 = vadd.f32 %v6510_v48, %v6147_v52 }
 0x243   : > { %8456 = vst [vmem:[#allocation62_spill] sm:$0xff] %v6690_v8  ;;  %v2917_v39 = vmul.f32 %v6166_v35, %v2881_v51  ;;  %v2543_v0 = vadd.f32 %v6575_v22, %v2475_v50  ;;  %v6711_v41 = vmul.f32 %v6160_v37, %v2200_v36  ;;  %v2310_v13 = vmul.f32 %v6158_v12, %v2162_v11 }
 0x244   : > { %8458 = vst [vmem:[#allocation59_spill] sm:$0xff] %v6696_v17  ;;  %8459 = vst [vmem:[#allocation61_spill] sm:$0xff] %v6707_v54  ;;  %v2544_v61 = vadd.f32 %v2512_v21, %v2476_v27  ;;  %v5297_v5 = vpop.eup %5296  ;;  %v6715_v51 = vmul.f32 %v5295_v42, %v6530_v55  ;;  %v2445_v31 = vmul.f32 %v6200_v30, %v6650_v4  ;;  %v6741_v54 = vld [vmem:[#allocation2 + $0x71] sm:$0xff] }
 0x245   : > { %v2746_v47 = vadd.f32 %v2714_v57, %v2678_v38  ;;  %v6720_v7 = vadd.f32 %v6169_v56, %v2917_v39  ;;  %v2378_v48 = vmul.f32 %v6160_v37, %v2198_v18  ;;  %v2580_v22 = vmul.f32 %v6174_v49, %v2198_v18  ;;  %v2128_v57 = vld [vmem:[#allocation2 + $0x6f] sm:$0xff]  ;;  %v2234_v39 = vld [vmem:[#allocation2 + $0x61] sm:$0xff] }
 0x246   : > { %8460 = vst [vmem:[#allocation74_spill] sm:$0xff] %v6715_v51  ;;  %v2313_v50 = vmul.f32 %v6158_v12, %v6700_v26  ;;  %v2381_v11 = vmul.f32 %v6160_v37, %v6702_v33  ;;  %v6731_v55 = vmul.f32 %v6174_v49, %v2200_v36  ;;  %v2784_v38 = vmul.f32 %v6178_v63, %v2200_v36 }
 0x247   : > { %8461 = vst [vmem:[#allocation75_spill] sm:$0xff] %v6720_v7  ;;  %v6728_v21 = vpop.eup %5298  ;;  %v2782_v42 = vmul.f32 %v6178_v63, %v2198_v18  ;;  %v4625_v27 = vmul.f32 -1.442695, %v6720_v7  ;;  %v6737_v3 = vmul.f32 %v5297_v5, %v6544_v44  ;;  %v2410_v40 = vadd.f32 %v2378_v48, %v2310_v13  ;;  %v2235_v44 = vld [vmem:[#allocation2 + $0x69] sm:$0xff] }
 0x248   : > { %v2612_v32 = vadd.f32 %v2580_v22, %v2544_v61  ;;  %v2647_v53 = vmul.f32 %v6211_v25, %v6650_v4  ;;  %v6749_v18 = vsel %vm358_vm2, %v6715_v51, 0.0  ;;  %v2477_v13 = vadd.f32 %v2445_v31, %v6572_v60  ;;  %v6752_v61 = vpop.f32.mrb[30].mxu1  ;;  %v8466_v48 = vld [vmem:[#allocation50_spill] sm:$0xff] }
 0x249   : > { %8462 = vst [vmem:[#allocation76_spill] sm:$0xff] %v6737_v3  ;;  %v6745_v36 = vpop.eup %5300  ;;  %v2814_v58 = vadd.f32 %v2782_v42, %v2746_v47  ;;  %5308 = vpow2.f32 %v4625_v27  ;;  %8464 = vst [vmem:[#allocation78_spill] sm:$0xff] %v6752_v61  ;;  %v6754_v4 = vadd.f32 %v2381_v11, %v2313_v50  ;;  %v2164_v22 = vmul.f32 %v8466_v48, %v2128_v57  ;;  %v2199_v31 = vld [vmem:[#allocation2 + $0x68] sm:$0xff] }
 0x24a   : > { %v5303_v5 = vpop.eup %5302  ;;  %v2611_v6 = vadd.f32 %v6578_v10, %v2543_v0  ;;  %v2648_v20 = vmul.f32 %v6211_v25, %v2234_v39  ;;  %v6761_v47 = vmul.f32 %v6200_v30, %v6741_v54  ;;  %v2852_v60 = vmul.f32 %v6163_v16, %v6741_v54  ;;  %v8467_v27 = vld [vmem:[#allocation51_spill] sm:$0xff] }
 0x24b   : > { %8465 = vst [vmem:[#allocation79_spill] sm:$0xff] %v6754_v4  ;;  %v5305_v52 = vpop.eup %5304  ;;  %v3078_v34 = vadd.f32 1.0, %v5303_v5  ;;  %v2513_v42 = vmul.f32 %v6206_v1, %v2127_v2  ;;  %v2271_v57 = vmul.f32 %v8467_v27, %v2235_v44  ;;  %v2311_v5 = vmul.f32 %v6158_v12, %v2127_v2 }
 0x24c   : > { %v5307_v50 = vpop.eup %5306  ;;  %v3079_v11 = vadd.f32 1.0, %v5305_v52  ;;  %v2679_v48 = vadd.f32 %v2647_v53, %v2611_v6  ;;  %v2680_v10 = vadd.f32 %v2648_v20, %v2612_v32  ;;  %v2379_v61 = vmul.f32 %v6160_v37, %v2199_v31  ;;  %v6775_v6 = vpop.f32.mrb[31].mxu1  ;;  %v8469_v32 = vld [vmem:[#allocation45_spill] sm:$0xff] }
 0x24d   : > { %v3080_v0 = vadd.f32 1.0, %v5307_v50  ;;  %5310 = vrcp.f32 %v3078_v34  ;;  %v2545_v51 = vadd.f32 %v2513_v42, %v2477_v13  ;;  %v2446_v4 = vmul.f32 %v6200_v30, %v2234_v39  ;;  %8468 = vst [vmem:[#allocation50_spill] sm:$0xff] %v6775_v6  ;;  %v8470_v42 = vld [vmem:[#allocation46_spill] sm:$0xff] }
 0x24e   : > { %v2715_v7 = vmul.f32 %v6215_v24, %v2127_v2  ;;  %v2716_v17 = vmul.f32 %v6215_v24, %v2164_v22  ;;  %5312 = vrcp.f32 %v3079_v11  ;;  %v2581_v52 = vmul.f32 %v6174_v49, %v2199_v31 }
 0x24f   : > { %v2783_v44 = vmul.f32 %v6178_v63, %v2199_v31  ;;  %v2850_v20 = vmul.f32 %v6163_v16, %v2234_v39  ;;  %v1379_v13 = vmul.f32 %v6637_v29, %v8469_v32  ;;  %v1377_v50 = vmul.f32 %v6652_v59, %v8470_v42  ;;  %v8471_v39 = vld [vmem:[#allocation47_spill] sm:$0xff] }
 0x250   : > { %v2747_v53 = vadd.f32 %v2715_v7, %v2679_v48  ;;  %v2748_v34 = vadd.f32 %v2716_v17, %v2680_v10  ;;  %5314 = vrcp.f32 %v3080_v0  ;;  %v2613_v2 = vadd.f32 %v2581_v52, %v2545_v51  ;;  %v8472_v7 = vld [vmem:[#allocation48_spill] sm:$0xff] }
 0x251   : > { %v2851_v11 = vmul.f32 %v6163_v16, %v2271_v57  ;;  %v2882_v27 = vadd.f32 %v2850_v20, %v2814_v58  ;;  %2098 = vst.msk [vmem:[#allocation2 + $0x90] sm:$0xff] %vm358_vm2, %v1379_v13  ;;  %2096 = vst.msk [vmem:[#allocation2 + $0x80] sm:$0xff] %vm358_vm2, %v1377_v50  ;;  %v1380_v17 = vmul.f32 %v6668_v15, %v8471_v39  ;;  %v3205_v15 = vsel %vm358_vm2, %v6737_v3, 0.0  ;;  %v8494_v3 = vld [vmem:[#allocation58_spill] sm:$0xff] }
 0x252   : > { %v2815_v37 = vadd.f32 %v2783_v44, %v2747_v53  ;;  %v2816_v14 = vadd.f32 %v2784_v38, %v2748_v34  ;;  %v1378_v29 = vmul.f32 %v6728_v21, %v8472_v7  ;;  %v2411_v48 = vadd.f32 %v2379_v61, %v2311_v5 }
 0x253   : > { %v5309_v31 = vpop.eup %5308  ;;  %v2447_v59 = vmul.f32 %v6200_v30, %v2271_v57  ;;  %v2478_v51 = vadd.f32 %v2446_v4, %v2410_v40  ;;  %v2918_v10 = vmul.f32 %v6166_v35, %v2882_v27  ;;  %v2649_v38 = vmul.f32 %v6211_v25, %v2271_v57  ;;  %2099 = vst.msk [vmem:[#allocation2 + $0x98] sm:$0xff] %vm358_vm2, %v1380_v17 }
 0x254   : > { %v3081_v58 = vadd.f32 1.0, %v5309_v31  ;;  %v2883_v0 = vadd.f32 %v2851_v11, %v2815_v37  ;;  %v2884_v52 = vadd.f32 %v2852_v60, %v2816_v14  ;;  %2097 = vst.msk [vmem:[#allocation2 + $0x88] sm:$0xff] %vm358_vm2, %v1378_v29  ;;  %v2312_v21 = vmul.f32 %v6158_v12, %v2164_v22 }
 0x255   : > { %v2514_v61 = vmul.f32 %v6206_v1, %v2164_v22  ;;  %v6798_v40 = vadd.f32 %v6169_v56, %v2918_v10  ;;  %v2681_v4 = vadd.f32 %v2649_v38, %v2613_v2  ;;  %v2515_v60 = vmul.f32 %v6206_v1, %v6700_v26 }
 0x256   : > { %5316 = vrcp.f32 %v3081_v58  ;;  %v2919_v57 = vmul.f32 %v6166_v35, %v2883_v0  ;;  %v2920_v37 = vmul.f32 %v6166_v35, %v2884_v52  ;;  %v2717_v5 = vmul.f32 %v6215_v24, %v6700_v26 }
 0x257   : > { %v5311_v14 = vpop.eup %5310  ;;  %v2546_v44 = vadd.f32 %v2514_v61, %v2478_v51  ;;  %v4626_v20 = vmul.f32 -1.442695, %v6798_v40  ;;  %v2479_v53 = vadd.f32 %v2447_v59, %v2411_v48  ;;  %v3206_v42 = vadd.f32 %v3205_v15, %v6749_v18  ;;  %v8474_v48 = vld [vmem:[#allocation64_spill] sm:$0xff] }
 0x258   : > { %v6808_v22 = vmul.f32 %v5311_v14, %v6657_v9  ;;  %v6811_v34 = vadd.f32 %v6169_v56, %v2919_v57  ;;  %v6814_v32 = vadd.f32 %v6169_v56, %v2920_v37  ;;  %v5313_v13 = vpop.eup %5312  ;;  %v2583_v50 = vmul.f32 %v6174_v49, %v6702_v33  ;;  %v2130_v39 = vld [vmem:[#allocation2 + $0x7f] sm:$0xff]  ;;  %v2204_v61 = vld [vmem:[#allocation2 + $0x90] sm:$0xff] }
 0x259   : > { %v2650_v26 = vmul.f32 %v6211_v25, %v6741_v54  ;;  %5318 = vpow2.f32 %v4626_v20  ;;  %v2412_v9 = vadd.f32 %v6711_v41, %v2312_v21  ;;  %v2749_v2 = vadd.f32 %v2717_v5, %v2681_v4  ;;  %v2237_v17 = vld [vmem:[#allocation2 + $0x79] sm:$0xff] }
 0x25a   : > { %8473 = vst [vmem:[#allocation51_spill] sm:$0xff] %v6808_v22  ;;  %v4627_v11 = vmul.f32 -1.442695, %v6811_v34  ;;  %v4628_v27 = vmul.f32 -1.442695, %v6814_v32  ;;  %v5315_v7 = vpop.eup %5314  ;;  %v3207_v18 = vsel %vm358_vm2, %v6808_v22, 0.0  ;;  %v2614_v29 = vadd.f32 %v6731_v55, %v2546_v44 }
 0x25b   : > { %v1287_v31 = vadd.f32 1.0, %v6745_v36  ;;  %5320 = vpow2.f32 %v8474_v48  ;;  %v2785_v54 = vmul.f32 %v6178_v63, %v6702_v33  ;;  %v2547_v41 = vadd.f32 %v2515_v60, %v2479_v53  ;;  %v8479_v55 = vld [vmem:[#allocation52_spill] sm:$0xff]  ;;  %v8480_v36 = vld [vmem:[#allocation53_spill] sm:$0xff]  ;;  %v8486_v44 = vld [vmem:[#allocation59_spill] sm:$0xff] }
 0x25c   : > { %5322 = vpow2.f32 %v4627_v11  ;;  %v8475_v59 = vand.u32 15, %v6666_v28  ;;  %v6838_v10 = vmul.f32 %v5313_v13, %v6662_v62  ;;  %v2166_v58 = vmul.f32 %v8479_v55, %v2130_v39  ;;  %v2202_v60 = vld [vmem:[#allocation2 + $0x80] sm:$0xff]  ;;  %v8487_v13 = vld [vmem:[#allocation75_spill] sm:$0xff] }
 0x25d   : > { %5324 = vpow2.f32 %v4628_v27  ;;  %v2273_v38 = vmul.f32 %v8480_v36, %v2237_v17  ;;  %v3208_v0 = vadd.f32 %v3207_v18, %v3206_v42  ;;  %v2817_v52 = vadd.f32 %v2785_v54, %v2749_v2  ;;  %v8490_v2 = vld [vmem:[#allocation6_spill] sm:$0xff]  ;;  %v6895_v36 = vld [vmem:[#allocation2 + $0x97] sm:$0xff] }
 0x25e   : > { %vm6833_vm10 = vcmp.ne.s32.totalorder %v8475_v59, 0  ;;  %8478 = vst [vmem:[#allocation45_spill] sm:$0xff] %v6838_v10  ;;  %5326 = vpow2.f32 %v6601_v43  ;;  %v8481_v33 = vand.u32 15, %v6643_v46  ;;  %v6846_v28 = vmul.f32 %v5315_v7, %v6672_v45 }
 0x25f   : > { %v2480_v15 = vadd.f32 %v6761_v47, %v2412_v9  ;;  %v2682_v21 = vadd.f32 %v2650_v26, %v2614_v29  ;;  %5328 = vrcp.f32 %v1287_v31  ;;  %v2853_v4 = vmul.f32 %v6163_v16, %v2273_v38  ;;  %v8489_v26 = vld [vmem:[#allocation42_spill] sm:$0xff] }
 0x260   : > { %vm1995_vm11 = vcmp.ne.s32.totalorder %v8481_v33, 15  ;;  %8482 = vst [vmem:[#allocation46_spill] sm:$0xff] %v6846_v28  ;;  %v5317_v62 = vpop.eup %5316  ;;  %v6850_v57 = vadd.f32 %v2583_v50, %v2547_v41  ;;  %5330 = vpow2.f32 %v6608_v23  ;;  %v6856_v43 = vsel %vm6833_vm10, 1.0, %v8390_v19  ;;  %v8485_v23 = vld [vmem:[#allocation73_spill] sm:$0xff] }
 0x261   : > { %8483 = vst [vmem:[#allocation47_spill] sm:$0xff] %v6856_v43  ;;  %v3209_v46 = vsel %vm358_vm2, %v6838_v10, 0.0  ;;  %v2516_v45 = vmul.f32 %v6206_v1, %v2166_v58  ;;  %v6862_v47 = vsel %vm1995_vm11, 1.0, %v8390_v19  ;;  %v6865_v37 = vmul.f32 -1.442695, %v6690_v8  ;;  %v8492_v10 = vld [vmem:[#allocation55_spill] sm:$0xff] }
 0x262   : > { %8484 = vst [vmem:[#allocation48_spill] sm:$0xff] %v6862_v47  ;;  %v3210_v14 = vadd.f32 %v3209_v46, %v3208_v0  ;;  %v2885_v5 = vadd.f32 %v2853_v4, %v2817_v52  ;;  %5332 = vpow2.f32 %v8485_v23  ;;  %v6869_v20 = vmul.f32 -1.442695, %v8486_v44  ;;  %v2132_v0 = vld [vmem:[#allocation2 + $0x8f] sm:$0xff] }
 0x263   : > { %v5319_v53 = vpop.eup %5318  ;;  %v6872_v42 = vmul.f32 %v5317_v62, %v8487_v13  ;;  %v3211_v50 = vsel %vm358_vm2, %v6846_v28, 0.0  ;;  %v6877_v9 = vmul.f32 %v8489_v26, %v2204_v61  ;;  %v6880_v11 = vadd.s32 184, %v8490_v2  ;;  %v2239_v23 = vld [vmem:[#allocation2 + $0x89] sm:$0xff] }
 0x264   : > { %v3082_v27 = vadd.f32 1.0, %v5319_v53  ;;  %v6883_v39 = vmul.f32 %v6174_v49, %v2204_v61  ;;  %v2718_v17 = vmul.f32 %v6215_v24, %v2166_v58  ;;  %v2921_v7 = vmul.f32 %v6166_v35, %v2885_v5  ;;  %v2238_v5 = vld [vmem:[#allocation2 + $0x81] sm:$0xff] }
 0x265   : > { %8488 = vst [vmem:[#allocation64_spill] sm:$0xff] %v6872_v42  ;;  %v5321_v18 = vpop.eup %5320  ;;  %v6888_v29 = vmul.f32 %v6178_v63, %v2204_v61  ;;  %v2314_v31 = vmul.f32 %v6158_v12, %v2166_v58  ;;  %v2382_v48 = vmul.f32 %v8489_v26, %v2202_v60  ;;  %v2548_v54 = vadd.f32 %v2516_v45, %v2480_v15  ;;  %v6901_v15 = vld [vmem:[#allocation2 + $0x91] sm:$0xff]  ;;  %v2203_v28 = vld [vmem:[#allocation2 + $0x88] sm:$0xff] }
 0x266   : > { %v5323_v41 = vpop.eup %5322  ;;  %5334 = vrcp.f32 %v3082_v27  ;;  %v3212_v59 = vadd.f32 %v3211_v50, %v3210_v14  ;;  %v2750_v51 = vadd.f32 %v2718_v17, %v2682_v21  ;;  %v6893_v55 = vadd.f32 %v6169_v56, %v2921_v7  ;;  %v2131_v17 = vld [vmem:[#allocation2 + $0x87] sm:$0xff] }
 0x267   : > { %v5325_v52 = vpop.eup %5324  ;;  %v3213_v33 = vsel %vm358_vm2, %v6872_v42, 0.0  ;;  %v3083_v62 = vadd.f32 1.0, %v5323_v41  ;;  %v2449_v58 = vmul.f32 %v6200_v30, %v2273_v38  ;;  %v2584_v61 = vmul.f32 %v6174_v49, %v2202_v60  ;;  %v8491_v7 = vld [vmem:[#allocation54_spill] sm:$0xff] }
 0x268   : > { %v5327_v4 = vpop.eup %5326  ;;  %v3084_v46 = vadd.f32 1.0, %v5325_v52  ;;  %v2651_v21 = vmul.f32 %v6211_v25, %v2273_v38  ;;  %v2786_v45 = vmul.f32 %v6178_v63, %v2202_v60  ;;  %v4629_v14 = vmul.f32 -1.442695, %v6893_v55 }
 0x269   : > { %v5329_v53 = vpop.eup %5328  ;;  %v2414_v13 = vadd.f32 %v2382_v48, %v2314_v31  ;;  %v2616_v50 = vadd.f32 %v2584_v61, %v2548_v54  ;;  %v6908_v27 = vmul.f32 %v6158_v12, %v6895_v36  ;;  %v2168_v41 = vmul.f32 %v8491_v7, %v2132_v0  ;;  %v8493_v48 = vld [vmem:[#allocation79_spill] sm:$0xff] }
 0x26a   : > { %v5331_v42 = vpop.eup %5330  ;;  %5336 = vrcp.f32 %v3083_v62  ;;  %v6911_v52 = vadd.f32 %v3213_v33, %v3212_v59  ;;  %v2818_v38 = vadd.f32 %v2786_v45, %v2750_v51  ;;  %v2856_v60 = vmul.f32 %v6163_v16, %v6901_v15 }
 0x26b   : > { %5338 = vpow2.f32 %v4629_v14  ;;  %v2275_v31 = vmul.f32 %v8492_v10, %v2239_v23  ;;  %v2481_v54 = vadd.f32 %v2449_v58, %v8493_v48  ;;  %v2652_v61 = vmul.f32 %v6211_v25, %v2238_v5 }
 0x26c   : > { %v6918_v22 = vpop.eup %5332  ;;  %5340 = vrcp.f32 %v3084_v46  ;;  %v2315_v0 = vmul.f32 %v6158_v12, %v2131_v17  ;;  %v2683_v59 = vadd.f32 %v2651_v21, %v6850_v57  ;;  %v2719_v51 = vmul.f32 %v6215_v24, %v2131_v17 }
 0x26d   : > { %v2383_v33 = vmul.f32 %v8489_v26, %v2203_v28  ;;  %v2517_v62 = vmul.f32 %v6206_v1, %v2131_v17  ;;  %v2684_v45 = vadd.f32 %v2652_v61, %v2616_v50  ;;  %v2720_v10 = vmul.f32 %v6215_v24, %v2168_v41 }
 0x26e   : > { %v2316_v58 = vmul.f32 %v6158_v12, %v2168_v41  ;;  %v2751_v14 = vadd.f32 %v2719_v51, %v2683_v59  ;;  %v2787_v23 = vmul.f32 %v6178_v63, %v2203_v28  ;;  %v2854_v46 = vmul.f32 %v6163_v16, %v2238_v5 }
 0x26f   : > { %v2549_v7 = vadd.f32 %v2517_v62, %v2481_v54  ;;  %v2752_v48 = vadd.f32 %v2720_v10, %v2684_v45  ;;  %v1383_v57 = vmul.f32 %v5329_v53, %v8494_v3  ;;  %v1285_v21 = vadd.f32 1.0, %v5321_v18 }
 0x270   : > { %v5335_v47 = vpop.eup %5334  ;;  %v2450_v43 = vmul.f32 %v6200_v30, %v2238_v5  ;;  %v2819_v6 = vadd.f32 %v2787_v23, %v2751_v14  ;;  %v2855_v50 = vmul.f32 %v6163_v16, %v2275_v31  ;;  %v2886_v17 = vadd.f32 %v2854_v46, %v2818_v38  ;;  %v2205_v23 = vld [vmem:[#allocation2 + $0x98] sm:$0xff] }
 0x271   : > { %v6933_v61 = vmul.f32 %v5335_v47, %v6798_v40  ;;  %v2585_v59 = vmul.f32 %v6174_v49, %v2203_v28  ;;  %v2820_v51 = vadd.f32 %v6888_v29, %v2752_v48  ;;  %2102 = vst.msk [vmem:[#allocation2 + $0xb0] sm:$0xff] %vm358_vm2, %v1383_v57  ;;  %5342 = vrcp.f32 %v1285_v21 }
 0x272   : > { %v2482_v54 = vadd.f32 %v2450_v43, %v2414_v13  ;;  %v2887_v3 = vadd.f32 %v2855_v50, %v2819_v6  ;;  %v2922_v18 = vmul.f32 %v6166_v35, %v2886_v17  ;;  %v1288_v53 = vadd.f32 1.0, %v5327_v4 }
 0x273   : > { %8495 = vst [vmem:[#allocation52_spill] sm:$0xff] %v6933_v61  ;;  %v2451_v5 = vmul.f32 %v6200_v30, %v2275_v31  ;;  %v2617_v62 = vadd.f32 %v2585_v59, %v2549_v7  ;;  %v2888_v45 = vadd.f32 %v2856_v60, %v2820_v51  ;;  %v1286_v38 = vadd.f32 1.0, %v5331_v42 }
 0x274   : > { %v5337_v10 = vpop.eup %5336  ;;  %v2415_v40 = vadd.f32 %v2383_v33, %v2315_v0  ;;  %v2518_v47 = vmul.f32 %v6206_v1, %v2168_v41  ;;  %v2923_v28 = vmul.f32 %v6166_v35, %v2887_v3  ;;  %v6943_v29 = vadd.f32 %v6169_v56, %v2922_v18 }
 0x275   : > { %v5339_v14 = vpop.eup %5338  ;;  %v3215_v6 = vsel %vm358_vm2, %v6933_v61, 0.0  ;;  %v2653_v43 = vmul.f32 %v6211_v25, %v2275_v31  ;;  %v2924_v4 = vmul.f32 %v6166_v35, %v2888_v45  ;;  %5344 = vrcp.f32 %v1288_v53 }
 0x276   : > { %v5341_v13 = vpop.eup %5340  ;;  %v3085_v42 = vadd.f32 1.0, %v5339_v14  ;;  %v2550_v60 = vadd.f32 %v2518_v47, %v2482_v54  ;;  %v6950_v0 = vadd.f32 %v6169_v56, %v2923_v28  ;;  %v4630_v41 = vmul.f32 -1.442695, %v6943_v29 }
 0x277   : > { %v6954_v33 = vmul.f32 %v5337_v10, %v6811_v34  ;;  %v2685_v46 = vadd.f32 %v2653_v43, %v2617_v62  ;;  %v6957_v7 = vadd.f32 %v6169_v56, %v2924_v4  ;;  %5346 = vrcp.f32 %v1286_v38  ;;  %v8498_v62 = vld [vmem:[#allocation60_spill] sm:$0xff] }
 0x278   : > { %v3216_v31 = vadd.f32 %v3215_v6, %v6911_v52  ;;  %5348 = vrcp.f32 %v3085_v42  ;;  %v2483_v48 = vadd.f32 %v2451_v5, %v2415_v40  ;;  %v4631_v57 = vmul.f32 -1.442695, %v6950_v0  ;;  %v2208_v40 = vld [vmem:[#allocation2 + $0xb0] sm:$0xff] }
 0x279   : > { %8496 = vst [vmem:[#allocation53_spill] sm:$0xff] %v6954_v33  ;;  %v6962_v21 = vmul.f32 %v5341_v13, %v6814_v32  ;;  %v2721_v50 = vmul.f32 %v6215_v24, %v6895_v36  ;;  %5350 = vpow2.f32 %v4630_v41  ;;  %v4632_v34 = vmul.f32 -1.442695, %v6957_v7  ;;  %v8499_v4 = vld [vmem:[#allocation40_spill] sm:$0xff]  ;;  %v8500_v13 = vld [vmem:[#allocation65_spill] sm:$0xff] }
 0x27a   : > { %v2385_v17 = vmul.f32 %v8489_v26, %v2205_v23  ;;  %v2519_v59 = vmul.f32 %v6206_v1, %v6895_v36  ;;  %v2416_v52 = vadd.f32 %v6877_v9, %v2316_v58  ;;  %5352 = vpow2.f32 %v4631_v57 }
 0x27b   : > { %8497 = vst [vmem:[#allocation73_spill] sm:$0xff] %v6962_v21  ;;  %v5343_v51 = vpop.eup %5342  ;;  %v3217_v54 = vsel %vm358_vm2, %v6954_v33, 0.0  ;;  %v2618_v32 = vadd.f32 %v6883_v39, %v2550_v60  ;;  %v2753_v3 = vadd.f32 %v2721_v50, %v2685_v46  ;;  %5354 = vpow2.f32 %v4632_v34  ;;  %v8502_v60 = vld [vmem:[#allocation63_spill] sm:$0xff] }
 0x27c   : > { %v3218_v18 = vadd.f32 %v3217_v54, %v3216_v31  ;;  %v2452_v53 = vmul.f32 %v6200_v30, %v6901_v15  ;;  %v2551_v5 = vadd.f32 %v2519_v59, %v2483_v48  ;;  %v1381_v45 = vmul.f32 %v5343_v51, %v8498_v62 }
 0x27d   : > { %v2654_v36 = vmul.f32 %v6211_v25, %v6901_v15  ;;  %v2789_v9 = vmul.f32 %v6178_v63, %v2205_v23  ;;  %v3219_v58 = vsel %vm358_vm2, %v6962_v21, 0.0  ;;  %v1422_v38 = vadd.s32 192, %v8490_v2 }
 0x27e   : > { %v6984_v39 = vadd.f32 %v2385_v17, %v6908_v27  ;;  %v2587_v10 = vmul.f32 %v6174_v49, %v2205_v23  ;;  %2100 = vst.msk [vmem:[#allocation2 + $0xa0] sm:$0xff] %vm358_vm2, %v1381_v45  ;;  %v6988_v47 = vadd.f32 %v2452_v53, %v2416_v52  ;;  %v1291_v28 = vadd.f32 1.0, %v6918_v22  ;;  %v8503_v17 = vld [vmem:[#allocation66_spill] sm:$0xff]  ;;  %v8504_v52 = vld [vmem:[#allocation67_spill] sm:$0xff] }
 0x27f   : > { %v5345_v15 = vpop.eup %5344  ;;  %v6991_v14 = vadd.f32 %v2654_v36, %v2618_v32  ;;  %v2821_v6 = vadd.f32 %v2789_v9, %v2753_v3  ;;  %v1599_v43 = vand.u32 15, %v6880_v11  ;;  %v6996_v42 = vadd.f32 %v8500_v13, %v8499_v4  ;;  %v8506_v32 = vld [vmem:[#allocation49_spill] sm:$0xff]  ;;  %v8510_v9 = vld [vmem:[#allocation71_spill] sm:$0xff] }
 0x280   : > { %v6998_v27 = vadd.f32 %v3219_v58, %v3218_v18  ;;  %v1384_v41 = vmul.f32 %v5345_v15, %v8502_v60  ;;  %v7001_v23 = vadd.f32 %v2587_v10, %v2551_v5  ;;  %v1423_v46 = vadd.s32 200, %v8490_v2  ;;  %v8509_v18 = vld [vmem:[#allocation61_spill] sm:$0xff] }
 0x281   : > { %8501 = vst [vmem:[#allocation75_spill] sm:$0xff] %v6996_v42  ;;  %v5347_v31 = vpop.eup %5346  ;;  %v7005_v22 = vmul.f32 %v8489_v26, %v2208_v40  ;;  %v7008_v48 = vmul.f32 %v6174_v49, %v2208_v40  ;;  %v1606_v11 = vand.u32 15, %v1422_v38  ;;  %v1424_v57 = vadd.s32 208, %v8490_v2 }
 0x282   : > { %v5349_v50 = vpop.eup %5348  ;;  %v7012_v34 = vmul.f32 %v6178_v63, %v2208_v40  ;;  %2103 = vst.msk [vmem:[#allocation2 + $0xb8] sm:$0xff] %vm358_vm2, %v1384_v41  ;;  %v1382_v59 = vmul.f32 %v5347_v31, %v8503_v17  ;;  %5356 = vrcp.f32 %v1291_v28  ;;  %v7018_v51 = vadd.f32 %v8504_v52, %v8499_v4  ;;  %v8516_v31 = vld [vmem:[#allocation57_spill] sm:$0xff] }
 0x283   : > { %v5351_v54 = vpop.eup %5350  ;;  %5358 = vpow2.f32 %v8506_v32  ;;  %vm7021_vm12 = vcmp.ne.s32.totalorder %v1599_v43, 15  ;;  %v4578_v53 = vmul.f32 -1.442695, %v8509_v18  ;;  %v4576_v5 = vmul.f32 -1.442695, %v6996_v42 }
 0x284   : > { %8505 = vst [vmem:[#allocation54_spill] sm:$0xff] %v7018_v51  ;;  %v5353_v62 = vpop.eup %5352  ;;  %v3086_v45 = vadd.f32 1.0, %v5351_v54  ;;  %2101 = vst.msk [vmem:[#allocation2 + $0xa8] sm:$0xff] %vm358_vm2, %v1382_v59  ;;  %5360 = vpow2.f32 %v6865_v37  ;;  %v1613_v36 = vand.u32 15, %v1423_v46  ;;  %v7031_v58 = vadd.f32 %v8510_v9, %v8499_v4  ;;  %v8515_v37 = vld [vmem:[#allocation56_spill] sm:$0xff] }
 0x285   : > { %v5355_v38 = vpop.eup %5354  ;;  %v3087_v10 = vadd.f32 1.0, %v5353_v62  ;;  %v2134_v40 = vld [vmem:[#allocation2 + $0x9f] sm:$0xff]  ;;  %5362 = vpow2.f32 %v6869_v20  ;;  %vm7034_vm13 = vcmp.ne.s32.totalorder %v1606_v11, 0  ;;  %v1620_v43 = vand.u32 15, %v1424_v57 }
 0x286   : > { %8511 = vst [vmem:[#allocation55_spill] sm:$0xff] %v7031_v58  ;;  %v2241_v28 = vld [vmem:[#allocation2 + $0x99] sm:$0xff]  ;;  %v7039_v13 = vmul.f32 %v5349_v50, %v6893_v55  ;;  %5364 = vrcp.f32 %v3086_v45  ;;  %v2170_v60 = vmul.f32 %v8515_v37, %v2134_v40  ;;  %v4579_v41 = vmul.f32 -1.442695, %v7018_v51 }
 0x287   : > { %v3088_v46 = vadd.f32 1.0, %v5355_v38  ;;  %v2277_v17 = vmul.f32 %v8516_v31, %v2241_v28  ;;  %5366 = vpow2.f32 %v4578_v53  ;;  %v7045_v59 = vadd.s32 216, %v8490_v2  ;;  %v2206_v32 = vld [vmem:[#allocation2 + $0xa0] sm:$0xff]  ;;  %v8521_v37 = vld [vmem:[#allocation44_spill] sm:$0xff] }
 0x288   : > { %8514 = vst [vmem:[#allocation79_spill] sm:$0xff] %v7039_v13  ;;  %5368 = vpow2.f32 %v4576_v5  ;;  %vm1999_vm14 = vcmp.ne.s32.totalorder %v1613_v36, 15  ;;  %v4577_v20 = vmul.f32 -1.442695, %v7031_v58  ;;  %v7049_v11 = vadd.s32 224, %v8490_v2  ;;  %v8524_v58 = vld [vmem:[#allocation68_spill] sm:$0xff] }
 0x289   : > { %5370 = vrcp.f32 %v3087_v10  ;;  %v2857_v55 = vmul.f32 %v6163_v16, %v2277_v17  ;;  %v7055_v57 = vsel %vm7021_vm12, 1.0, %v8390_v19  ;;  %vm1892_vm15 = vcmp.ne.s32.totalorder %v1620_v43, 0  ;;  %v7083_v28 = vld [vmem:[#allocation2 + $0xb7] sm:$0xff] }
 0x28a   : > { %8517 = vst [vmem:[#allocation58_spill] sm:$0xff] %v7055_v57  ;;  %v3221_v50 = vsel %vm358_vm2, %v7039_v13, 0.0  ;;  %v2520_v52 = vmul.f32 %v6206_v1, %v2170_v60  ;;  %v7063_v54 = vsel %vm7034_vm13, 1.0, %v8390_v19  ;;  %5372 = vpow2.f32 %v4579_v41 }
 0x28b   : > { %8518 = vst [vmem:[#allocation60_spill] sm:$0xff] %v7063_v54  ;;  %5374 = vrcp.f32 %v3088_v46  ;;  %v2889_v53 = vadd.f32 %v2857_v55, %v2821_v6  ;;  %v7066_v5 = vsel %vm1999_vm14, 1.0, %v8390_v19  ;;  %v2318_v45 = vmul.f32 %v6158_v12, %v2170_v60  ;;  %v2136_v15 = vld [vmem:[#allocation2 + $0xaf] sm:$0xff]  ;;  %v7095_v55 = vld [vmem:[#allocation2 + $0xb8] sm:$0xff] }
 0x28c   : > { %8519 = vst [vmem:[#allocation40_spill] sm:$0xff] %v7066_v5  ;;  %v7069_v62 = vpop.eup %5356  ;;  %v7073_v36 = vsel %vm1892_vm15, 1.0, %v8390_v19  ;;  %5376 = vpow2.f32 %v4577_v20  ;;  %v7079_v10 = vadd.f32 %v3221_v50, %v6998_v27  ;;  %v2722_v6 = vmul.f32 %v6215_v24, %v2170_v60  ;;  %v2243_v43 = vld [vmem:[#allocation2 + $0xa9] sm:$0xff] }
 0x28d   : > { %8520 = vst [vmem:[#allocation65_spill] sm:$0xff] %v7073_v36  ;;  %v7076_v38 = vpop.eup %5358  ;;  %v2925_v40 = vmul.f32 %v6166_v35, %v2889_v53  ;;  %v7087_v41 = vadd.f32 %v8521_v37, %v8499_v4  ;;  %v2386_v31 = vmul.f32 %v8489_v26, %v2206_v32  ;;  %v2453_v20 = vmul.f32 %v6200_v30, %v2277_v17  ;;  %v2135_v50 = vld [vmem:[#allocation2 + $0xa7] sm:$0xff] }
 0x28e   : > { %v7089_v46 = vpop.eup %5360  ;;  %v2552_v27 = vadd.f32 %v2520_v52, %v6988_v47  ;;  %v2588_v60 = vmul.f32 %v6174_v49, %v2206_v32  ;;  %v2207_v53 = vld [vmem:[#allocation2 + $0xa8] sm:$0xff]  ;;  %v2655_v3 = vmul.f32 %v6211_v25, %v2277_v17  ;;  %v2754_v37 = vadd.f32 %v2722_v6, %v6991_v14  ;;  %v7105_v47 = vld [vmem:[#allocation2 + $0xb1] sm:$0xff] }
 0x28f   : > { %8522 = vst [vmem:[#allocation63_spill] sm:$0xff] %v7087_v41  ;;  %v7097_v9 = vpop.eup %5362  ;;  %v2790_v13 = vmul.f32 %v6178_v63, %v2206_v32  ;;  %v7103_v21 = vadd.f32 %v6169_v56, %v2925_v40  ;;  %v2418_v61 = vadd.f32 %v2386_v31, %v2318_v45  ;;  %v7109_v52 = vmul.f32 %v6158_v12, %v7083_v28  ;;  %v2242_v36 = vld [vmem:[#allocation2 + $0xa1] sm:$0xff] }
 0x290   : > { %v5365_v33 = vpop.eup %5364  ;;  %v2172_v51 = vmul.f32 %v8524_v58, %v2136_v15  ;;  %v8525_v5 = vld [vmem:[#allocation70_spill] sm:$0xff]  ;;  %v7116_v32 = vmul.f32 %v8489_v26, %v7095_v55  ;;  %v2319_v45 = vmul.f32 %v6158_v12, %v2135_v50  ;;  %v2387_v6 = vmul.f32 %v8489_v26, %v2207_v53 }
 0x291   : > { %8523 = vst [vmem:[#allocation66_spill] sm:$0xff] %v7103_v21  ;;  %v2279_v17 = vmul.f32 %v8525_v5, %v2243_v43  ;;  %v5367_v57 = vpop.eup %5366  ;;  %v4633_v14 = vmul.f32 -1.442695, %v7103_v21  ;;  %v7121_v31 = vmul.f32 %v5365_v33, %v6943_v29  ;;  %v2620_v54 = vadd.f32 %v2588_v60, %v2552_v27 }
 0x292   : > { %v5369_v40 = vpop.eup %5368  ;;  %v7125_v58 = vmul.f32 %v6206_v1, %v7083_v28  ;;  %v2485_v5 = vadd.f32 %v2453_v20, %v6984_v39  ;;  %v2822_v43 = vadd.f32 %v2790_v13, %v2754_v37  ;;  %v2860_v21 = vmul.f32 %v6163_v16, %v7105_v47 }
 0x293   : > { %8526 = vst [vmem:[#allocation67_spill] sm:$0xff] %v7121_v31  ;;  %v5371_v15 = vpop.eup %5370  ;;  %5378 = vpow2.f32 %v4633_v14  ;;  %v2454_v42 = vmul.f32 %v6200_v30, %v2242_v36  ;;  %v2320_v29 = vmul.f32 %v6158_v12, %v2172_v51  ;;  %v2455_v33 = vmul.f32 %v6200_v30, %v2279_v17 }
 0x294   : > { %v7131_v41 = vpop.eup %5372  ;;  %v2521_v27 = vmul.f32 %v6206_v1, %v2135_v50  ;;  %v2522_v60 = vmul.f32 %v6206_v1, %v2172_v51  ;;  %v2419_v39 = vadd.f32 %v2387_v6, %v2319_v45  ;;  %v2656_v13 = vmul.f32 %v6211_v25, %v2242_v36  ;;  %v8529_v45 = vld [vmem:[#allocation69_spill] sm:$0xff] }
 0x295   : > { %v5375_v18 = vpop.eup %5374  ;;  %v2486_v20 = vadd.f32 %v2454_v42, %v2418_v61  ;;  %v2687_v37 = vadd.f32 %v2655_v3, %v7001_v23  ;;  %v7142_v26 = vmul.f32 %v5371_v15, %v6950_v0  ;;  %v3223_v12 = vsel %vm358_vm2, %v7121_v31, 0.0 }
 0x296   : > { %v7139_v14 = vpop.eup %5376  ;;  %v2553_v44 = vadd.f32 %v2521_v27, %v2485_v5  ;;  %v2723_v19 = vmul.f32 %v6215_v24, %v2135_v50  ;;  %v2589_v1 = vmul.f32 %v6174_v49, %v2207_v53  ;;  %v2688_v8 = vadd.f32 %v2656_v13, %v2620_v54 }
 0x297   : > { %8527 = vst [vmem:[#allocation49_spill] sm:$0xff] %v7142_v26  ;;  %v2724_v61 = vmul.f32 %v6215_v24, %v2172_v51  ;;  %v2858_v42 = vmul.f32 %v6163_v16, %v2242_v36  ;;  %v7151_v23 = vmul.f32 %v5375_v18, %v6957_v7  ;;  %v2791_v0 = vmul.f32 %v6178_v63, %v2207_v53 }
 0x298   : > { %v2755_v3 = vadd.f32 %v2723_v19, %v2687_v37  ;;  %v1387_v6 = vmul.f32 %v7069_v62, %v8529_v45  ;;  %v3224_v5 = vadd.f32 %v3223_v12, %v7079_v10  ;;  %v2487_v15 = vadd.f32 %v2455_v33, %v2419_v39 }
 0x299   : > { %8528 = vst [vmem:[#allocation71_spill] sm:$0xff] %v7151_v23  ;;  %v2756_v50 = vadd.f32 %v2724_v61, %v2688_v8  ;;  %v2890_v27 = vadd.f32 %v2858_v42, %v2822_v43  ;;  %v2621_v31 = vadd.f32 %v2589_v1, %v2553_v44  ;;  %v2859_v51 = vmul.f32 %v6163_v16, %v2279_v17 }
 0x29a   : > { %v2823_v54 = vadd.f32 %v2791_v0, %v2755_v3  ;;  %2106 = vst.msk [vmem:[#allocation2 + $0xd0] sm:$0xff] %vm358_vm2, %v1387_v6  ;;  %v1289_v7 = vadd.f32 1.0, %v7076_v38  ;;  %v2554_v18 = vadd.f32 %v2522_v60, %v2486_v20  ;;  %v1292_v62 = vadd.f32 1.0, %v7089_v46 }
 0x29b   : > { %v2824_v19 = vadd.f32 %v7012_v34, %v2756_v50  ;;  %v2926_v36 = vmul.f32 %v6166_v35, %v2890_v27  ;;  %v2657_v12 = vmul.f32 %v6211_v25, %v2279_v17  ;;  %v1290_v1 = vadd.f32 1.0, %v7097_v9  ;;  %v8538_v27 = vld [vmem:[#allocation78_spill] sm:$0xff]  ;;  %v8547_v17 = vld [vmem:[#allocation61_spill] sm:$0xff] }
 0x29c   : > { %v2891_v10 = vadd.f32 %v2859_v51, %v2823_v54  ;;  %5380 = vrcp.f32 %v1289_v7  ;;  %v1295_v38 = vadd.f32 1.0, %v5367_v57  ;;  %v8530_v46 = vand.u32 15, %v7045_v59 }
 0x29d   : > { %v5379_v8 = vpop.eup %5378  ;;  %v2892_v44 = vadd.f32 %v2860_v21, %v2824_v19  ;;  %v7166_v53 = vadd.f32 %v6169_v56, %v2926_v36  ;;  %5382 = vrcp.f32 %v1292_v62  ;;  %v2689_v33 = vadd.f32 %v2657_v12, %v2621_v31 }
 0x29e   : > { %v3089_v43 = vadd.f32 1.0, %v5379_v8  ;;  %v2927_v34 = vmul.f32 %v6166_v35, %v2891_v10  ;;  %5384 = vrcp.f32 %v1290_v1  ;;  %vm7171_vm0 = vcmp.ne.s32.totalorder %v8530_v46, 15  ;;  %v8541_v10 = vld [vmem:[#allocation62_spill] sm:$0xff] }
 0x29f   : > { %v2928_v9 = vmul.f32 %v6166_v35, %v2892_v44  ;;  %v4634_v21 = vmul.f32 -1.442695, %v7166_v53  ;;  %5386 = vrcp.f32 %v1295_v38  ;;  %v1293_v60 = vadd.f32 1.0, %v5369_v40 }
 0x2a0   : > { %v3225_v57 = vsel %vm358_vm2, %v7142_v26, 0.0  ;;  %v2725_v31 = vmul.f32 %v6215_v24, %v7083_v28  ;;  %v2420_v39 = vadd.f32 %v7005_v22, %v2320_v29  ;;  %v7183_v59 = vadd.f32 %v6169_v56, %v2927_v34  ;;  %v8533_v29 = vld [vmem:[#allocation77_spill] sm:$0xff] }
 0x2a1   : > { %v3226_v20 = vadd.f32 %v3225_v57, %v3224_v5  ;;  %v2555_v13 = vadd.f32 %v7125_v58, %v2487_v15  ;;  %v7187_v37 = vadd.f32 %v6169_v56, %v2928_v9  ;;  %5388 = vpow2.f32 %v4634_v21  ;;  %v3276_v21 = vld [vmem:[%s8246_s5 + $0x8] sm:$0xff] }
 0x2a2   : > { %5390 = vrcp.f32 %v3089_v43  ;;  %v2622_v40 = vadd.f32 %v7008_v48, %v2554_v18  ;;  %v2757_v61 = vadd.f32 %v2725_v31, %v2689_v33  ;;  %v3227_v42 = vsel %vm358_vm2, %v7151_v23, 0.0  ;;  %v8540_v18 = vld [vmem:[#allocation72_spill] sm:$0xff]  ;;  %v8544_v33 = vld [vmem:[#allocation59_spill] sm:$0xff] }
 0x2a3   : > { %v2456_v22 = vmul.f32 %v6200_v30, %v7105_v47  ;;  %v4635_v28 = vmul.f32 -1.442695, %v7183_v59  ;;  %5392 = vrcp.f32 %v1293_v60  ;;  %v7197_v58 = vadd.f32 %v8533_v29, %v8499_v4  ;;  %v8546_v60 = vld [vmem:[#allocation42_spill] sm:$0xff]  ;;  %v3277_v29 = vld [vmem:[%s8246_s5 + $0x10] sm:$0xff] }
 0x2a4   : > { %v2591_v3 = vmul.f32 %v6174_v49, %v7095_v55  ;;  %v2658_v48 = vmul.f32 %v6211_v25, %v7105_v47  ;;  %v2793_v0 = vmul.f32 %v6178_v63, %v7095_v55  ;;  %v4636_v45 = vmul.f32 -1.442695, %v7187_v37 }
 0x2a5   : > { %8534 = vst [vmem:[#allocation56_spill] sm:$0xff] %v7197_v58  ;;  %v7208_v6 = vadd.f32 %v7116_v32, %v7109_v52  ;;  %v7210_v5 = vadd.f32 %v3227_v42, %v3226_v20  ;;  %v8535_v15 = vand.u32 15, %v7049_v11  ;;  %v7220_v47 = vadd.f32 %v8538_v27, %v8499_v4  ;;  %v2212_v11 = vld [vmem:[#allocation2 + $0xd0] sm:$0xff] }
 0x2a6   : > { %v5381_v54 = vpop.eup %5380  ;;  %v7222_v55 = vadd.f32 %v2456_v22, %v2420_v39  ;;  %v7224_v51 = vadd.f32 %v2658_v48, %v2622_v40  ;;  %v7226_v7 = vadd.f32 %v2793_v0, %v2757_v61  ;;  %v7228_v52 = vadd.f32 %v2591_v3, %v2555_v13  ;;  %v8548_v39 = vld [vmem:[#allocation63_spill] sm:$0xff]  ;;  %v3278_v3 = vld [vmem:[%s8246_s5 + $0x18] sm:$0xff] }
 0x2a7   : > { %vm7214_vm3 = vcmp.ne.s32.totalorder %v8535_v15, 0  ;;  %8539 = vst [vmem:[#allocation57_spill] sm:$0xff] %v7220_v47  ;;  %v5383_v32 = vpop.eup %5382  ;;  %5394 = vpow2.f32 %v4635_v28  ;;  %v1385_v19 = vmul.f32 %v5381_v54, %v8540_v18  ;;  %v1296_v36 = vadd.f32 1.0, %v7131_v41 }
 0x2a8   : > { %v1427_v62 = vadd.s32 232, %v8490_v2  ;;  %v5385_v12 = vpop.eup %5384  ;;  %5396 = vpow2.f32 %v4636_v45  ;;  %v1388_v1 = vmul.f32 %v5383_v32, %v8541_v10  ;;  %v1294_v8 = vadd.f32 1.0, %v7139_v14  ;;  %v3275_v14 = vld [vmem:[%s8246_s5] sm:$0xff] }
 0x2a9   : > { %v8542_v44 = vmov 0.0   ;;  %v5387_v43 = vpop.eup %5386  ;;  %2104 = vst.msk [vmem:[#allocation2 + $0xc0] sm:$0xff] %vm358_vm2, %v1385_v19  ;;  %v1386_v34 = vmul.f32 %v5385_v12, %v8544_v33  ;;  %v1428_v46 = vadd.s32 240, %v8490_v2  ;;  %v1431_v9 = vadd.s32 264, %v8490_v2  ;;  %v8549_v32 = vld [vmem:[#allocation50_spill] sm:$0xff] }
 0x2aa   : > { %v7238_v38 = vsel %vm7214_vm3, 1.0, %v8542_v44  ;;  %v7245_v41 = vsel %vm7171_vm0, 1.0, %v8542_v44  ;;  %v7256_v57 = vmul.f32 %v8546_v60, %v2212_v11  ;;  %2107 = vst.msk [vmem:[#allocation2 + $0xd8] sm:$0xff] %vm358_vm2, %v1388_v1  ;;  %v1391_v31 = vmul.f32 %v5387_v43, %v8547_v17  ;;  %v8552_v43 = vld [vmem:[#allocation66_spill] sm:$0xff]  ;;  %4909 = vmatprep.mubr.msk.f32.mxu1 %vm5687_vm6, %v8542_v44  ;;  %4914 = vmatprep.mubr.msk.f32.mxu0 %vm5687_vm6, %v8542_v44 }
 0x2ab   : > { %8543 = vst [vmem:[#allocation44_spill] sm:$0xff] %v7238_v38  ;;  %8545 = vst [vmem:[#allocation68_spill] sm:$0xff] %v7245_v41  ;;  %v4582_v20 = vmul.f32 -1.442695, %v8548_v39  ;;  %v1432_v13 = vadd.s32 272, %v8490_v2  ;;  %v5389_v40 = vpop.eup %5388  ;;  %v7263_v61 = vmul.f32 %v6174_v49, %v2212_v11  ;;  %v7266_v42 = vmul.f32 %v6178_v63, %v2212_v11 }
 0x2ac   : > { %2105 = vst.msk [vmem:[#allocation2 + $0xc8] sm:$0xff] %vm358_vm2, %v1386_v34  ;;  %v1641_v22 = vand.u32 15, %v1427_v62  ;;  %v1429_v28 = vadd.s32 248, %v8490_v2  ;;  %v5391_v48 = vpop.eup %5390  ;;  %2110 = vst.msk [vmem:[#allocation2 + $0xf0] sm:$0xff] %vm358_vm2, %v1391_v31  ;;  %v4580_v0 = vmul.f32 -1.442695, %v7197_v58  ;;  %v5011_v15 = vpack.c.bf16 %v3276_v21, %v3275_v14 }
 0x2ad   : > { %v1430_v45 = vadd.s32 256, %v8490_v2  ;;  %v5393_v50 = vpop.eup %5392  ;;  %5398 = vrcp.f32 %v1296_v36  ;;  %v1648_v27 = vand.u32 15, %v1428_v46  ;;  %v1669_v54 = vand.u32 15, %v1431_v9  ;;  %v8551_v62 = vld [vmem:[#allocation75_spill] sm:$0xff] }
 0x2ae   : > { %v7281_v11 = vadd.f32 %v8549_v32, %v8499_v4  ;;  %v8331_v18 = vmov 0.0|0.0   ;;  %v3090_v19 = vadd.f32 1.0, %v5389_v40  ;;  %v1389_v12 = vmul.f32 %v5393_v50, %v8551_v62  ;;  %v3279_v4 = vld [vmem:[%s8246_s5 + $0x20] sm:$0xff]  ;;  %v3280_v46 = vld [vmem:[%s8246_s5 + $0x28] sm:$0xff]  ;;  %v8557_v40 = vld [vmem:[#allocation48_spill] sm:$0xff] }
 0x2af   : > { %5010 = vmatprep.subr.bf16.mxu1 %v8331_v18  ;;  %v1676_v10 = vand.u32 15, %v1432_v13  ;;  %v5014_v1 = vpack.c.bf16 %v3278_v3, %v3277_v29  ;;  %v7286_v33 = vmul.f32 %v5391_v48, %v8552_v43  ;;  %5400 = vrcp.f32 %v1294_v8  ;;  %v8556_v31 = vld [vmem:[#allocation47_spill] sm:$0xff]  ;;  %v3282_v32 = vld [vmem:[%s8246_s5 + $0x38] sm:$0xff] }
 0x2b0   : > { %8550 = vst [vmem:[#allocation70_spill] sm:$0xff] %v7281_v11  ;;  %5012 = vmatpush3.bf16.msra.mxu1 %v5011_v15  ;;  %vm7288_vm4 = vcmp.ne.s32.totalorder %v1641_v22, 15  ;;  %v1655_v34 = vand.u32 15, %v1429_v28  ;;  %v2138_v9 = vld [vmem:[#allocation2 + $0xbf] sm:$0xff]  ;;  %2108 = vst.msk [vmem:[#allocation2 + $0xe0] sm:$0xff] %vm358_vm2, %v1389_v12  ;;  %5402 = vpow2.f32 %v4582_v20  ;;  %v1662_v21 = vand.u32 15, %v1430_v45 }
 0x2b1   : > { %8553 = vst [vmem:[#allocation69_spill] sm:$0xff] %v7286_v33  ;;  %5013 = vmatprep.subr.bf16.mxu1 %v8331_v18  ;;  %v2245_v14 = vld [vmem:[#allocation2 + $0xb9] sm:$0xff]  ;;  %v4583_v8 = vmul.f32 -1.442695, %v7220_v47  ;;  %v5395_v17 = vpop.eup %5394  ;;  %v2174_v13 = vmul.f32 %v8556_v31, %v2138_v9  ;;  %5404 = vpow2.f32 %v4580_v0  ;;  %vm7303_vm5 = vcmp.ne.s32.totalorder %v1648_v27, 0  ;;  %v3281_v0 = vld [vmem:[%s8246_s5 + $0x30] sm:$0xff] }
 0x2b2   : > { %v2281_v22 = vmul.f32 %v8557_v40, %v2245_v14  ;;  %v5397_v20 = vpop.eup %5396  ;;  %5406 = vrcp.f32 %v3090_v19  ;;  %v7314_v29 = vsel %vm7288_vm4, 1.0, %v8542_v44  ;;  %vm7316_vm7 = vcmp.ne.s32.totalorder %v1676_v10, 0  ;;  %v8567_v62 = vld [vmem:[#allocation43_spill] sm:$0xff]  ;;  %v2210_v36 = vld [vmem:[#allocation2 + $0xc0] sm:$0xff] }
 0x2b3   : > { %8560 = vst [vmem:[#allocation77_spill] sm:$0xff] %v7314_v29  ;;  %v5017_v48 = vpack.c.bf16 %v3280_v46, %v3279_v4  ;;  %v3229_v45 = vsel %vm358_vm2, %v7286_v33, 0.0  ;;  %vm7325_vm8 = vcmp.ne.s32.totalorder %v1669_v54, 15  ;;  %v4581_v50 = vmul.f32 -1.442695, %v7281_v11  ;;  %v8573_v31 = vld [vmem:[#allocation41_spill] sm:$0xff] }
 0x2b4   : > { %5015 = vmatpush3.bf16.msra.mxu1 %v5014_v1  ;;  %vm7330_vm9 = vcmp.ne.s32.totalorder %v1655_v34, 15  ;;  %v3091_v19 = vadd.f32 1.0, %v5395_v17  ;;  %v2524_v12 = vmul.f32 %v8567_v62, %v2174_v13  ;;  %v2861_v54 = vmul.f32 %v6163_v16, %v2281_v22  ;;  %v2139_v3 = vld [vmem:[#allocation2 + $0xc7] sm:$0xff] }
 0x2b5   : > { %5016 = vmatprep.subr.bf16.mxu1 %v8331_v18  ;;  %vm1898_vm10 = vcmp.ne.s32.totalorder %v1662_v21, 0  ;;  %v3092_v10 = vadd.f32 1.0, %v5397_v20  ;;  %v7343_v1 = vsel %vm7303_vm5, 1.0, %v8542_v44  ;;  %5408 = vpow2.f32 %v4583_v8  ;;  %v2141_v21 = vld [vmem:[#allocation2 + $0xd7] sm:$0xff]  ;;  %v2246_v33 = vld [vmem:[#allocation2 + $0xc1] sm:$0xff] }
 0x2b6   : > { %8568 = vst [vmem:[#allocation78_spill] sm:$0xff] %v7343_v1  ;;  %v7348_v43 = vsel %vm7316_vm7, 1.0, %v8542_v44  ;;  %v2457_v34 = vmul.f32 %v6200_v30, %v2281_v22  ;;  %v2893_v4 = vadd.f32 %v2861_v54, %v7226_v7  ;;  %v7355_v46 = vsel %vm7325_vm8, 1.0, %v8542_v44  ;;  %v7374_v20 = vld [vmem:[#allocation2 + $0xd8] sm:$0xff]  ;;  %v2247_v54 = vld [vmem:[#allocation2 + $0xc9] sm:$0xff] }
 0x2b7   : > { %8569 = vst [vmem:[#allocation72_spill] sm:$0xff] %v7348_v43  ;;  %8570 = vst [vmem:[#allocation62_spill] sm:$0xff] %v7355_v46  ;;  %v5020_v9 = vpack.c.bf16 %v3282_v32, %v3281_v0  ;;  %v7357_v14 = vpop.eup %5398  ;;  %v7360_v8 = vadd.f32 %v3229_v45, %v7210_v5  ;;  %5410 = vpow2.f32 %v4581_v50  ;;  %v7363_v17 = vsel %vm1898_vm10, 1.0, %v8542_v44  ;;  %v7381_v50 = vld [vmem:[#allocation2 + $0xd1] sm:$0xff]  ;;  %v2249_v38 = vld [vmem:[#allocation2 + $0xd9] sm:$0xff] }
 0x2b8   : > { %5018 = vmatpush3.bf16.msra.mxu1 %v5017_v48  ;;  %8571 = vst [vmem:[#allocation59_spill] sm:$0xff] %v7363_v17  ;;  %v7368_v7 = vsel %vm7330_vm9, 1.0, %v8542_v44  ;;  %5412 = vrcp.f32 %v3091_v19  ;;  %v2322_v40 = vmul.f32 %v8573_v31, %v2174_v13  ;;  %v2556_v28 = vadd.f32 %v2524_v12, %v7222_v55  ;;  %v2140_v12 = vld [vmem:[#allocation2 + $0xcf] sm:$0xff] }
 0x2b9   : > { %8572 = vst [vmem:[#allocation42_spill] sm:$0xff] %v7368_v7  ;;  %5019 = vmatprep.subr.bf16.mxu1 %v8331_v18  ;;  %v2929_v5 = vmul.f32 %v6166_v35, %v2893_v4  ;;  %v7376_v48 = vpop.eup %5400  ;;  %5414 = vrcp.f32 %v3092_v10  ;;  %v2390_v0 = vmul.f32 %v8546_v60, %v2210_v36  ;;  %v2592_v45 = vmul.f32 %v6174_v49, %v2210_v36 }
 0x2ba   : > { %v2726_v15 = vmul.f32 %v6215_v24, %v2174_v13  ;;  %v7383_v27 = vpop.eup %5402  ;;  %v2794_v55 = vmul.f32 %v6178_v63, %v2210_v36  ;;  %v7390_v19 = vmul.f32 %v8573_v31, %v2141_v21  ;;  %v2489_v10 = vadd.f32 %v2457_v34, %v7208_v6 }
 0x2bb   : > { %v7387_v32 = vadd.f32 %v6169_v56, %v2929_v5  ;;  %v7393_v4 = vpop.eup %5404  ;;  %v2659_v13 = vmul.f32 %v6211_v25, %v2281_v22  ;;  %v7399_v36 = vmul.f32 %v8546_v60, %v7374_v20  ;;  %v2211_v5 = vld [vmem:[#allocation2 + $0xc8] sm:$0xff]  ;;  %v2525_v23 = vmul.f32 %v8567_v62, %v2139_v3 }
 0x2bc   : > { %5021 = vmatpush3.bf16.msra.mxu1 %v5020_v9  ;;  %v2758_v18 = vadd.f32 %v2726_v15, %v7224_v51  ;;  %v5407_v26 = vpop.eup %5406  ;;  %v2422_v7 = vadd.f32 %v2390_v0, %v2322_v40  ;;  %v2624_v17 = vadd.f32 %v2592_v45, %v2556_v28  ;;  %v7405_v34 = vmul.f32 %v6200_v30, %v7381_v50  ;;  %v8574_v51 = vld [vmem:[#allocation60_spill] sm:$0xff]  ;;  %v8575_v15 = vld [vmem:[#allocation58_spill] sm:$0xff] }
 0x2bd   : > { %v4637_v6 = vmul.f32 -1.442695, %v7387_v32  ;;  %v7408_v22 = vmul.f32 %v8567_v62, %v2141_v21  ;;  %v2176_v9 = vmul.f32 %v8574_v51, %v2140_v12  ;;  %v2283_v46 = vmul.f32 %v8575_v15, %v2247_v54 }
 0x2be   : > { %v2557_v43 = vadd.f32 %v2525_v23, %v2489_v10  ;;  %v7414_v29 = vmul.f32 %v6174_v49, %v7374_v20  ;;  %v2593_v40 = vmul.f32 %v6174_v49, %v2211_v5  ;;  %v2660_v28 = vmul.f32 %v6211_v25, %v2246_v33 }
 0x2bf   : > { %5416 = vpow2.f32 %v4637_v6  ;;  %v7418_v0 = vpop.eup %5408  ;;  %v7421_v45 = vmul.f32 %v5407_v26, %v7166_v53  ;;  %v2826_v1 = vadd.f32 %v2794_v55, %v2758_v18  ;;  %v2729_v12 = vmul.f32 %v6215_v24, %v2141_v21 }
 0x2c0   : > { %v2458_v54 = vmul.f32 %v6200_v30, %v2246_v33  ;;  %v2625_v23 = vadd.f32 %v2593_v40, %v2557_v43  ;;  %v2691_v10 = vadd.f32 %v2659_v13, %v7228_v52  ;;  %v2692_v6 = vadd.f32 %v2660_v28, %v2624_v17 }
 0x2c1   : > { %8576 = vst [vmem:[#allocation61_spill] sm:$0xff] %v7421_v45  ;;  %v2727_v51 = vmul.f32 %v6215_v24, %v2139_v3  ;;  %v7427_v15 = vpop.eup %5410  ;;  %v2323_v11 = vmul.f32 %v8573_v31, %v2139_v3  ;;  %v2661_v47 = vmul.f32 %v6211_v25, %v2283_v46  ;;  %v2728_v26 = vmul.f32 %v6215_v24, %v2176_v9 }
 0x2c2   : > { %v2862_v53 = vmul.f32 %v6163_v16, %v2246_v33  ;;  %v5413_v18 = vpop.eup %5412  ;;  %v2391_v21 = vmul.f32 %v8546_v60, %v2211_v5  ;;  %v2490_v55 = vadd.f32 %v2458_v54, %v2422_v7  ;;  %v2795_v52 = vmul.f32 %v6178_v63, %v2211_v5 }
 0x2c3   : > { %v2759_v43 = vadd.f32 %v2727_v51, %v2691_v10  ;;  %v5415_v17 = vpop.eup %5414  ;;  %v3231_v13 = vsel %vm358_vm2, %v7421_v45, 0.0  ;;  %v2693_v40 = vadd.f32 %v2661_v47, %v2625_v23  ;;  %v2760_v28 = vadd.f32 %v2728_v26, %v2692_v6 }
 0x2c4   : > { %v2894_v3 = vadd.f32 %v2862_v53, %v2826_v1  ;;  %v2864_v58 = vmul.f32 %v6163_v16, %v7381_v50  ;;  %v2526_v39 = vmul.f32 %v8567_v62, %v2176_v9  ;;  %v2863_v41 = vmul.f32 %v6163_v16, %v2283_v46 }
 0x2c5   : > { %v2827_v33 = vadd.f32 %v2795_v52, %v2759_v43  ;;  %v7442_v7 = vmul.f32 %v5413_v18, %v7183_v59  ;;  %v2459_v5 = vmul.f32 %v6200_v30, %v2283_v46  ;;  %v2828_v54 = vadd.f32 %v7266_v42, %v2760_v28  ;;  %v8578_v43 = vld [vmem:[#allocation40_spill] sm:$0xff] }
 0x2c6   : > { %v2930_v47 = vmul.f32 %v6166_v35, %v2894_v3  ;;  %v3232_v1 = vadd.f32 %v3231_v13, %v7360_v8  ;;  %v2423_v23 = vadd.f32 %v2391_v21, %v2323_v11  ;;  %v2558_v10 = vadd.f32 %v2526_v39, %v2490_v55  ;;  %v2142_v39 = vld [vmem:[#allocation2 + $0xdf] sm:$0xff] }
 0x2c7   : > { %8577 = vst [vmem:[#allocation50_spill] sm:$0xff] %v7442_v7  ;;  %v2895_v6 = vadd.f32 %v2863_v41, %v2827_v33  ;;  %v2761_v51 = vadd.f32 %v2729_v12, %v2693_v40  ;;  %v2896_v26 = vadd.f32 %v2864_v58, %v2828_v54  ;;  %v2285_v52 = vmul.f32 %v8578_v43, %v2249_v38  ;;  %v2216_v33 = vld [vmem:[#allocation2 + $0xf0] sm:$0xff]  ;;  %v8581_v54 = vld [vmem:[#allocation54_spill] sm:$0xff] }
 0x2c8   : > { %v7449_v53 = vadd.f32 %v6169_v56, %v2930_v47  ;;  %v7453_v18 = vmul.f32 %v5415_v17, %v7187_v37  ;;  %v2797_v42 = vmul.f32 %v6178_v63, %v7374_v20  ;;  %v2324_v46 = vmul.f32 %v8573_v31, %v2176_v9  ;;  %v8580_v20 = vld [vmem:[#allocation65_spill] sm:$0xff] }
 0x2c9   : > { %v5417_v59 = vpop.eup %5416  ;;  %v2931_v11 = vmul.f32 %v6166_v35, %v2895_v6  ;;  %v3233_v58 = vsel %vm358_vm2, %v7442_v7, 0.0  ;;  %v2932_v8 = vmul.f32 %v6166_v35, %v2896_v26  ;;  %v2491_v21 = vadd.f32 %v2459_v5, %v2423_v23  ;;  %v2214_v26 = vld [vmem:[#allocation2 + $0xe0] sm:$0xff] }
 0x2ca   : > { %8579 = vst [vmem:[#allocation75_spill] sm:$0xff] %v7453_v18  ;;  %v3093_v41 = vadd.f32 1.0, %v5417_v59  ;;  %v4638_v38 = vmul.f32 -1.442695, %v7449_v53  ;;  %v3234_v12 = vadd.f32 %v3233_v58, %v3232_v1  ;;  %v2626_v37 = vadd.f32 %v7263_v61, %v2558_v10  ;;  %v8582_v1 = vld [vmem:[#allocation55_spill] sm:$0xff] }
 0x2cb   : > { %v7465_v55 = vadd.f32 %v6169_v56, %v2931_v11  ;;  %v2178_v9 = vmul.f32 %v8580_v20, %v2142_v39  ;;  %v2829_v17 = vadd.f32 %v2797_v42, %v2761_v51  ;;  %v2865_v13 = vmul.f32 %v6163_v16, %v2285_v52  ;;  %v3366_v39 = vld [vmem:[%s8247_s6] sm:$0xf] }
 0x2cc   : > { %5418 = vrcp.f32 %v3093_v41  ;;  %v7470_v40 = vadd.f32 %v6169_v56, %v2932_v8  ;;  %v3235_v3 = vsel %vm358_vm2, %v7453_v18, 0.0  ;;  %v2424_v61 = vadd.f32 %v7256_v57, %v2324_v46 }
 0x2cd   : > { %5420 = vpow2.f32 %v4638_v38  ;;  %v4639_v28 = vmul.f32 -1.442695, %v7465_v55  ;;  %v2897_v5 = vadd.f32 %v2865_v13, %v2829_v17  ;;  %v1392_v47 = vmul.f32 %v7357_v14, %v8581_v54 }
 0x2ce   : > { %v1390_v23 = vmul.f32 %v7376_v48, %v8582_v1  ;;  %v7482_v10 = vadd.f32 %v7399_v36, %v7390_v19  ;;  %v2662_v6 = vmul.f32 %v6211_v25, %v7381_v50  ;;  %v2559_v51 = vadd.f32 %v7408_v22, %v2491_v21  ;;  %v2258_v1 = vld [vmem:[#allocation2 + $0x121] sm:$0xff] }
 0x2cf   : > { %5422 = vpow2.f32 %v4639_v28  ;;  %v7487_v43 = vadd.f32 %v3235_v3, %v3234_v12  ;;  %v7490_v57 = vmul.f32 %v8546_v60, %v2216_v33  ;;  %v2528_v14 = vmul.f32 %v8567_v62, %v2178_v9  ;;  %2111 = vst.msk [vmem:[#allocation2 + $0xf8] sm:$0xff] %vm358_vm2, %v1392_v47  ;;  %v2223_v47 = vld [vmem:[#allocation2 + $0x128] sm:$0xff] }
 0x2d0   : > { %v2933_v48 = vmul.f32 %v6166_v35, %v2897_v5  ;;  %2109 = vst.msk [vmem:[#allocation2 + $0xe8] sm:$0xff] %vm358_vm2, %v1390_v23  ;;  %v4640_v19 = vmul.f32 -1.442695, %v7470_v40  ;;  %v7498_v50 = vmul.f32 %v6174_v49, %v2216_v33  ;;  %v2694_v36 = vadd.f32 %v2662_v6, %v2626_v37 }
 0x2d1   : > { %v1433_v22 = vadd.s32 280, %v8490_v2  ;;  %v2394_v59 = vmul.f32 %v8546_v60, %v2214_v26  ;;  %v2492_v42 = vadd.f32 %v7405_v34, %v2424_v61  ;;  %v2596_v46 = vmul.f32 %v6174_v49, %v2214_v26 }
 0x2d2   : > { %v1299_v11 = vadd.f32 1.0, %v7383_v27  ;;  %v2730_v58 = vmul.f32 %v6215_v24, %v2178_v9  ;;  %v7510_v41 = vadd.f32 %v6169_v56, %v2933_v48  ;;  %v1297_v8 = vadd.f32 1.0, %v7393_v4  ;;  %v2259_v48 = vld [vmem:[#allocation2 + $0x129] sm:$0xff] }
 0x2d3   : > { %v1683_v38 = vand.u32 15, %v1433_v22  ;;  %v2326_v12 = vmul.f32 %v8573_v31, %v2178_v9  ;;  %v2560_v21 = vadd.f32 %v2528_v14, %v2492_v42  ;;  %v1300_v34 = vadd.f32 1.0, %v7418_v0 }
 0x2d4   : > { %8583 = vst [vmem:[#allocation66_spill] sm:$0xff] %v7510_v41  ;;  %vm3373_vm11 = vcmask 1043456   ;;  %5424 = vpow2.f32 %v4640_v19  ;;  %v2461_v27 = vmul.f32 %v6200_v30, %v2285_v52  ;;  %v2762_v37 = vadd.f32 %v2730_v58, %v2694_v36 }
 0x2d5   : > { %v1298_v20 = vadd.f32 1.0, %v7427_v15  ;;  %4913 = vmatpush3.msk.msra.mxu0 %vm3373_vm11, %v3366_v39  ;;  %v2663_v13 = vmul.f32 %v6211_v25, %v2285_v52  ;;  %v2627_v28 = vadd.f32 %v7414_v29, %v2559_v51  ;;  %5426 = vrcp.f32 %v1299_v11  ;;  %v2151_v15 = vld [vmem:[#allocation2 + $0x127] sm:$0xff] }
 0x2d6   : > { %v5419_v17 = vpop.eup %5418  ;;  %vm7519_vm12 = vcmp.ne.s32.totalorder %v1683_v38, 15  ;;  %v7524_v0 = vmul.f32 %v6178_v63, %v2216_v33  ;;  %v2798_v3 = vmul.f32 %v6178_v63, %v2214_v26  ;;  %v4641_v61 = vmul.f32 -1.442695, %v7510_v41  ;;  %v2222_v29 = vld [vmem:[#allocation2 + $0x120] sm:$0xff]  ;;  %v7531_v33 = vld [vmem:[#allocation2 + $0xf7] sm:$0xff] }
 0x2d7   : > { %v5421_v9 = vpop.eup %5420  ;;  %5428 = vrcp.f32 %v1297_v8  ;;  %v2426_v54 = vadd.f32 %v2394_v59, %v2326_v12  ;;  %v2628_v52 = vadd.f32 %v2596_v46, %v2560_v21  ;;  %v7529_v6 = vmul.f32 %v5419_v17, %v7387_v32  ;;  %v7533_v14 = vld [vmem:[#allocation2 + $0xf8] sm:$0xff]  ;;  %v2143_v36 = vld [vmem:[#allocation2 + $0xe7] sm:$0xff]  ;;  %v2144_v22 = vld [vmem:[#allocation2 + $0xef] sm:$0xff] }
 0x2d8   : > { %v3094_v5 = vadd.f32 1.0, %v5421_v9  ;;  %5430 = vrcp.f32 %v1300_v34  ;;  %v2830_v51 = vadd.f32 %v2798_v3, %v2762_v37  ;;  %v4619_v26 = vsel %vm7519_vm12, 1.0, %v8542_v44  ;;  %v7538_v19 = vld [vmem:[#allocation2 + $0xf1] sm:$0xff]  ;;  %v2251_v46 = vld [vmem:[#allocation2 + $0xe9] sm:$0xff]  ;;  %v2250_v21 = vld [vmem:[#allocation2 + $0xe1] sm:$0xff] }
 0x2d9   : > { %v5423_v23 = vpop.eup %5422  ;;  %8586 = vst [vmem:[#allocation47_spill] sm:$0xff] %v7529_v6  ;;  %5432 = vrcp.f32 %v1298_v20  ;;  %v2493_v59 = vadd.f32 %v2461_v27, %v7482_v10  ;;  %v2695_v32 = vadd.f32 %v2663_v13, %v2627_v28  ;;  %v7542_v42 = vmul.f32 %v6215_v24, %v2151_v15  ;;  %v2215_v12 = vld [vmem:[#allocation2 + $0xe8] sm:$0xff]  ;;  %v8589_v20 = vld [vmem:[#allocation44_spill] sm:$0xff] }
 0x2da   : > { %5434 = vrcp.f32 %v3094_v5  ;;  %v7545_v11 = vmul.f32 %v6178_v63, %v2222_v29  ;;  %v7548_v39 = vmul.f32 %v6178_v63, %v2223_v47  ;;  %v7551_v58 = vmul.f32 %v6163_v16, %v2258_v1  ;;  %v8590_v9 = vld [vmem:[#allocation68_spill] sm:$0xff] }
 0x2db   : > { %5436 = vpow2.f32 %v4641_v61  ;;  %v3095_v8 = vadd.f32 1.0, %v5423_v23  ;;  %v7555_v38 = vmul.f32 %v8573_v31, %v7531_v33  ;;  %v7559_v10 = vmul.f32 %v8546_v60, %v7533_v14 }
 0x2dc   : > { %8587 = vst [vmem:[#allocation48_spill] sm:$0xff] %v7548_v39  ;;  %8588 = vst [vmem:[#allocation43_spill] sm:$0xff] %v7551_v58  ;;  %v7561_v34 = vmul.f32 %v4619_v26, %v2259_v48  ;;  %v3237_v27 = vsel %vm358_vm2, %v7529_v6, 0.0  ;;  %v7567_v37 = vmul.f32 %v6200_v30, %v7538_v19  ;;  %v2180_v17 = vmul.f32 %v8589_v20, %v2144_v22 }
 0x2dd   : > { %v2529_v13 = vmul.f32 %v8567_v62, %v2143_v36  ;;  %v7573_v28 = vmul.f32 %v8567_v62, %v7531_v33  ;;  %v7577_v4 = vmul.f32 %v6174_v49, %v7533_v14  ;;  %v2287_v3 = vmul.f32 %v8590_v9, %v2251_v46 }
 0x2de   : > { %v2327_v61 = vmul.f32 %v8573_v31, %v2143_v36  ;;  %v5425_v15 = vpop.eup %5424  ;;  %v2395_v5 = vmul.f32 %v8546_v60, %v2215_v12  ;;  %v2462_v29 = vmul.f32 %v6200_v30, %v2250_v21  ;;  %v2597_v1 = vmul.f32 %v6174_v49, %v2215_v12 }
 0x2df   : > { %v2561_v47 = vadd.f32 %v2529_v13, %v2493_v59  ;;  %v5427_v23 = vpop.eup %5426  ;;  %5438 = vrcp.f32 %v3095_v8  ;;  %v7585_v26 = vadd.f32 %v3237_v27, %v7487_v43  ;;  %v2664_v48 = vmul.f32 %v6211_v25, %v2250_v21 }
 0x2e0   : > { %v2731_v22 = vmul.f32 %v6215_v24, %v2143_v36  ;;  %v2328_v20 = vmul.f32 %v8573_v31, %v2180_v17  ;;  %v2494_v9 = vadd.f32 %v2462_v29, %v2426_v54  ;;  %v2732_v2 = vmul.f32 %v6215_v24, %v2180_v17 }
 0x2e1   : > { %v5429_v46 = vpop.eup %5428  ;;  %v2629_v44 = vadd.f32 %v2597_v1, %v2561_v47  ;;  %v2696_v59 = vadd.f32 %v2664_v48, %v2628_v52  ;;  %v2799_v18 = vmul.f32 %v6178_v63, %v2215_v12  ;;  %v2866_v8 = vmul.f32 %v6163_v16, %v2250_v21  ;;  %v8591_v21 = vld [vmem:[#allocation63_spill] sm:$0xff] }
 0x2e2   : > { %v5431_v6 = vpop.eup %5430  ;;  %v2763_v13 = vadd.f32 %v2731_v22, %v2695_v32  ;;  %v2427_v27 = vadd.f32 %v2395_v5, %v2327_v61  ;;  %v2463_v7 = vmul.f32 %v6200_v30, %v2287_v3  ;;  %v2530_v36 = vmul.f32 %v8567_v62, %v2180_v17  ;;  %v8592_v61 = vld [vmem:[#allocation56_spill] sm:$0xff] }
 0x2e3   : > { %v5433_v43 = vpop.eup %5432  ;;  %v2665_v45 = vmul.f32 %v6211_v25, %v2287_v3  ;;  %v2764_v54 = vadd.f32 %v2732_v2, %v2696_v59  ;;  %v2867_v47 = vmul.f32 %v6163_v16, %v2287_v3  ;;  %v2898_v1 = vadd.f32 %v2866_v8, %v2830_v51 }
 0x2e4   : > { %v5435_v41 = vpop.eup %5434  ;;  %v2831_v29 = vadd.f32 %v2799_v18, %v2763_v13  ;;  %v2868_v32 = vmul.f32 %v6163_v16, %v7538_v19  ;;  %v2562_v12 = vadd.f32 %v2530_v36, %v2494_v9  ;;  %v1395_v48 = vmul.f32 %v5427_v23, %v8591_v21  ;;  %v8595_v9 = vld [vmem:[#allocation70_spill] sm:$0xff] }
 0x2e5   : > { %v5437_v52 = vpop.eup %5436  ;;  %v1393_v5 = vmul.f32 %v5429_v46, %v8592_v61  ;;  %v2697_v22 = vadd.f32 %v2665_v45, %v2629_v44  ;;  %v2832_v17 = vadd.f32 %v7524_v0, %v2764_v54  ;;  %v2934_v39 = vmul.f32 %v6166_v35, %v2898_v1 }
 0x2e6   : > { %v2899_v58 = vadd.f32 %v2867_v47, %v2831_v29  ;;  %v3096_v2 = vadd.f32 1.0, %v5425_v15  ;;  %v7604_v18 = vmul.f32 %v5435_v41, %v7449_v53  ;;  %v2733_v51 = vmul.f32 %v6215_v24, %v7531_v33  ;;  %2114 = vst.msk [vmem:[#allocation2 + $0x110] sm:$0xff] %vm358_vm2, %v1395_v48  ;;  %v8594_v41 = vld [vmem:[#allocation57_spill] sm:$0xff] }
 0x2e7   : > { %v2495_v3 = vadd.f32 %v2463_v7, %v2427_v27  ;;  %2112 = vst.msk [vmem:[#allocation2 + $0x100] sm:$0xff] %vm358_vm2, %v1393_v5  ;;  %v2428_v23 = vadd.f32 %v7490_v57, %v2328_v20  ;;  %v2900_v44 = vadd.f32 %v2868_v32, %v2832_v17  ;;  %v7613_v0 = vadd.f32 %v6169_v56, %v2934_v39  ;;  %v8596_v32 = vld [vmem:[#allocation78_spill] sm:$0xff] }
 0x2e8   : > { %8593 = vst [vmem:[#allocation41_spill] sm:$0xff] %v7604_v18  ;;  %v2935_v45 = vmul.f32 %v6166_v35, %v2899_v58  ;;  %v3097_v15 = vadd.f32 1.0, %v5437_v52  ;;  %v2630_v53 = vadd.f32 %v7498_v50, %v2562_v12  ;;  %v1396_v46 = vmul.f32 %v5431_v6, %v8594_v41  ;;  %v8598_v41 = vld [vmem:[#allocation72_spill] sm:$0xff] }
 0x2e9   : > { %v1394_v33 = vmul.f32 %v5433_v43, %v8595_v9  ;;  %v5439_v7 = vpop.eup %5438  ;;  %v2765_v59 = vadd.f32 %v2733_v51, %v2697_v22  ;;  %v4642_v13 = vmul.f32 -1.442695, %v7613_v0  ;;  %v2936_v8 = vmul.f32 %v6166_v35, %v2900_v44 }
 0x2ea   : > { %v7621_v57 = vadd.f32 %v6169_v56, %v2935_v45  ;;  %5440 = vrcp.f32 %v3096_v2  ;;  %v3239_v39 = vsel %vm358_vm2, %v7604_v18, 0.0  ;;  %v2666_v50 = vmul.f32 %v6211_v25, %v7538_v19  ;;  %2115 = vst.msk [vmem:[#allocation2 + $0x118] sm:$0xff] %vm358_vm2, %v1396_v46 }
 0x2eb   : > { %v2563_v6 = vadd.f32 %v7573_v28, %v2495_v3  ;;  %2113 = vst.msk [vmem:[#allocation2 + $0x108] sm:$0xff] %vm358_vm2, %v1394_v33  ;;  %v2801_v58 = vmul.f32 %v6178_v63, %v7533_v14  ;;  %5442 = vpow2.f32 %v4642_v13  ;;  %v7633_v20 = vadd.f32 %v6169_v56, %v2936_v8  ;;  %v8599_v13 = vld [vmem:[#allocation62_spill] sm:$0xff] }
 0x2ec   : > { %v4643_v43 = vmul.f32 -1.442695, %v7621_v57  ;;  %v7637_v27 = vmul.f32 %v5439_v7, %v7465_v55  ;;  %5444 = vrcp.f32 %v3097_v15  ;;  %v2429_v19 = vadd.f32 %v7559_v10, %v7555_v38 }
 0x2ed   : > { %v2496_v28 = vadd.f32 %v7567_v37, %v2428_v23  ;;  %v7643_v36 = vadd.f32 %v3239_v39, %v7585_v26  ;;  %v2220_v54 = vld [vmem:[#allocation2 + $0x110] sm:$0xff]  ;;  %v2698_v47 = vadd.f32 %v2666_v50, %v2630_v53  ;;  %v2833_v1 = vadd.f32 %v2801_v58, %v2765_v59  ;;  %v8597_v26 = vld [vmem:[#allocation77_spill] sm:$0xff] }
 0x2ee   : > { %v2146_v14 = vld [vmem:[#allocation2 + $0xff] sm:$0xff]  ;;  %v4644_v52 = vmul.f32 -1.442695, %v7633_v20  ;;  %v2631_v21 = vadd.f32 %v7577_v4, %v2563_v6  ;;  %v7650_v38 = vmul.f32 %v6163_v16, %v7561_v34  ;;  %5446 = vpow2.f32 %v4643_v43 }
 0x2ef   : > { %v2218_v29 = vld [vmem:[#allocation2 + $0x100] sm:$0xff]  ;;  %v2182_v12 = vmul.f32 %v8596_v32, %v2146_v14  ;;  %v7653_v10 = vmul.f32 %v6174_v49, %v2220_v54  ;;  %v7656_v37 = vmul.f32 %v6178_v63, %v2220_v54  ;;  %vm3369_vm13 = vcmask 31744  }
 0x2f0   : > { %v2253_v55 = vld [vmem:[#allocation2 + $0xf9] sm:$0xff]  ;;  %v2398_v61 = vmul.f32 %v8546_v60, %v2218_v29  ;;  %v2600_v4 = vmul.f32 %v6174_v49, %v2218_v29  ;;  %v2802_v2 = vmul.f32 %v6178_v63, %v2218_v29  ;;  %5448 = vpow2.f32 %v4644_v52 }
 0x2f1   : > { %v2289_v48 = vmul.f32 %v8597_v26, %v2253_v55  ;;  %v2330_v5 = vmul.f32 %v8573_v31, %v2182_v12  ;;  %v2532_v22 = vmul.f32 %v8567_v62, %v2182_v12  ;;  %v2734_v34 = vmul.f32 %v6215_v24, %v2182_v12  ;;  %v2149_v3 = vld [vmem:[#allocation2 + $0x117] sm:$0xff]  ;;  %v2150_v23 = vld [vmem:[#allocation2 + $0x11f] sm:$0xff] }
 0x2f2   : > { %v2221_v44 = vld [vmem:[#allocation2 + $0x118] sm:$0xff]  ;;  %v2186_v46 = vmul.f32 %v8598_v41, %v2150_v23  ;;  %v2535_v39 = vmul.f32 %v8567_v62, %v2149_v3  ;;  %v2147_v50 = vld [vmem:[#allocation2 + $0x107] sm:$0xff]  ;;  %v2148_v6 = vld [vmem:[#allocation2 + $0x10f] sm:$0xff]  ;;  %v2737_v12 = vmul.f32 %v6215_v24, %v2149_v3 }
 0x2f3   : > { %v2465_v17 = vmul.f32 %v6200_v30, %v2289_v48  ;;  %v2869_v51 = vmul.f32 %v6163_v16, %v2289_v48  ;;  %v2564_v45 = vadd.f32 %v2532_v22, %v2496_v28  ;;  %v2667_v15 = vmul.f32 %v6211_v25, %v2289_v48  ;;  %v2256_v9 = vld [vmem:[#allocation2 + $0x111] sm:$0xff]  ;;  %v2257_v33 = vld [vmem:[#allocation2 + $0x119] sm:$0xff]  ;;  %v2219_v29 = vld [vmem:[#allocation2 + $0x108] sm:$0xff] }
 0x2f4   : > { %v2766_v53 = vadd.f32 %v2734_v34, %v2698_v47  ;;  %v2430_v7 = vadd.f32 %v2398_v61, %v2330_v5  ;;  %v2293_v8 = vmul.f32 %v8599_v13, %v2257_v33  ;;  %v7671_v58 = vpop.eup %5440  ;;  %v2603_v28 = vmul.f32 %v6174_v49, %v2221_v44  ;;  %v2254_v47 = vld [vmem:[#allocation2 + $0x101] sm:$0xff]  ;;  %v2255_v52 = vld [vmem:[#allocation2 + $0x109] sm:$0xff] }
 0x2f5   : > { %v2901_v59 = vadd.f32 %v2869_v51, %v2833_v1  ;;  %v2632_v43 = vadd.f32 %v2600_v4, %v2564_v45  ;;  %v2670_v14 = vmul.f32 %v6211_v25, %v2256_v9  ;;  %v5443_v32 = vpop.eup %5442  ;;  %v2738_v55 = vmul.f32 %v6215_v24, %v2186_v46  ;;  %v8600_v5 = vld [vmem:[#allocation59_spill] sm:$0xff]  ;;  %v8601_v4 = vld [vmem:[#allocation42_spill] sm:$0xff] }
 0x2f6   : > { %v2834_v54 = vadd.f32 %v2802_v2, %v2766_v53  ;;  %v2671_v1 = vmul.f32 %v6211_v25, %v2293_v8  ;;  %v2805_v26 = vmul.f32 %v6178_v63, %v2221_v44  ;;  %v7679_v48 = vpop.eup %5444  ;;  %v2872_v61 = vmul.f32 %v6163_v16, %v2256_v9 }
 0x2f7   : > { %v2184_v22 = vmul.f32 %v8600_v5, %v2148_v6  ;;  %v2291_v34 = vmul.f32 %v8601_v4, %v2255_v52  ;;  %v2331_v2 = vmul.f32 %v8573_v31, %v2147_v50  ;;  %v2399_v51 = vmul.f32 %v8546_v60, %v2219_v29 }
 0x2f8   : > { %v2466_v23 = vmul.f32 %v6200_v30, %v2254_v47  ;;  %v2497_v45 = vadd.f32 %v2465_v17, %v2429_v19  ;;  %v2533_v3 = vmul.f32 %v8567_v62, %v2147_v50  ;;  %v5447_v53 = vpop.eup %5446  ;;  %v3098_v41 = vadd.f32 1.0, %v5443_v32 }
 0x2f9   : > { %v2467_v44 = vmul.f32 %v6200_v30, %v2291_v34  ;;  %v2534_v46 = vmul.f32 %v8567_v62, %v2184_v22  ;;  %v2601_v9 = vmul.f32 %v6174_v49, %v2219_v29  ;;  %v2431_v33 = vadd.f32 %v2399_v51, %v2331_v2 }
 0x2fa   : > { %v2498_v13 = vadd.f32 %v2466_v23, %v2430_v7  ;;  %v2565_v6 = vadd.f32 %v2533_v3, %v2497_v45  ;;  %v2668_v31 = vmul.f32 %v6211_v25, %v2254_v47  ;;  %v2669_v60 = vmul.f32 %v6211_v25, %v2291_v34  ;;  %v5449_v5 = vpop.eup %5448 }
 0x2fb   : > { %v2699_v52 = vadd.f32 %v2667_v15, %v2631_v21  ;;  %v2735_v19 = vmul.f32 %v6215_v24, %v2147_v50  ;;  %v2736_v17 = vmul.f32 %v6215_v24, %v2184_v22  ;;  %v2499_v32 = vadd.f32 %v2467_v44, %v2431_v33 }
 0x2fc   : > { %v2566_v4 = vadd.f32 %v2534_v46, %v2498_v13  ;;  %v2633_v30 = vadd.f32 %v2601_v9, %v2565_v6  ;;  %v2700_v18 = vadd.f32 %v2668_v31, %v2632_v43  ;;  %5450 = vrcp.f32 %v3098_v41 }
 0x2fd   : > { %v2767_v62 = vadd.f32 %v2735_v19, %v2699_v52  ;;  %v2803_v49 = vmul.f32 %v6178_v63, %v2219_v29  ;;  %v2870_v7 = vmul.f32 %v6163_v16, %v2254_v47  ;;  %v2567_v23 = vadd.f32 %v2535_v39, %v2499_v32 }
 0x2fe   : > { %v2701_v2 = vadd.f32 %v2669_v60, %v2633_v30  ;;  %v2768_v51 = vadd.f32 %v2736_v17, %v2700_v18  ;;  %v2634_v25 = vadd.f32 %v7653_v10, %v2566_v4  ;;  %v2871_v15 = vmul.f32 %v6163_v16, %v2291_v34  ;;  %v8604_v17 = vld [vmem:[#allocation66_spill] sm:$0xff] }
 0x2ff   : > { %v2835_v21 = vadd.f32 %v2803_v49, %v2767_v62  ;;  %v2902_v24 = vadd.f32 %v2870_v7, %v2834_v54  ;;  %v2937_v50 = vmul.f32 %v6166_v35, %v2901_v59  ;;  %v2635_v22 = vadd.f32 %v2603_v28, %v2567_v23 }
 0x300   : > { %v2702_v45 = vadd.f32 %v2670_v14, %v2634_v25  ;;  %v2769_v43 = vadd.f32 %v2737_v12, %v2701_v2  ;;  %v2836_v3 = vadd.f32 %v7656_v37, %v2768_v51  ;;  %v2873_v63 = vmul.f32 %v6163_v16, %v2293_v8 }
 0x301   : > { %v2903_v29 = vadd.f32 %v2871_v15, %v2835_v21  ;;  %v2938_v47 = vmul.f32 %v6166_v35, %v2902_v24  ;;  %v7704_v18 = vadd.f32 %v6169_v56, %v2937_v50  ;;  %v2703_v10 = vadd.f32 %v2671_v1, %v2635_v22 }
 0x302   : > { %v2770_v39 = vadd.f32 %v2738_v55, %v2702_v45  ;;  %v2837_v41 = vadd.f32 %v2805_v26, %v2769_v43  ;;  %v2904_v34 = vadd.f32 %v2872_v61, %v2836_v3  ;;  %v7713_v16 = vmul.f32 %v7671_v58, %v7470_v40  ;;  %v8602_v61 = vld [vmem:[#allocation48_spill] sm:$0xff]  ;;  %v8603_v40 = vld [vmem:[#allocation43_spill] sm:$0xff] }
 0x303   : > { %v2939_v54 = vmul.f32 %v6166_v35, %v2903_v29  ;;  %v7708_v59 = vadd.f32 %v6169_v56, %v2938_v47  ;;  %v4645_v28 = vmul.f32 -1.442695, %v7704_v18  ;;  %v2771_v37 = vadd.f32 %v7542_v42, %v2703_v10 }
 0x304   : > { %v2838_v8 = vadd.f32 %v7545_v11, %v2770_v39  ;;  %v2905_v14 = vadd.f32 %v2873_v63, %v2837_v41  ;;  %v2940_v1 = vmul.f32 %v6166_v35, %v2904_v34  ;;  %v3241_v26 = vsel %vm358_vm2, %v7637_v27, 0.0 }
 0x305   : > { %v7719_v12 = vadd.f32 %v6169_v56, %v2939_v54  ;;  %5452 = vpow2.f32 %v4645_v28  ;;  %v4646_v55 = vmul.f32 -1.442695, %v7708_v59  ;;  %v2839_v44 = vadd.f32 %v8602_v61, %v2771_v37 }
 0x306   : > { %v2906_v58 = vadd.f32 %v8603_v40, %v2838_v8  ;;  %v2941_v42 = vmul.f32 %v6166_v35, %v2905_v14  ;;  %v7728_v11 = vadd.f32 %v6169_v56, %v2940_v1  ;;  %v5451_v46 = vpop.eup %5450  ;;  %v3099_v33 = vadd.f32 1.0, %v5447_v53 }
 0x307   : > { %5454 = vpow2.f32 %v4646_v55  ;;  %v4647_v9 = vmul.f32 -1.442695, %v7719_v12  ;;  %v3242_v13 = vadd.f32 %v3241_v26, %v7643_v36  ;;  %v2907_v6 = vadd.f32 %v7650_v38, %v2839_v44 }
 0x308   : > { %v2942_v31 = vmul.f32 %v6166_v35, %v2906_v58  ;;  %v7735_v60 = vadd.f32 %v6169_v56, %v2941_v42  ;;  %v4648_v52 = vmul.f32 -1.442695, %v7728_v11  ;;  %v3100_v19 = vadd.f32 1.0, %v5449_v5 }
 0x309   : > { %5456 = vpow2.f32 %v4647_v9  ;;  %v7740_v32 = vmul.f32 %v7679_v48, %v8604_v17  ;;  %v3243_v53 = vsel %vm358_vm2, %v7713_v16, 0.0  ;;  %v2943_v36 = vmul.f32 %v6166_v35, %v2907_v6 }
 0x30a   : > { %v7746_v38 = vadd.f32 %v6169_v56, %v2942_v31  ;;  %5458 = vpow2.f32 %v4648_v52  ;;  %v4649_v4 = vmul.f32 -1.442695, %v7735_v60  ;;  %v3244_v48 = vadd.f32 %v3243_v53, %v3242_v13 }
 0x30b   : > { %5460 = vrcp.f32 %v3099_v33  ;;  %v7750_v30 = vadd.f32 %v6169_v56, %v2943_v36  ;;  %v7755_v35 = vmul.f32 %v5451_v46, %v7613_v0  ;;  %v3245_v49 = vsel %vm358_vm2, %v7740_v32, 0.0 }
 0x30c   : > { %5462 = vpow2.f32 %v4649_v4  ;;  %v4650_v5 = vmul.f32 -1.442695, %v7746_v38  ;;  %v3246_v56 = vadd.f32 %v3245_v49, %v3244_v48 }
 0x30d   : > { %5464 = vrcp.f32 %v3100_v19  ;;  %v4651_v62 = vmul.f32 -1.442695, %v7750_v30  ;;  %v3247_v25 = vsel %vm358_vm2, %v7755_v35, 0.0 }
 0x30e   : > { %5466 = vpow2.f32 %v4650_v5  ;;  %v3248_v22 = vadd.f32 %v3247_v25, %v3246_v56 }
 0x30f   : > { %v5453_v7 = vpop.eup %5452  ;;  %5468 = vpow2.f32 %v4651_v62 }
 0x310   : > { %v3101_v2 = vadd.f32 1.0, %v5453_v7 }
 0x311   : > { %v5455_v51 = vpop.eup %5454 }
 0x312   : > { %v3102_v23 = vadd.f32 1.0, %v5455_v51  ;;  %5470 = vrcp.f32 %v3101_v2 }
 0x313   : > { %v5457_v21 = vpop.eup %5456 }
 0x314   : > { %v5459_v15 = vpop.eup %5458  ;;  %v3103_v24 = vadd.f32 1.0, %v5457_v21  ;;  %5472 = vrcp.f32 %v3102_v23 }
 0x315   : > { %v5461_v50 = vpop.eup %5460  ;;  %v3104_v0 = vadd.f32 1.0, %v5459_v15 }
 0x316   : > { %v5463_v45 = vpop.eup %5462  ;;  %5474 = vrcp.f32 %v3103_v24  ;;  %v7762_v43 = vmul.f32 %v5461_v50, %v7621_v57 }
 0x317   : > { %v5465_v3 = vpop.eup %5464  ;;  %v3105_v63 = vadd.f32 1.0, %v5463_v45  ;;  %5476 = vrcp.f32 %v3104_v0  ;;  %v5095_v0 = vld [vmem:[%s8248_s7] sm:$0xff]   ;;  %v5097_v45 = vld [vmem:[%s8248_s7 + $0x10] sm:$0xff]  }
 0x318   : > { %v5467_v29 = vpop.eup %5466  ;;  %v7765_v47 = vmul.f32 %v5465_v3, %v7633_v20  ;;  %v3249_v10 = vsel %vm358_vm2, %v7762_v43, 0.0  ;;  %4917 = vmatprep.subr.bf16.mxu1 %v5095_v0  ;;  %v5098_v3 = vld [vmem:[%s8248_s7 + $0x18] sm:$0xff]  }
 0x319   : > { %v3106_v39 = vadd.f32 1.0, %v5467_v29  ;;  %5478 = vrcp.f32 %v3105_v63  ;;  %v3250_v41 = vadd.f32 %v3249_v10, %v3248_v22  ;;  %v5469_v34 = vpop.eup %5468  ;;  %v5096_v22 = vld [vmem:[%s8248_s7 + $0x8] sm:$0xff]  }
 0x31a   : > { %v3251_v54 = vsel %vm358_vm2, %v7765_v47, 0.0  ;;  %v3107_v28 = vadd.f32 1.0, %v5469_v34 }
 0x31b   : > { %5480 = vrcp.f32 %v3106_v39  ;;  %v3252_v37 = vadd.f32 %v3251_v54, %v3250_v41 }
 0x31c   : > { %v5471_v57 = vpop.eup %5470  ;;  %5482 = vrcp.f32 %v3107_v28 }
 0x31d   : > { %v7772_v8 = vmul.f32 %v5471_v57, %v7704_v18  ;;  %v8605_v57 = vld [vmem:[#allocation7_spill] sm:$0xff] }
 0x31e   : > { %v5473_v20 = vpop.eup %5472 }
 0x31f   : > { %v7775_v14 = vmul.f32 %v5473_v20, %v7708_v59  ;;  %v3253_v1 = vsel %vm358_vm2, %v7772_v8, 0.0  ;;  %v8606_v20 = vld [vmem:[#allocation74_spill] sm:$0xff] }
 0x320   : > { %v5475_v55 = vpop.eup %5474  ;;  %v3254_v26 = vadd.f32 %v3253_v1, %v3252_v37 }
 0x321   : > { %v5477_v61 = vpop.eup %5476  ;;  %v7780_v44 = vmul.f32 %v5475_v55, %v7719_v12  ;;  %v3255_v40 = vsel %vm358_vm2, %v7775_v14, 0.0  ;;  %v8607_v55 = vld [vmem:[#allocation76_spill] sm:$0xff] }
 0x322   : > { %v7785_v58 = vmul.f32 %v5477_v61, %v7728_v11  ;;  %v3256_v18 = vadd.f32 %v3255_v40, %v3254_v26  ;;  %v8608_v61 = vld [vmem:[#allocation51_spill] sm:$0xff] }
 0x323   : > { %v5479_v42 = vpop.eup %5478  ;;  %v3257_v59 = vsel %vm358_vm2, %v7780_v44, 0.0 }
 0x324   : > { %v7790_v46 = vmul.f32 %v5479_v42, %v7735_v60  ;;  %v3258_v9 = vadd.f32 %v3257_v59, %v3256_v18  ;;  %v3259_v33 = vsel %vm358_vm2, %v7785_v58, 0.0  ;;  %v8609_v18 = vld [vmem:[#allocation45_spill] sm:$0xff]  ;;  %v8610_v59 = vld [vmem:[#allocation46_spill] sm:$0xff] }
 0x325   : > { %v5481_v12 = vpop.eup %5480 }
 0x326   : > { %v7795_v13 = vmul.f32 %v5481_v12, %v7746_v38  ;;  %v3260_v6 = vadd.f32 %v3259_v33, %v3258_v9  ;;  %v3261_v11 = vsel %vm358_vm2, %v7790_v46, 0.0  ;;  %v5483_v31 = vpop.eup %5482  ;;  %v8611_v33 = vld [vmem:[#allocation64_spill] sm:$0xff] }
 0x327   : > { %v7800_v52 = vmul.f32 %v5483_v31, %v7750_v30  ;;  %v7810_v30 = vld [vmem:[%s8242_s1] sm:$0xff] }
 0x328   : > { %v3262_v19 = vadd.f32 %v3261_v11, %v3260_v6  ;;  %v3263_v60 = vsel %vm358_vm2, %v7795_v13, 0.0  ;;  %v3284_v2 = vrot.slane %v7810_v30, 4  ;;  %v3367_v63 = vrot.slane %v7810_v30, 5 }
 0x329   : > { %v3265_v53 = vsel %vm358_vm2, %v7800_v52, 0.0 }
 0x32a   : > { %v3264_v17 = vadd.f32 %v3263_v60, %v3262_v19  ;;  %v8612_v19 = vld [vmem:[#allocation52_spill] sm:$0xff] }
 0x32c   : > { %v3266_v36 = vadd.f32 %v3265_v53, %v3264_v17  ;;  %v8613_v17 = vld [vmem:[#allocation53_spill] sm:$0xff] }
 0x32e   : > { %v3267_v4 = vrot.slane %v3266_v36, 4 }
 0x330   : > { %v3268_v38 = vadd.f32 %v3267_v4, %v3266_v36  ;;  %v8614_v36 = vld [vmem:[#allocation73_spill] sm:$0xff] }
 0x332   : > { %v3269_v5 = vrot.slane %v3268_v38, 2 }
 0x334   : > { %v3270_v48 = vadd.f32 %v3269_v5, %v3268_v38  ;;  %v8615_v38 = vld [vmem:[#allocation79_spill] sm:$0xff] }
 0x336   : > { %v3271_v62 = vrot.slane %v3270_v48, 1 }
 0x338   : > { %v3272_v49 = vadd.f32 %v3271_v62, %v3270_v48 }
 0x33a   : > { %v3274_v7 = vmul.f32 0.00390625, %v3272_v49  ;;  %v8616_v49 = vld [vmem:[#allocation67_spill] sm:$0xff] }
 0x33c   : > { %4910 = vmatmul.mubr.msk.f32.vlgmr.msra.gmra.mrb[32].mxu1 %vm358_vm2, %v3274_v7 }
 0x33d   : > { %4918 = vmatpush3.bf16.msra.mxu1 %v5095_v0 }
 0x33e   : > { %4919 = vmatprep.subr.bf16.mxu1 %v5096_v22 }
 0x341   : > { %4920 = vmatpush3.bf16.msra.mxu1 %v5096_v22  ;;  %v8621_v22 = vld [vmem:[#allocation50_spill] sm:$0xff] }
 0x342   : > { %4921 = vmatprep.subr.bf16.mxu1 %v5097_v45 }
 0x345   : > { %4922 = vmatpush3.bf16.msra.mxu1 %v5097_v45 }
 0x346   : > { %4923 = vmatprep.subr.bf16.mxu1 %v5098_v3 }
 0x349   : > { %4924 = vmatpush3.bf16.msra.mxu1 %v5098_v3  ;;  %v8622_v3 = vld [vmem:[#allocation75_spill] sm:$0xff] }
 0x40f   : > { %v3355_v51 = vpop.f32.mrb[32].mxu1 }
 0x410   : > { %v3356_v56 = vadd.f32 %v3355_v51, %v3284_v2  ;;  %v4911_v23 = vpop.f32.mrb[33].mxu1  ;;  %v8617_v2 = vld [vmem:[#allocation49_spill] sm:$0xff] }
 0x412   : > { %v4653_v25 = vmul.f32 -1.442695, %v3356_v56 }
 0x414   : > { %5484 = vpow2.f32 %v4653_v25  ;;  %v8619_v25 = vld [vmem:[#allocation69_spill] sm:$0xff] }
 0x41e   : > { %v5485_v21 = vpop.eup %5484 }
 0x41f   : > { %v3362_v15 = vadd.f32 1.0, %v5485_v21 }
 0x421   : > { %5486 = vrcp.f32 %v3362_v15 }
 0x42b   : > { %v5487_v24 = vpop.eup %5486 }
 0x42c   : > { %v3365_v50 = vmul.f32 %v5487_v24, %v3356_v56  ;;  %v8618_v56 = vld [vmem:[#allocation71_spill] sm:$0xff] }
 0x42e   : > { %4915 = vmatmul.mubr.msk.f32.vlgmr.msra.gmra.mrb[32].mxu0 %vm3369_vm13, %v3365_v50  ;;  %v8620_v50 = vld [vmem:[#allocation61_spill] sm:$0xff] }
 0x501   : > { %v3443_v29 = vpop.f32.mrb[32].mxu0 }
 0x502   : > { %v3444_v10 = vadd.f32 %v3443_v29, %v3367_v63  ;;  %v4916_v39 = vpop.f32.mrb[33].mxu0  ;;  %v8623_v29 = vld [vmem:[#allocation47_spill] sm:$0xff] }
 0x504   : > { %v4656_v41 = vmul.f32 -1.442695, %v3444_v10 }
 0x506   : > { %5488 = vpow2.f32 %v4656_v41 }
 0x510   : > { %v5489_v34 = vpop.eup %5488 }
 0x511   : > { %v3450_v54 = vadd.f32 1.0, %v5489_v34  ;;  %v8624_v34 = vld [vmem:[#allocation41_spill] sm:$0xff] }
 0x513   : > { %5490 = vrcp.f32 %v3450_v54 }
 0x51d   : > { %v5491_v28 = vpop.eup %5490 }
 0x51e   : > { %v3456_v37 = vrot.slane %v5491_v28, %v8605_v57 }
 0x520   : > { %v3457_v1 = vmul.f32 %v3456_v37, %v8606_v20  ;;  %v3458_v26 = vmul.f32 %v3456_v37, %v8607_v55  ;;  %v3459_v40 = vmul.f32 %v3456_v37, %v8608_v61  ;;  %v3460_v42 = vmul.f32 %v3456_v37, %v8609_v18 }
 0x521   : > { %v3461_v9 = vmul.f32 %v3456_v37, %v8610_v59  ;;  %v3462_v12 = vmul.f32 %v3456_v37, %v8611_v33  ;;  %v3463_v60 = vmul.f32 %v3456_v37, %v8612_v19  ;;  %v3464_v53 = vmul.f32 %v3456_v37, %v8613_v17  ;;  %v8628_v17 = vld [vmem:[#allocation9_spill] sm:$0xff] }
 0x522   : > { %v3489_v6 = vpack.c.bf16 %v3458_v26, %v3457_v1  ;;  %v3490_v11 = vpack.c.bf16 %v3460_v42, %v3459_v40  ;;  %v3465_v4 = vmul.f32 %v3456_v37, %v8614_v36  ;;  %v3466_v5 = vmul.f32 %v3456_v37, %v8615_v38  ;;  %v8629_v36 = vld [vmem:[#allocation8_spill] sm:$0xff]  ;;  %v8630_v38 = vld [vmem:[#allocation10_spill] sm:$0xff] }
 0x523   : > { %v3491_v31 = vpack.c.bf16 %v3462_v12, %v3461_v9  ;;  %v3492_v48 = vpack.c.bf16 %v3464_v53, %v3463_v60  ;;  %v3467_v7 = vmul.f32 %v3456_v37, %v8616_v49  ;;  %v3468_v51 = vmul.f32 %v3456_v37, %v8617_v2 }
 0x524   : > { %4925 = vmatprep.mubr.msk.bf16.mxu1 %vm358_vm2, %v3489_v6  ;;  %v3493_v62 = vpack.c.bf16 %v3466_v5, %v3465_v4  ;;  %v3469_v23 = vmul.f32 %v3456_v37, %v8618_v56  ;;  %v3470_v21 = vmul.f32 %v3456_v37, %v8619_v25  ;;  %v3471_v0 = vmul.f32 %v3456_v37, %v8620_v50  ;;  %v8632_v50 = vld [vmem:[#allocation12_spill] sm:$0xff] }
 0x525   : > { %4926 = vmatmul.mubr.msk.bf16.vlgmr.msra.gmra.mrb[36].mxu1 %vm358_vm2, %v3490_v11  ;;  %v3494_v15 = vpack.c.bf16 %v3468_v51, %v3467_v7  ;;  %v3472_v45 = vmul.f32 %v3456_v37, %v8621_v22  ;;  %v3473_v63 = vmul.f32 %v3456_v37, %v8622_v3  ;;  %v3474_v10 = vmul.f32 %v3456_v37, %v8623_v29  ;;  %v8633_v22 = vld [vmem:[#allocation13_spill] sm:$0xff]  ;;  %v8634_v3 = vld [vmem:[#allocation14_spill] sm:$0xff]  ;;  %v8635_v29 = vld [vmem:[#allocation15_spill] sm:$0xff] }
 0x526   : > { %4929 = vmatprep.mubr.msk.bf16.mxu1 %vm358_vm2, %v3491_v31  ;;  %v3495_v24 = vpack.c.bf16 %v3470_v21, %v3469_v23  ;;  %v3475_v54 = vmul.f32 %v3456_v37, %v8624_v34  ;;  %v3476_v28 = vmul.f32 %v3456_v37, %v7637_v27  ;;  %v3477_v57 = vmul.f32 %v3456_v37, %v7713_v16 }
 0x527   : > { %v3496_v39 = vpack.c.bf16 %v3472_v45, %v3471_v0  ;;  %v3497_v41 = vpack.c.bf16 %v3474_v10, %v3473_v63  ;;  %v3478_v20 = vmul.f32 %v3456_v37, %v7740_v32  ;;  %v3479_v26 = vmul.f32 %v3456_v37, %v7755_v35 }
 0x528   : > { %v3498_v1 = vpack.c.bf16 %v3476_v28, %v3475_v54  ;;  %v3480_v61 = vmul.f32 %v3456_v37, %v7762_v43  ;;  %v3481_v40 = vmul.f32 %v3456_v37, %v7765_v47  ;;  %v3482_v18 = vmul.f32 %v3456_v37, %v7772_v8 }
 0x529   : > { %v3499_v55 = vpack.c.bf16 %v3478_v20, %v3477_v57  ;;  %v3483_v16 = vmul.f32 %v3456_v37, %v7775_v14  ;;  %v3484_v32 = vmul.f32 %v3456_v37, %v7780_v44  ;;  %v3485_v59 = vmul.f32 %v3456_v37, %v7785_v58  ;;  %v5099_v14 = vld [vmem:[%s8249_s8] sm:$0xff]  }
 0x52a   : > { %v3500_v42 = vpack.c.bf16 %v3480_v61, %v3479_v26  ;;  %v3501_v27 = vpack.c.bf16 %v3482_v18, %v3481_v40  ;;  %v3486_v35 = vmul.f32 %v3456_v37, %v7790_v46  ;;  %v3487_v47 = vmul.f32 %v3456_v37, %v7795_v13  ;;  %4957 = vmatprep.subr.bf16.mxu0 %v5099_v14  ;;  %v8626_v58 = vld [vmem:[#allocation6_spill] sm:$0xff]  ;;  %v8636_v61 = vld [vmem:[#allocation16_spill] sm:$0xff]  ;;  %v8637_v18 = vld [vmem:[#allocation17_spill] sm:$0xff] }
 0x52b   : > { %v3502_v9 = vpack.c.bf16 %v3484_v32, %v3483_v16  ;;  %v3488_v8 = vmul.f32 %v3456_v37, %v7800_v52  ;;  %4958 = vmatpush3.bf16.msra.mxu0 %v5099_v14  ;;  %v8625_v44 = vmov 0.0|0.0   ;;  %v8627_v46 = vsub.s32 6, %v8626_v58  ;;  %v8639_v32 = vld [vmem:[#allocation19_spill] sm:$0xff] }
 0x52c   : > { %v3503_v43 = vpack.c.bf16 %v3486_v35, %v3485_v59  ;;  %5022 = vmatprep.subr.bf16.mxu0 %v8625_v44 }
 0x52d   : > { %4930 = vmatmul.mubr.msk.bf16.gmra.mrb[40].mxu1 %vm358_vm2, %v3492_v48  ;;  %v3504_v33 = vpack.c.bf16 %v3488_v8, %v3487_v47  ;;  %v7882_v12 = vrot.slane %v7810_v30, %v8627_v46  ;;  %v8631_v48 = vld [vmem:[#allocation11_spill] sm:$0xff] }
 0x52e   : > { %4933 = vmatprep.mubr.msk.bf16.mxu1 %vm358_vm2, %v3493_v62 }
 0x535   : > { %4934 = vmatmul.mubr.msk.bf16.gmra.mrb[44].mxu1 %vm358_vm2, %v3494_v15 }
 0x536   : > { %4937 = vmatprep.mubr.msk.bf16.mxu1 %vm358_vm2, %v3495_v24 }
 0x53d   : > { %4938 = vmatmul.mubr.msk.bf16.gmra.mrb[48].mxu1 %vm358_vm2, %v3496_v39 }
 0x53e   : > { %4941 = vmatprep.mubr.msk.bf16.mxu1 %vm358_vm2, %v3497_v41 }
 0x545   : > { %4942 = vmatmul.mubr.msk.bf16.gmra.mrb[52].mxu1 %vm358_vm2, %v3498_v1 }
 0x546   : > { %4945 = vmatprep.mubr.msk.bf16.mxu1 %vm358_vm2, %v3499_v55 }
 0x54d   : > { %4946 = vmatmul.mubr.msk.bf16.gmra.mrb[56].mxu1 %vm358_vm2, %v3500_v42 }
 0x54e   : > { %4949 = vmatprep.mubr.msk.bf16.mxu1 %vm358_vm2, %v3501_v27  ;;  %v8638_v27 = vld [vmem:[#allocation18_spill] sm:$0xff] }
 0x555   : > { %4950 = vmatmul.mubr.msk.bf16.gmra.mrb[60].mxu1 %vm358_vm2, %v3502_v9 }
 0x556   : > { %4953 = vmatprep.mubr.msk.bf16.mxu1 %vm358_vm2, %v3503_v43 }
 0x55d   : > { %4954 = vmatmul.mubr.msk.bf16.gmra.mrb[64].mxu1 %vm358_vm2, %v3504_v33 }
 0x5f8   : > { %v4927_v6 = vpop.f32.mrb[36].mxu1 }
 0x5f9   : > { %v3632_v13 = vadd.f32 %v4927_v6, %v7882_v12  ;;  %v3623_v52 = vpop.f32.mrb[37].mxu1 }
 0x5fa   : > { %v3624_v37 = vadd.f32 %v3623_v52, %v7882_v12  ;;  %v4928_v11 = vpop.f32.mrb[38].mxu1  ;;  %v8640_v52 = vld [vmem:[#allocation20_spill] sm:$0xff] }
 0x5fb   : > { %v3635_v31 = vadd.f32 %v4928_v11, %v7882_v12  ;;  %v3626_v19 = vpop.f32.mrb[39].mxu1  ;;  %v3752_v53 = vadd.f32 %v3632_v13, %v8628_v17  ;;  %v8641_v11 = vld [vmem:[#allocation21_spill] sm:$0xff]  ;;  %v8643_v17 = vld [vmem:[#allocation23_spill] sm:$0xff] }
 0x5fc   : > { %v3627_v60 = vadd.f32 %v3626_v19, %v7882_v12  ;;  %v3750_v5 = vadd.f32 %v3624_v37, %v8630_v38  ;;  %v8642_v19 = vld [vmem:[#allocation22_spill] sm:$0xff] }
 0x5fd   : > { %v3753_v4 = vadd.f32 %v3635_v31, %v8629_v36 }
 0x5fe   : > { %v3751_v62 = vadd.f32 %v3627_v60, %v8631_v48 }
 0x5ff   : > { %v3783_v49 = vpack.c.bf16 %v3753_v4, %v3752_v53 }
 0x600   : > { %v3782_v7 = vpack.c.bf16 %v3751_v62, %v3750_v5  ;;  %v4931_v2 = vpop.f32.mrb[40].mxu1 }
 0x601   : > { %v3648_v51 = vadd.f32 %v4931_v2, %v7882_v12  ;;  %v3639_v56 = vpop.f32.mrb[41].mxu1 }
 0x602   : > { %v3640_v23 = vadd.f32 %v3639_v56, %v7882_v12  ;;  %v4932_v25 = vpop.f32.mrb[42].mxu1  ;;  %4959 = vmatprep.mubr.msk.bf16.mxu0 %vm963_vm1, %v3782_v7  ;;  %v8644_v56 = vld [vmem:[#allocation27_spill] sm:$0xff] }
 0x603   : > { %v3651_v21 = vadd.f32 %v4932_v25, %v7882_v12  ;;  %v3642_v15 = vpop.f32.mrb[43].mxu1  ;;  %4960 = vmatmul.mubr.msk.bf16.vlgmr.msra.gmra.mrb[36].mxu0 %vm963_vm1, %v3783_v49  ;;  %v3756_v0 = vadd.f32 %v3648_v51, %v8632_v50  ;;  %v8645_v25 = vld [vmem:[#allocation24_spill] sm:$0xff]  ;;  %v8647_v50 = vld [vmem:[#allocation26_spill] sm:$0xff] }
 0x604   : > { %v3643_v24 = vadd.f32 %v3642_v15, %v7882_v12  ;;  %v3754_v63 = vadd.f32 %v3640_v23, %v8634_v3  ;;  %v8646_v15 = vld [vmem:[#allocation25_spill] sm:$0xff] }
 0x605   : > { %v3757_v45 = vadd.f32 %v3651_v21, %v8633_v22 }
 0x606   : > { %v3755_v10 = vadd.f32 %v3643_v24, %v8635_v29 }
 0x607   : > { %v3785_v39 = vpack.c.bf16 %v3757_v45, %v3756_v0 }
 0x608   : > { %v3784_v41 = vpack.c.bf16 %v3755_v10, %v3754_v63  ;;  %v4935_v34 = vpop.f32.mrb[44].mxu1 }
 0x609   : > { %v3664_v54 = vadd.f32 %v4935_v34, %v7882_v12  ;;  %v3655_v28 = vpop.f32.mrb[45].mxu1 }
 0x60a   : > { %v3656_v57 = vadd.f32 %v3655_v28, %v7882_v12  ;;  %v4936_v20 = vpop.f32.mrb[46].mxu1  ;;  %4963 = vmatprep.mubr.msk.bf16.mxu0 %vm963_vm1, %v3784_v41  ;;  %v8648_v28 = vld [vmem:[#allocation31_spill] sm:$0xff] }
 0x60b   : > { %v3667_v1 = vadd.f32 %v4936_v20, %v7882_v12  ;;  %v3658_v55 = vpop.f32.mrb[47].mxu1  ;;  %4964 = vmatmul.mubr.msk.bf16.gmra.mrb[40].mxu0 %vm963_vm1, %v3785_v39  ;;  %v3760_v40 = vadd.f32 %v3664_v54, %v8636_v61  ;;  %v8649_v20 = vld [vmem:[#allocation28_spill] sm:$0xff]  ;;  %v8651_v61 = vld [vmem:[#allocation30_spill] sm:$0xff] }
 0x60c   : > { %v3659_v26 = vadd.f32 %v3658_v55, %v7882_v12  ;;  %v3758_v16 = vadd.f32 %v3656_v57, %v8638_v27  ;;  %v8650_v55 = vld [vmem:[#allocation29_spill] sm:$0xff] }
 0x60d   : > { %v3761_v42 = vadd.f32 %v3667_v1, %v8637_v18 }
 0x60e   : > { %v3759_v59 = vadd.f32 %v3659_v26, %v8639_v32 }
 0x60f   : > { %v3787_v35 = vpack.c.bf16 %v3761_v42, %v3760_v40 }
 0x610   : > { %v3786_v9 = vpack.c.bf16 %v3759_v59, %v3758_v16  ;;  %v4939_v43 = vpop.f32.mrb[48].mxu1 }
 0x611   : > { %v3680_v47 = vadd.f32 %v4939_v43, %v7882_v12  ;;  %v3671_v8 = vpop.f32.mrb[49].mxu1 }
 0x612   : > { %v3672_v33 = vadd.f32 %v3671_v8, %v7882_v12  ;;  %v4940_v14 = vpop.f32.mrb[50].mxu1  ;;  %4967 = vmatprep.mubr.msk.bf16.mxu0 %vm963_vm1, %v3786_v9  ;;  %v8652_v8 = vld [vmem:[#allocation35_spill] sm:$0xff] }
 0x613   : > { %v3683_v46 = vadd.f32 %v4940_v14, %v7882_v12  ;;  %v3674_v6 = vpop.f32.mrb[51].mxu1  ;;  %4968 = vmatmul.mubr.msk.bf16.gmra.mrb[44].mxu0 %vm963_vm1, %v3787_v35  ;;  %v3764_v37 = vadd.f32 %v3680_v47, %v8640_v52  ;;  %v8653_v14 = vld [vmem:[#allocation32_spill] sm:$0xff]  ;;  %v8655_v52 = vld [vmem:[#allocation34_spill] sm:$0xff] }
 0x614   : > { %v3675_v13 = vadd.f32 %v3674_v6, %v7882_v12  ;;  %v3762_v60 = vadd.f32 %v3672_v33, %v8642_v19  ;;  %v8654_v6 = vld [vmem:[#allocation33_spill] sm:$0xff] }
 0x615   : > { %v3765_v31 = vadd.f32 %v3683_v46, %v8641_v11 }
 0x616   : > { %v3763_v53 = vadd.f32 %v3675_v13, %v8643_v17 }
 0x617   : > { %v3789_v36 = vpack.c.bf16 %v3765_v31, %v3764_v37 }
 0x618   : > { %v3788_v4 = vpack.c.bf16 %v3763_v53, %v3762_v60  ;;  %v4943_v38 = vpop.f32.mrb[52].mxu1 }
 0x619   : > { %v3696_v5 = vadd.f32 %v4943_v38, %v7882_v12  ;;  %v3687_v48 = vpop.f32.mrb[53].mxu1 }
 0x61a   : > { %v3688_v62 = vadd.f32 %v3687_v48, %v7882_v12  ;;  %v4944_v49 = vpop.f32.mrb[54].mxu1  ;;  %4971 = vmatprep.mubr.msk.bf16.mxu0 %vm963_vm1, %v3788_v4  ;;  %v8656_v48 = vld [vmem:[#allocation39_spill] sm:$0xff] }
 0x61b   : > { %v3699_v7 = vadd.f32 %v4944_v49, %v7882_v12  ;;  %v3690_v2 = vpop.f32.mrb[55].mxu1  ;;  %4972 = vmatmul.mubr.msk.bf16.gmra.mrb[48].mxu0 %vm963_vm1, %v3789_v36  ;;  %v3768_v23 = vadd.f32 %v3696_v5, %v8644_v56  ;;  %v8657_v49 = vld [vmem:[#allocation36_spill] sm:$0xff]  ;;  %v8659_v56 = vld [vmem:[#allocation38_spill] sm:$0xff] }
 0x61c   : > { %v3691_v51 = vadd.f32 %v3690_v2, %v7882_v12  ;;  %v3766_v24 = vadd.f32 %v3688_v62, %v8646_v15  ;;  %v8658_v2 = vld [vmem:[#allocation37_spill] sm:$0xff]  ;;  %v8660_v15 = vmov 0.0  }
 0x61d   : > { %v3769_v21 = vadd.f32 %v3699_v7, %v8645_v25 }
 0x61e   : > { %v3767_v0 = vadd.f32 %v3691_v51, %v8647_v50 }
 0x61f   : > { %v3791_v22 = vpack.c.bf16 %v3769_v21, %v3768_v23 }
 0x620   : > { %v3790_v45 = vpack.c.bf16 %v3767_v0, %v3766_v24  ;;  %v4947_v3 = vpop.f32.mrb[56].mxu1  ;;  %v4314_v24 = vld [vmem:[%s8250_s9 + $0x8] sm:$0xff]  ;;  %v4315_v0 = vld [vmem:[%s8250_s9 + $0x10] sm:$0xff] }
 0x621   : > { %v3712_v63 = vadd.f32 %v4947_v3, %v7882_v12  ;;  %v3703_v29 = vpop.f32.mrb[57].mxu1  ;;  %v4317_v3 = vld [vmem:[%s8250_s9 + $0x20] sm:$0xff] }
 0x622   : > { %v3704_v10 = vadd.f32 %v3703_v29, %v7882_v12  ;;  %v4948_v39 = vpop.f32.mrb[58].mxu1  ;;  %4975 = vmatprep.mubr.msk.bf16.mxu0 %vm963_vm1, %v3790_v45  ;;  %v4319_v29 = vld [vmem:[%s8250_s9 + $0x30] sm:$0xff] }
 0x623   : > { %v3715_v41 = vadd.f32 %v4948_v39, %v7882_v12  ;;  %v3706_v34 = vpop.f32.mrb[59].mxu1  ;;  %4976 = vmatmul.mubr.msk.bf16.gmra.mrb[52].mxu0 %vm963_vm1, %v3791_v22  ;;  %v3772_v57 = vadd.f32 %v3712_v63, %v8648_v28  ;;  %v4316_v22 = vld [vmem:[%s8250_s9 + $0x18] sm:$0xff]  ;;  %v4318_v63 = vld [vmem:[%s8250_s9 + $0x28] sm:$0xff] }
 0x624   : > { %v3707_v54 = vadd.f32 %v3706_v34, %v7882_v12  ;;  %v3770_v26 = vadd.f32 %v3704_v10, %v8650_v55  ;;  %v5026_v45 = vpack.c.bf16 %v4316_v22, %v4315_v0  ;;  %v5029_v10 = vpack.c.bf16 %v4318_v63, %v4317_v3  ;;  %v4320_v39 = vld [vmem:[%s8250_s9 + $0x38] sm:$0xff] }
 0x625   : > { %v3773_v1 = vadd.f32 %v3715_v41, %v8649_v20  ;;  %v5032_v41 = vpack.c.bf16 %v4320_v39, %v4319_v29  ;;  %v8661_v34 = vsub.s32 7, %v8626_v58 }
 0x626   : > { %v3771_v40 = vadd.f32 %v3707_v54, %v8651_v61 }
 0x627   : > { %v3793_v18 = vpack.c.bf16 %v3773_v1, %v3772_v57  ;;  %v7996_v54 = vrot.slane %v7810_v30, %v8661_v34 }
 0x628   : > { %v3792_v42 = vpack.c.bf16 %v3771_v40, %v3770_v26  ;;  %v4951_v27 = vpop.f32.mrb[60].mxu1 }
 0x629   : > { %v3728_v16 = vadd.f32 %v4951_v27, %v7882_v12  ;;  %v3719_v32 = vpop.f32.mrb[61].mxu1 }
 0x62a   : > { %v3720_v59 = vadd.f32 %v3719_v32, %v7882_v12  ;;  %v4952_v35 = vpop.f32.mrb[62].mxu1  ;;  %4979 = vmatprep.mubr.msk.bf16.mxu0 %vm963_vm1, %v3792_v42 }
 0x62b   : > { %v3731_v9 = vadd.f32 %v4952_v35, %v7882_v12  ;;  %v3722_v43 = vpop.f32.mrb[63].mxu1  ;;  %4980 = vmatmul.mubr.msk.bf16.gmra.mrb[56].mxu0 %vm963_vm1, %v3793_v18  ;;  %v3776_v33 = vadd.f32 %v3728_v16, %v8652_v8 }
 0x62c   : > { %v3723_v47 = vadd.f32 %v3722_v43, %v7882_v12  ;;  %v3774_v13 = vadd.f32 %v3720_v59, %v8654_v6 }
 0x62d   : > { %v3777_v46 = vadd.f32 %v3731_v9, %v8653_v14 }
 0x62e   : > { %v3775_v37 = vadd.f32 %v3723_v47, %v8655_v52 }
 0x62f   : > { %v3795_v11 = vpack.c.bf16 %v3777_v46, %v3776_v33 }
 0x630   : > { %v3794_v31 = vpack.c.bf16 %v3775_v37, %v3774_v13  ;;  %v4955_v19 = vpop.f32.mrb[64].mxu1 }
 0x631   : > { %v3744_v60 = vadd.f32 %v4955_v19, %v7882_v12  ;;  %v3735_v17 = vpop.f32.mrb[65].mxu1 }
 0x632   : > { %v3736_v53 = vadd.f32 %v3735_v17, %v7882_v12  ;;  %v4956_v36 = vpop.f32.mrb[66].mxu1  ;;  %4983 = vmatprep.mubr.msk.bf16.mxu0 %vm963_vm1, %v3794_v31 }
 0x633   : > { %v3747_v4 = vadd.f32 %v4956_v36, %v7882_v12  ;;  %v3738_v38 = vpop.f32.mrb[67].mxu1  ;;  %4984 = vmatmul.mubr.msk.bf16.gmra.mrb[60].mxu0 %vm963_vm1, %v3795_v11  ;;  %v3780_v62 = vadd.f32 %v3744_v60, %v8656_v48 }
 0x634   : > { %v3739_v5 = vadd.f32 %v3738_v38, %v7882_v12  ;;  %v3778_v51 = vadd.f32 %v3736_v53, %v8658_v2  ;;  %v4313_v12 = vld [vmem:[%s8250_s9] sm:$0xff] }
 0x635   : > { %v3781_v7 = vadd.f32 %v3747_v4, %v8657_v49  ;;  %v5023_v50 = vpack.c.bf16 %v4314_v24, %v4313_v12 }
 0x636   : > { %v3779_v23 = vadd.f32 %v3739_v5, %v8659_v56 }
 0x637   : > { %v3797_v25 = vpack.c.bf16 %v3781_v7, %v3780_v62  ;;  %5024 = vmatpush3.bf16.msra.mxu0 %v5023_v50 }
 0x638   : > { %v3796_v21 = vpack.c.bf16 %v3779_v23, %v3778_v51  ;;  %5025 = vmatprep.subr.bf16.mxu0 %v8625_v44 }
 0x63a   : > { %4987 = vmatprep.mubr.msk.bf16.mxu0 %vm963_vm1, %v3796_v21 }
 0x63b   : > { %4988 = vmatmul.mubr.msk.bf16.gmra.mrb[64].mxu0 %vm963_vm1, %v3797_v25 }
 0x63c   : > { %5007 = vmatprep.mubr.msk.f32.mxu0 %vm5687_vm6, %v8660_v15  ;;  %5027 = vmatpush3.bf16.msra.mxu0 %v5026_v45 }
 0x63d   : > { %5028 = vmatprep.subr.bf16.mxu0 %v8625_v44 }
 0x640   : > { %5030 = vmatpush3.bf16.msra.mxu0 %v5029_v10 }
 0x641   : > { %5031 = vmatprep.subr.bf16.mxu0 %v8625_v44 }
 0x644   : > { %5033 = vmatpush3.bf16.msra.mxu0 %v5032_v41 }
 0x6d6   : > { %v4961_v28 = vpop.f32.mrb[36].mxu0 }
 0x6d7   : > { %v7999_v57 = vadd.f32 %v4961_v28, %v7996_v54  ;;  %v3892_v20 = vpop.f32.mrb[37].mxu0 }
 0x6d8   : > { %v8002_v1 = vadd.f32 %v3892_v20, %v7996_v54  ;;  %v4962_v55 = vpop.f32.mrb[38].mxu0 }
 0x6d9   : > { %v4696_v26 = vmul.f32 -1.442695, %v7999_v57  ;;  %v8006_v61 = vadd.f32 %v4962_v55, %v7996_v54  ;;  %v3895_v44 = vpop.f32.mrb[39].mxu0 }
 0x6da   : > { %v4694_v58 = vmul.f32 -1.442695, %v8002_v1  ;;  %v8010_v30 = vadd.f32 %v3895_v44, %v7996_v54 }
 0x6db   : > { %5492 = vpow2.f32 %v4696_v26  ;;  %v4697_v40 = vmul.f32 -1.442695, %v8006_v61 }
 0x6dc   : > { %5494 = vpow2.f32 %v4694_v58  ;;  %v4695_v18 = vmul.f32 -1.442695, %v8010_v30 }
 0x6dd   : > { %5496 = vpow2.f32 %v4697_v40 }
 0x6de   : > { %5498 = vpow2.f32 %v4695_v18  ;;  %v4965_v42 = vpop.f32.mrb[40].mxu0 }
 0x6df   : > { %v8015_v27 = vadd.f32 %v4965_v42, %v7996_v54  ;;  %v3908_v16 = vpop.f32.mrb[41].mxu0 }
 0x6e0   : > { %v8018_v32 = vadd.f32 %v3908_v16, %v7996_v54  ;;  %v4966_v59 = vpop.f32.mrb[42].mxu0 }
 0x6e1   : > { %v4700_v35 = vmul.f32 -1.442695, %v8015_v27  ;;  %v8022_v9 = vadd.f32 %v4966_v59, %v7996_v54  ;;  %v3911_v43 = vpop.f32.mrb[43].mxu0 }
 0x6e2   : > { %v4698_v47 = vmul.f32 -1.442695, %v8018_v32  ;;  %v8026_v8 = vadd.f32 %v3911_v43, %v7996_v54 }
 0x6e3   : > { %5500 = vpow2.f32 %v4700_v35  ;;  %v4701_v33 = vmul.f32 -1.442695, %v8022_v9 }
 0x6e4   : > { %5502 = vpow2.f32 %v4698_v47  ;;  %v4699_v14 = vmul.f32 -1.442695, %v8026_v8 }
 0x6e5   : > { %v5493_v46 = vpop.eup %5492  ;;  %5504 = vpow2.f32 %v4701_v33 }
 0x6e6   : > { %v5495_v6 = vpop.eup %5494  ;;  %v4117_v13 = vadd.f32 1.0, %v5493_v46  ;;  %5506 = vpow2.f32 %v4699_v14  ;;  %v4969_v52 = vpop.f32.mrb[44].mxu0 }
 0x6e7   : > { %v5497_v37 = vpop.eup %5496  ;;  %v4115_v11 = vadd.f32 1.0, %v5495_v6  ;;  %v8031_v31 = vadd.f32 %v4969_v52, %v7996_v54  ;;  %v3924_v19 = vpop.f32.mrb[45].mxu0 }
 0x6e8   : > { %v5499_v60 = vpop.eup %5498  ;;  %5508 = vrcp.f32 %v4117_v13  ;;  %v4118_v17 = vadd.f32 1.0, %v5497_v37  ;;  %v8034_v53 = vadd.f32 %v3924_v19, %v7996_v54  ;;  %v4970_v36 = vpop.f32.mrb[46].mxu0 }
 0x6e9   : > { %5510 = vrcp.f32 %v4115_v11  ;;  %v4116_v4 = vadd.f32 1.0, %v5499_v60  ;;  %v4704_v38 = vmul.f32 -1.442695, %v8031_v31  ;;  %v8038_v5 = vadd.f32 %v4970_v36, %v7996_v54  ;;  %v3927_v48 = vpop.f32.mrb[47].mxu0 }
 0x6ea   : > { %5512 = vrcp.f32 %v4118_v17  ;;  %v4702_v62 = vmul.f32 -1.442695, %v8034_v53  ;;  %v8042_v49 = vadd.f32 %v3927_v48, %v7996_v54 }
 0x6eb   : > { %5514 = vrcp.f32 %v4116_v4  ;;  %v4705_v7 = vmul.f32 -1.442695, %v8038_v5 }
 0x6ec   : > { %5516 = vpow2.f32 %v4704_v38  ;;  %v4703_v2 = vmul.f32 -1.442695, %v8042_v49 }
 0x6ed   : > { %v5501_v51 = vpop.eup %5500  ;;  %5518 = vpow2.f32 %v4702_v62 }
 0x6ee   : > { %v5503_v56 = vpop.eup %5502  ;;  %v4121_v23 = vadd.f32 1.0, %v5501_v51  ;;  %5520 = vpow2.f32 %v4705_v7  ;;  %v4973_v25 = vpop.f32.mrb[48].mxu0 }
 0x6ef   : > { %v5505_v21 = vpop.eup %5504  ;;  %v4119_v15 = vadd.f32 1.0, %v5503_v56  ;;  %5522 = vpow2.f32 %v4703_v2  ;;  %v8047_v12 = vadd.f32 %v4973_v25, %v7996_v54  ;;  %v3940_v24 = vpop.f32.mrb[49].mxu0 }
 0x6f0   : > { %v5507_v50 = vpop.eup %5506  ;;  %5524 = vrcp.f32 %v4121_v23  ;;  %v4122_v0 = vadd.f32 1.0, %v5505_v21  ;;  %v8050_v22 = vadd.f32 %v3940_v24, %v7996_v54  ;;  %v4974_v45 = vpop.f32.mrb[50].mxu0 }
 0x6f1   : > { %5526 = vrcp.f32 %v4119_v15  ;;  %v4120_v3 = vadd.f32 1.0, %v5507_v50  ;;  %v4708_v63 = vmul.f32 -1.442695, %v8047_v12  ;;  %v8054_v29 = vadd.f32 %v4974_v45, %v7996_v54  ;;  %v3943_v10 = vpop.f32.mrb[51].mxu0 }
 0x6f2   : > { %v5509_v39 = vpop.eup %5508  ;;  %5528 = vrcp.f32 %v4122_v0  ;;  %v4706_v41 = vmul.f32 -1.442695, %v8050_v22  ;;  %v8058_v34 = vadd.f32 %v3943_v10, %v7996_v54 }
 0x6f3   : > { %v5511_v28 = vpop.eup %5510  ;;  %v4213_v20 = vmul.f32 %v5509_v39, %v7999_v57  ;;  %5530 = vrcp.f32 %v4120_v3  ;;  %v4709_v55 = vmul.f32 -1.442695, %v8054_v29 }
 0x6f4   : > { %v5513_v26 = vpop.eup %5512  ;;  %v4211_v44 = vmul.f32 %v5511_v28, %v8002_v1  ;;  %5532 = vpow2.f32 %v4708_v63  ;;  %v4707_v58 = vmul.f32 -1.442695, %v8058_v34 }
 0x6f5   : > { %v5515_v40 = vpop.eup %5514  ;;  %5534 = vpow2.f32 %v4706_v41  ;;  %v4246_v42 = vsel %vm358_vm2, %v4213_v20, 0.0  ;;  %v4214_v57 = vmul.f32 %v5513_v26, %v8006_v61 }
 0x6f6   : > { %v5517_v18 = vpop.eup %5516  ;;  %v4212_v16 = vmul.f32 %v5515_v40, %v8010_v30  ;;  %5536 = vpow2.f32 %v4709_v55  ;;  %v4977_v59 = vpop.f32.mrb[52].mxu0  ;;  %v4243_v14 = vsel %vm358_vm2, %v4211_v44, 0.0 }
 0x6f7   : > { %v5519_v35 = vpop.eup %5518  ;;  %v4125_v43 = vadd.f32 1.0, %v5517_v18  ;;  %5538 = vpow2.f32 %v4707_v58  ;;  %v8068_v47 = vadd.f32 %v4977_v59, %v7996_v54  ;;  %v3956_v1 = vpop.f32.mrb[53].mxu0  ;;  %v4248_v51 = vsel %vm358_vm2, %v4214_v57, 0.0 }
 0x6f8   : > { %v5521_v33 = vpop.eup %5520  ;;  %v4244_v46 = vsel %vm358_vm2, %v4212_v16, 0.0  ;;  %v4123_v6 = vadd.f32 1.0, %v5519_v35  ;;  %v8073_v13 = vadd.f32 %v3956_v1, %v7996_v54  ;;  %v4978_v30 = vpop.f32.mrb[54].mxu0 }
 0x6f9   : > { %v5523_v52 = vpop.eup %5522  ;;  %v4245_v37 = vadd.f32 %v4244_v46, %v4243_v14  ;;  %5540 = vrcp.f32 %v4125_v43  ;;  %v4126_v61 = vadd.f32 1.0, %v5521_v33  ;;  %v4712_v11 = vmul.f32 -1.442695, %v8068_v47  ;;  %v3959_v19 = vpop.f32.mrb[55].mxu0 }
 0x6fa   : > { %v5525_v60 = vpop.eup %5524  ;;  %5542 = vrcp.f32 %v4123_v6  ;;  %v4124_v17 = vadd.f32 1.0, %v5523_v52  ;;  %v4710_v36 = vmul.f32 -1.442695, %v8073_v13  ;;  %v8078_v4 = vadd.f32 %v4978_v30, %v7996_v54 }
 0x6fb   : > { %v5527_v38 = vpop.eup %5526  ;;  %v4247_v48 = vadd.f32 %v4246_v42, %v4245_v37  ;;  %v4217_v62 = vmul.f32 %v5525_v60, %v8015_v27  ;;  %5544 = vrcp.f32 %v4126_v61  ;;  %v8082_v7 = vadd.f32 %v3959_v19, %v7996_v54 }
 0x6fc   : > { %v5529_v2 = vpop.eup %5528  ;;  %v4215_v56 = vmul.f32 %v5527_v38, %v8018_v32  ;;  %5546 = vrcp.f32 %v4124_v17  ;;  %v4713_v23 = vmul.f32 -1.442695, %v8078_v4 }
 0x6fd   : > { %v5531_v25 = vpop.eup %5530  ;;  %v4254_v21 = vsel %vm358_vm2, %v4217_v62, 0.0  ;;  %v4249_v15 = vadd.f32 %v4248_v51, %v4247_v48  ;;  %5548 = vpow2.f32 %v4712_v11  ;;  %v4711_v0 = vmul.f32 -1.442695, %v8082_v7 }
 0x6fe   : > { %v5533_v24 = vpop.eup %5532  ;;  %v4250_v27 = vsel %vm358_vm2, %v4215_v56, 0.0  ;;  %v4216_v50 = vmul.f32 %v5531_v25, %v8026_v8  ;;  %5550 = vpow2.f32 %v4710_v36  ;;  %v4981_v45 = vpop.f32.mrb[56].mxu0  ;;  %v4218_v32 = vmul.f32 %v5529_v2, %v8022_v9 }
 0x6ff   : > { %v5535_v3 = vpop.eup %5534  ;;  %v4251_v63 = vadd.f32 %v4250_v27, %v4249_v15  ;;  %v4129_v10 = vadd.f32 1.0, %v5533_v24  ;;  %5552 = vpow2.f32 %v4713_v23  ;;  %v3972_v39 = vpop.f32.mrb[57].mxu0  ;;  %v8094_v55 = vadd.f32 %v4981_v45, %v7996_v54 }
 0x700   : > { %v5537_v41 = vpop.eup %5536  ;;  %v4252_v28 = vsel %vm358_vm2, %v4216_v50, 0.0  ;;  %v4127_v20 = vadd.f32 1.0, %v5535_v3  ;;  %5554 = vpow2.f32 %v4711_v0  ;;  %v4982_v8 = vpop.f32.mrb[58].mxu0  ;;  %v8097_v40 = vadd.f32 %v3972_v39, %v7996_v54 }
 0x701   : > { %v5539_v26 = vpop.eup %5538  ;;  %v4253_v44 = vadd.f32 %v4252_v28, %v4251_v63  ;;  %5556 = vrcp.f32 %v4129_v10  ;;  %v4130_v58 = vadd.f32 1.0, %v5537_v41  ;;  %v3975_v9 = vpop.f32.mrb[59].mxu0  ;;  %v4716_v42 = vmul.f32 -1.442695, %v8094_v55 }
 0x702   : > { %5558 = vrcp.f32 %v4127_v20  ;;  %v4128_v18 = vadd.f32 1.0, %v5539_v26  ;;  %v8101_v16 = vadd.f32 %v4982_v8, %v7996_v54  ;;  %v4714_v57 = vmul.f32 -1.442695, %v8097_v40 }
 0x703   : > { %v5541_v59 = vpop.eup %5540  ;;  %v4255_v35 = vadd.f32 %v4254_v21, %v4253_v44  ;;  %5560 = vrcp.f32 %v4130_v58  ;;  %v8105_v43 = vadd.f32 %v3975_v9, %v7996_v54  ;;  %v4256_v33 = vsel %vm358_vm2, %v4218_v32, 0.0 }
 0x704   : > { %v5543_v1 = vpop.eup %5542  ;;  %v4221_v14 = vmul.f32 %v5541_v59, %v8031_v31  ;;  %5562 = vrcp.f32 %v4128_v18  ;;  %v4717_v46 = vmul.f32 -1.442695, %v8101_v16 }
 0x705   : > { %v5545_v6 = vpop.eup %5544  ;;  %v4219_v30 = vmul.f32 %v5543_v1, %v8034_v53  ;;  %v4257_v52 = vadd.f32 %v4256_v33, %v4255_v35  ;;  %5564 = vpow2.f32 %v4716_v42  ;;  %v4715_v37 = vmul.f32 -1.442695, %v8105_v43 }
 0x706   : > { %v5547_v61 = vpop.eup %5546  ;;  %v4262_v11 = vsel %vm358_vm2, %v4221_v14, 0.0  ;;  %5566 = vpow2.f32 %v4714_v57  ;;  %v4985_v19 = vpop.f32.mrb[60].mxu0  ;;  %v4222_v62 = vmul.f32 %v5545_v6, %v8038_v5 }
 0x707   : > { %v5549_v60 = vpop.eup %5548  ;;  %v4258_v17 = vsel %vm358_vm2, %v4219_v30, 0.0  ;;  %v4220_v31 = vmul.f32 %v5547_v61, %v8042_v49  ;;  %5568 = vpow2.f32 %v4717_v46  ;;  %v8116_v36 = vadd.f32 %v4985_v19, %v7996_v54  ;;  %v3988_v38 = vpop.f32.mrb[61].mxu0 }
 0x708   : > { %v5551_v53 = vpop.eup %5550  ;;  %v4259_v48 = vadd.f32 %v4258_v17, %v4257_v52  ;;  %v4133_v2 = vadd.f32 1.0, %v5549_v60  ;;  %5570 = vpow2.f32 %v4715_v37  ;;  %v4986_v51 = vpop.f32.mrb[62].mxu0  ;;  %v8122_v49 = vadd.f32 %v3988_v38, %v7996_v54 }
 0x709   : > { %v5553_v56 = vpop.eup %5552  ;;  %v4260_v23 = vsel %vm358_vm2, %v4220_v31, 0.0  ;;  %v4131_v25 = vadd.f32 1.0, %v5551_v53  ;;  %v4720_v21 = vmul.f32 -1.442695, %v8116_v36  ;;  %v3991_v15 = vpop.f32.mrb[63].mxu0  ;;  %v8125_v0 = vadd.f32 %v4986_v51, %v7996_v54 }
 0x70a   : > { %v5555_v24 = vpop.eup %5554  ;;  %v4261_v27 = vadd.f32 %v4260_v23, %v4259_v48  ;;  %5572 = vrcp.f32 %v4133_v2  ;;  %v4134_v50 = vadd.f32 1.0, %v5553_v56  ;;  %v4718_v3 = vmul.f32 -1.442695, %v8122_v49 }
 0x70b   : > { %v5557_v5 = vpop.eup %5556  ;;  %5574 = vrcp.f32 %v4131_v25  ;;  %v4132_v45 = vadd.f32 1.0, %v5555_v24  ;;  %v8129_v63 = vadd.f32 %v3991_v15, %v7996_v54  ;;  %v4721_v41 = vmul.f32 -1.442695, %v8125_v0 }
 0x70c   : > { %v5559_v32 = vpop.eup %5558  ;;  %v4263_v10 = vadd.f32 %v4262_v11, %v4261_v27  ;;  %v4225_v39 = vmul.f32 %v5557_v5, %v8047_v12  ;;  %5576 = vrcp.f32 %v4134_v50  ;;  %v4264_v20 = vsel %vm358_vm2, %v4222_v62, 0.0 }
 0x70d   : > { %v5561_v28 = vpop.eup %5560  ;;  %v4223_v8 = vmul.f32 %v5559_v32, %v8050_v22  ;;  %5578 = vrcp.f32 %v4132_v45  ;;  %v4719_v26 = vmul.f32 -1.442695, %v8129_v63 }
 0x70e   : > { %v5563_v44 = vpop.eup %5562  ;;  %v4270_v58 = vsel %vm358_vm2, %v4225_v39, 0.0  ;;  %v4265_v9 = vadd.f32 %v4264_v20, %v4263_v10  ;;  %5580 = vpow2.f32 %v4720_v21  ;;  %v4989_v18 = vpop.f32.mrb[64].mxu0  ;;  %v4226_v33 = vmul.f32 %v5561_v28, %v8054_v29 }
 0x70f   : > { %v5565_v42 = vpop.eup %5564  ;;  %v4266_v12 = vsel %vm358_vm2, %v4223_v8, 0.0  ;;  %v4224_v59 = vmul.f32 %v5563_v44, %v8058_v34  ;;  %5582 = vpow2.f32 %v4718_v3  ;;  %v8140_v35 = vadd.f32 %v4989_v18, %v7996_v54  ;;  %v4004_v57 = vpop.f32.mrb[65].mxu0 }
 0x710   : > { %v5567_v22 = vpop.eup %5566  ;;  %v4267_v1 = vadd.f32 %v4266_v12, %v4265_v9  ;;  %v4137_v14 = vadd.f32 1.0, %v5565_v42  ;;  %5584 = vpow2.f32 %v4721_v41  ;;  %v4990_v46 = vpop.f32.mrb[66].mxu0  ;;  %v8146_v60 = vadd.f32 %v4004_v57, %v7996_v54 }
 0x711   : > { %v5569_v6 = vpop.eup %5568  ;;  %v4268_v30 = vsel %vm358_vm2, %v4224_v59, 0.0  ;;  %v4135_v52 = vadd.f32 1.0, %v5567_v22  ;;  %5586 = vpow2.f32 %v4719_v26  ;;  %v4724_v37 = vmul.f32 -1.442695, %v8140_v35  ;;  %v4007_v34 = vpop.f32.mrb[67].mxu0 }
 0x712   : > { %v5571_v61 = vpop.eup %5570  ;;  %v4269_v11 = vadd.f32 %v4268_v30, %v4267_v1  ;;  %5588 = vrcp.f32 %v4137_v14  ;;  %v4138_v19 = vadd.f32 1.0, %v5569_v6  ;;  %v8149_v17 = vadd.f32 %v4990_v46, %v7996_v54 }
 0x713   : > { %5590 = vrcp.f32 %v4135_v52  ;;  %v4136_v29 = vadd.f32 1.0, %v5571_v61  ;;  %v8152_v31 = vadd.f32 %v4007_v34, %v7996_v54  ;;  %v4722_v48 = vmul.f32 -1.442695, %v8146_v60 }
 0x714   : > { %v5573_v38 = vpop.eup %5572  ;;  %v4271_v53 = vadd.f32 %v4270_v58, %v4269_v11  ;;  %5592 = vrcp.f32 %v4138_v19  ;;  %v4272_v2 = vsel %vm358_vm2, %v4226_v33, 0.0  ;;  %v4725_v51 = vmul.f32 -1.442695, %v8149_v17 }
 0x715   : > { %v5575_v62 = vpop.eup %5574  ;;  %5594 = vrcp.f32 %v4136_v29  ;;  %v4723_v56 = vmul.f32 -1.442695, %v8152_v31  ;;  %v4229_v24 = vmul.f32 %v5573_v38, %v8068_v47 }
 0x716   : > { %v5577_v23 = vpop.eup %5576  ;;  %v4227_v25 = vmul.f32 %v5575_v62, %v8073_v13  ;;  %v4273_v21 = vadd.f32 %v4272_v2, %v4271_v53  ;;  %5596 = vpow2.f32 %v4724_v37 }
 0x717   : > { %v5579_v54 = vpop.eup %5578  ;;  %5598 = vpow2.f32 %v4722_v48  ;;  %v4230_v10 = vmul.f32 %v5577_v23, %v8078_v4  ;;  %v4278_v8 = vsel %vm358_vm2, %v4229_v24, 0.0 }
 0x718   : > { %v5581_v15 = vpop.eup %5580  ;;  %v4274_v27 = vsel %vm358_vm2, %v4227_v25, 0.0  ;;  %v4228_v50 = vmul.f32 %v5579_v54, %v8082_v7  ;;  %5600 = vpow2.f32 %v4725_v51 }
 0x719   : > { %v5583_v5 = vpop.eup %5582  ;;  %v4275_v45 = vadd.f32 %v4274_v27, %v4273_v21  ;;  %v4141_v3 = vadd.f32 1.0, %v5581_v15  ;;  %5602 = vpow2.f32 %v4723_v56  ;;  %v4280_v9 = vsel %vm358_vm2, %v4230_v10, 0.0 }
 0x71a   : > { %v5585_v32 = vpop.eup %5584  ;;  %v4276_v13 = vsel %vm358_vm2, %v4228_v50, 0.0  ;;  %v4139_v39 = vadd.f32 1.0, %v5583_v5 }
 0x71b   : > { %v5587_v41 = vpop.eup %5586  ;;  %v4277_v28 = vadd.f32 %v4276_v13, %v4275_v45  ;;  %5604 = vrcp.f32 %v4141_v3  ;;  %v4142_v20 = vadd.f32 1.0, %v5585_v32 }
 0x71c   : > { %v5589_v47 = vpop.eup %5588  ;;  %5606 = vrcp.f32 %v4139_v39  ;;  %v4140_v7 = vadd.f32 1.0, %v5587_v41 }
 0x71d   : > { %v5591_v26 = vpop.eup %5590  ;;  %v4279_v44 = vadd.f32 %v4278_v8, %v4277_v28  ;;  %5608 = vrcp.f32 %v4142_v20  ;;  %v4233_v59 = vmul.f32 %v5589_v47, %v8094_v55 }
 0x71e   : > { %v5593_v58 = vpop.eup %5592  ;;  %v4231_v4 = vmul.f32 %v5591_v26, %v8097_v40  ;;  %5610 = vrcp.f32 %v4140_v7 }
 0x71f   : > { %v5595_v18 = vpop.eup %5594  ;;  %v4281_v42 = vadd.f32 %v4280_v9, %v4279_v44  ;;  %v4234_v6 = vmul.f32 %v5593_v58, %v8101_v16  ;;  %v4286_v61 = vsel %vm358_vm2, %v4233_v59, 0.0 }
 0x720   : > { %v5597_v12 = vpop.eup %5596  ;;  %v4282_v57 = vsel %vm358_vm2, %v4231_v4, 0.0  ;;  %v4232_v22 = vmul.f32 %v5595_v18, %v8105_v43 }
 0x721   : > { %v5599_v1 = vpop.eup %5598  ;;  %v4283_v33 = vadd.f32 %v4282_v57, %v4281_v42  ;;  %v4145_v14 = vadd.f32 1.0, %v5597_v12  ;;  %v4288_v29 = vsel %vm358_vm2, %v4234_v6, 0.0 }
 0x722   : > { %v5601_v46 = vpop.eup %5600  ;;  %v4284_v30 = vsel %vm358_vm2, %v4232_v22, 0.0  ;;  %v4143_v52 = vadd.f32 1.0, %v5599_v1 }
 0x723   : > { %v5603_v40 = vpop.eup %5602  ;;  %v4285_v37 = vadd.f32 %v4284_v30, %v4283_v33  ;;  %5612 = vrcp.f32 %v4145_v14  ;;  %v4146_v34 = vadd.f32 1.0, %v5601_v46 }
 0x724   : > { %5614 = vrcp.f32 %v4143_v52  ;;  %v4144_v55 = vadd.f32 1.0, %v5603_v40 }
 0x725   : > { %v5605_v11 = vpop.eup %5604  ;;  %v4287_v19 = vadd.f32 %v4286_v61, %v4285_v37  ;;  %5616 = vrcp.f32 %v4146_v34 }
 0x726   : > { %v5607_v43 = vpop.eup %5606  ;;  %5618 = vrcp.f32 %v4144_v55  ;;  %v4237_v62 = vmul.f32 %v5605_v11, %v8116_v36 }
 0x727   : > { %v5609_v38 = vpop.eup %5608  ;;  %v4235_v16 = vmul.f32 %v5607_v43, %v8122_v49  ;;  %v4289_v53 = vadd.f32 %v4288_v29, %v4287_v19 }
 0x728   : > { %v5611_v48 = vpop.eup %5610  ;;  %v4238_v23 = vmul.f32 %v5609_v38, %v8125_v0  ;;  %v4294_v15 = vsel %vm358_vm2, %v4237_v62, 0.0 }
 0x729   : > { %v4290_v2 = vsel %vm358_vm2, %v4235_v16, 0.0  ;;  %v4236_v51 = vmul.f32 %v5611_v48, %v8129_v63 }
 0x72a   : > { %v4291_v56 = vadd.f32 %v4290_v2, %v4289_v53  ;;  %v4296_v50 = vsel %vm358_vm2, %v4238_v23, 0.0 }
 0x72b   : > { %v4292_v25 = vsel %vm358_vm2, %v4236_v51, 0.0 }
 0x72c   : > { %v4293_v21 = vadd.f32 %v4292_v25, %v4291_v56 }
 0x72d   : > { %v5613_v54 = vpop.eup %5612 }
 0x72e   : > { %v5615_v24 = vpop.eup %5614  ;;  %v4295_v27 = vadd.f32 %v4294_v15, %v4293_v21  ;;  %v4241_v63 = vmul.f32 %v5613_v54, %v8140_v35 }
 0x72f   : > { %v5617_v49 = vpop.eup %5616  ;;  %v4239_v36 = vmul.f32 %v5615_v24, %v8146_v60 }
 0x730   : > { %v5619_v5 = vpop.eup %5618  ;;  %v4297_v45 = vadd.f32 %v4296_v50, %v4295_v27  ;;  %v4242_v10 = vmul.f32 %v5617_v49, %v8149_v17  ;;  %v4302_v41 = vsel %vm358_vm2, %v4241_v63, 0.0  ;;  %v368_v17 = vld [vmem:[%s8242_s1 + $0x8] sm:$0xff] }
 0x731   : > { %v4298_v3 = vsel %vm358_vm2, %v4239_v36, 0.0  ;;  %v4240_v0 = vmul.f32 %v5619_v5, %v8152_v31 }
 0x732   : > { %v4299_v32 = vadd.f32 %v4298_v3, %v4297_v45  ;;  %v4304_v60 = vsel %vm358_vm2, %v4242_v10, 0.0 }
 0x733   : > { %v4300_v13 = vsel %vm358_vm2, %v4240_v0, 0.0 }
 0x734   : > { %v4301_v39 = vadd.f32 %v4300_v13, %v4299_v32 }
 0x736   : > { %v4303_v28 = vadd.f32 %v4302_v41, %v4301_v39 }
 0x738   : > { %v4305_v20 = vadd.f32 %v4304_v60, %v4303_v28 }
 0x73a   : > { %v4306_v47 = vrot.slane %v4305_v20, 4 }
 0x73c   : > { %v4307_v35 = vadd.f32 %v4306_v47, %v4305_v20 }
 0x73e   : > { %v4308_v8 = vrot.slane %v4307_v35, 2 }
 0x740   : > { %v4309_v7 = vadd.f32 %v4308_v8, %v4307_v35 }
 0x742   : > { %v4310_v26 = vrot.slane %v4309_v7, 1 }
 0x744   : > { %v4311_v31 = vadd.f32 %v4310_v26, %v4309_v7 }
 0x746   : > { %v4312_v44 = vmul.f32 0.00390625, %v4311_v31 }
 0x748   : > { %5008 = vmatmul.mubr.msk.f32.vlgmr.msra.gmra.mrb[34].mxu0 %vm358_vm2, %v4312_v44 }
 0x81b   : > { %v4390_v58 = vpop.f32.mrb[34].mxu0 }
 0x81c   : > { %v4391_v9 = vadd.f32 %v4390_v58, %v368_v17  ;;  %v5009_v4 = vpop.f32.mrb[35].mxu0 }
 0x81e   : > { %4394 = vst [vmem:[%s351_s26] sm:$0x1] %v4391_v9 }
 0x81f   : > { %5634 = shalt.err (!%p5631_p3)
}
 0x820   : > { %s5635_s18 = scalar_lea.hbm %s8199_s30, 16  ;;  %s5639_s28 = scalar_lea.hbm %s8251_s10, 32 }
 0x821   : > { %p5636_p4 = scmp.ne.s32.totalorder %s8199_s30, %s5635_s18  ;;  %p5640_p9 = scmp.lt.u32.totalorder %s8199_s30, %s8251_s10 }
 0x822   : > { %p5641_p10 = scmp.lt.u32.totalorder %s5639_s28, %s5635_s18  ;;  %p5643_p12 = scmp.lt.u32.totalorder %s5635_s18, %s8199_s30 }
 0x823   : > { %p5637_p7 = pnand %p5636_p4, %p5782_p5 }
 0x824   : > { %p5642_p11 = por %p5641_p10, %p5640_p9 }
 0x825   : > { %p5638_p8 = pneg %p5637_p7 }
 0x826   : > { %p5644_p13 = por %p5643_p12, %p5642_p11 }
 0x828   : > { %p5645_p0 = pnand %p5644_p13, %p5638_p8 }
 0x82a   : > { %5648 = shalt.err (!%p5645_p0)
}
 0x82b   : > { %5034 = dma.vmem_to_hbm [thread:$0]  (%p5782_p5), %s8201_s27, 16, %s8199_s30, %s4396_s11  }
 0x82c PF: > { %p5040_p1 = scmp.ge.s32.totalorder %s5683_s16, 2  ;;  %s4420_s12 = sand.u32 1, %s5671_s13  }
 0x82d   : > { %s4421_s20 = scalar_lea.sflag [#allocation4], %s4420_s12 }
 0x82e   : > { %p5037_p2 = pnand %p5040_p1, %p5786_p6 }
 0x830   : > { %5666 = dma.done.wait (!%p5037_p2), %s4421_s20, 16  }
 0x831   : > { %5668 = vsyncadd (!%p5037_p2), %s4421_s20, 4294967280  ;;  %p20_p3 = scmp.ge.s32.totalorder %s5769_s19, 4   ;;  %s8662_s13 = smov %s5675_s14 }
 0x832   : > { %s8663_s14 = smov %s5679_s15  ;;  %s8664_s15 = smov %s5780_s22 }
 0x833   : > { %s8665_s16 = smov %s5769_s19  ;;  %22 = sbr.rel (!%p20_p3) target bundleno = 3 (0x3), region = 95 }
 0x83a   :  { %4425 = vsyncpa [#allocation4], 1 }
 0x83b   :  { %4427 = vsyncpa [#allocation4 + $0x1], 1 }

</bundles_post_ra>
